<compile_context>
chip_gen: v7x
topology: tpu7x:2x2x1
jax: 0.10.0
libtpu: 0.0.40
codegen_flags: <defaults>
</compile_context>

<pallas_src>
import jax
import jax.numpy as jnp
from jax.experimental import pallas as pl
from jax.experimental.pallas import tpu as pltpu

IN_FEATURES = 2064
PADDED_IN = 2176          # 17 * 128 — lane-aligned K for the first matmul
HIDDEN = 512
OUT_FEATURES = 1


def _round_up(x, m):
    return (x + m - 1) // m * m


def _mlp_kernel(x_ref,
                w0_ref, b0_ref,
                w1_ref, b1_ref, a1_ref,
                w2_ref, b2_ref, a2_ref,
                w3_ref, b3_ref,
                o_ref):
    # input layer: Linear(2176(padded 2064) -> 512), no activation
    x = x_ref[...].astype(w0_ref.dtype)
    h0 = jnp.dot(x, w0_ref[...], preferred_element_type=jnp.float32) + b0_ref[...]

    # layer1 + PReLU(512)
    h1 = jnp.dot(h0.astype(w1_ref.dtype), w1_ref[...],
                 preferred_element_type=jnp.float32) + b1_ref[...]
    h1 = jnp.where(h1 >= 0, h1, a1_ref[...] * h1)

    # layer2 + PReLU(512)
    h2 = jnp.dot(h1.astype(w2_ref.dtype), w2_ref[...],
                 preferred_element_type=jnp.float32) + b2_ref[...]
    h2 = jnp.where(h2 >= 0, h2, a2_ref[...] * h2)

    # output layer: Linear(512 -> 1) as VPU multiply + XLU lane-reduction
    # (keeps the MXU free; w3 is a (1, 512) f32 row).
    y = jnp.sum(h2 * w3_ref[...], axis=-1, keepdims=True) + b3_ref[...]
    o_ref[...] = y.astype(o_ref.dtype)


def network_forward(x, p, *, tb=256):
    """x: (B, 2064) float32, p: output of prepare_params -> (B, 1) float32."""
    B = x.shape[0]
    tb = min(tb, _round_up(B, 8))           # small batches: one tile of B rows
    Bp = _round_up(B, tb)                   # pad batch to a multiple of the tile
    xp = jnp.pad(x, ((0, Bp - B), (0, PADDED_IN - IN_FEATURES)))

    grid = (Bp // tb,)
    const2 = lambda i: (0, 0)               # weights/biases resident across grid

    in_specs = [
        pl.BlockSpec((tb, PADDED_IN), lambda i: (i, 0)),        # x tile
        pl.BlockSpec((PADDED_IN, HIDDEN), const2),              # w0 (bf16)
        pl.BlockSpec((1, HIDDEN), const2),                      # b0
        pl.BlockSpec((HIDDEN, HIDDEN), const2),                 # w1 (bf16)
        pl.BlockSpec((1, HIDDEN), const2),                      # b1
        pl.BlockSpec((1, HIDDEN), const2),                      # a1
        pl.BlockSpec((HIDDEN, HIDDEN), const2),                 # w2 (bf16)
        pl.BlockSpec((1, HIDDEN), const2),                      # b2
        pl.BlockSpec((1, HIDDEN), const2),                      # a2
        pl.BlockSpec((1, HIDDEN), const2),                      # w3 row (f32)
        pl.BlockSpec((1, 1), const2),                           # b3
    ]
    out_specs = pl.BlockSpec((tb, OUT_FEATURES), lambda i: (i, 0))

    wbytes = jnp.dtype(p["w0"].dtype).itemsize
    flops = 2 * Bp * (PADDED_IN * HIDDEN + 2 * HIDDEN * HIDDEN + HIDDEN)
    bytes_accessed = (
        Bp * PADDED_IN * 4 + Bp * OUT_FEATURES * 4
        + (PADDED_IN * HIDDEN + 2 * HIDDEN * HIDDEN) * wbytes
        + 7 * HIDDEN * 4 + 4)

    y = pl.pallas_call(
        _mlp_kernel,
        out_shape=jax.ShapeDtypeStruct((Bp, OUT_FEATURES), jnp.float32),
        grid=grid,
        in_specs=in_specs,
        out_specs=out_specs,
        compiler_params=pltpu.CompilerParams(
            dimension_semantics=("parallel",),   # v7x: shard batch over both TCs
            vmem_limit_bytes=32 << 20,           # actual footprint ~<12 MiB @ TB=256
        ),
        cost_estimate=pl.CostEstimate(
            flops=flops, transcendentals=0, bytes_accessed=bytes_accessed),
    )(xp,
      p["w0"], p["b0"],
      p["w1"], p["b1"], p["a1"],
      p["w2"], p["b2"], p["a2"],
      p["w3"], p["b3"])
    return y[:B]


def init_params(key):
    """Deterministic init mimicking torch.nn.Linear.reset_parameters
    (uniform(-1/sqrt(fan_in), 1/sqrt(fan_in))) and PReLU(init=0.25).
    Weights are stored (in, out), i.e. transposed vs torch Linear.weight."""
    def linear(key, fan_in, fan_out):
        kw, kb = jax.random.split(key)
        bound = 1.0 / jnp.sqrt(jnp.float32(fan_in))
        w = jax.random.uniform(kw, (fan_in, fan_out), jnp.float32, -bound, bound)
        b = jax.random.uniform(kb, (1, fan_out), jnp.float32, -bound, bound)
        return w, b

    k0, k1, k2, k3 = jax.random.split(key, 4)
    w0, b0 = linear(k0, IN_FEATURES, HIDDEN)
    w1, b1 = linear(k1, HIDDEN, HIDDEN)
    w2, b2 = linear(k2, HIDDEN, HIDDEN)
    w3, b3 = linear(k3, HIDDEN, OUT_FEATURES)
    a1 = jnp.full((1, HIDDEN), 0.25, jnp.float32)   # PReLU(n) default init
    a2 = jnp.full((1, HIDDEN), 0.25, jnp.float32)
    return dict(w0=w0, b0=b0, w1=w1, b1=b1, a1=a1,
                w2=w2, b2=b2, a2=a2, w3=w3, b3=b3)


def prepare_params(params, weight_dtype=jnp.bfloat16):
    """Pack params into the kernel layout:
       - w0 rows zero-padded 2064 -> 2176; w0/w1/w2 cast to weight_dtype
         (bf16 halves the dominant HBM weight traffic; accumulation stays f32),
       - the 512 -> 1 output weight kept as an f32 (1, 512) row for the lane
         reduction; biases / PReLU alphas stay f32 (1, out)."""
    w0 = jnp.pad(params["w0"], ((0, PADDED_IN - IN_FEATURES), (0, 0)))
    return dict(
        w0=w0.astype(weight_dtype), b0=params["b0"],
        w1=params["w1"].astype(weight_dtype), b1=params["b1"], a1=params["a1"],
        w2=params["w2"].astype(weight_dtype), b2=params["b2"], a2=params["a2"],
        w3=params["w3"].reshape(1, HIDDEN).astype(jnp.float32),
        b3=params["b3"].reshape(1, 1),
    )


def _reference_forward(x, p):
    """Pure-JAX reference performing the same (bf16-weight, f32-accum) math."""
    xp = jnp.pad(x, ((0, 0), (0, PADDED_IN - IN_FEATURES)))
    h0 = jnp.dot(xp.astype(p["w0"].dtype), p["w0"],
                 preferred_element_type=jnp.float32) + p["b0"]
    h1 = jnp.dot(h0.astype(p["w1"].dtype), p["w1"],
                 preferred_element_type=jnp.float32) + p["b1"]
    h1 = jnp.where(h1 >= 0, h1, p["a1"] * h1)
    h2 = jnp.dot(h1.astype(p["w2"].dtype), p["w2"],
                 preferred_element_type=jnp.float32) + p["b2"]
    h2 = jnp.where(h2 >= 0, h2, p["a2"] * h2)
    return jnp.sum(h2 * p["w3"], axis=-1, keepdims=True) + p["b3"]


if __name__ == "__main__":
    key = jax.random.PRNGKey(0)
    k_params, k_x1, k_x2 = jax.random.split(key, 3)

    raw = init_params(k_params)
    packed = prepare_params(raw)          # bf16 weights, K padded to 2176

    # 1) tiny batch: single grid step, batch padded up to a sublane multiple
    x1 = jax.random.normal(k_x1, (8, IN_FEATURES), jnp.float32)
    y1 = jax.block_until_ready(network_forward(x1, packed))
    assert y1.shape == (8, OUT_FEATURES)
    assert jnp.allclose(y1, _reference_forward(x1, packed), atol=1e-4, rtol=1e-3), \
        "mismatch vs JAX reference (B=8)"

    # 2) batch that is not a multiple of the tile: multi-step grid, resident
    #    weights across steps, padded rows trimmed.
    x2 = jax.random.normal(k_x2, (96, IN_FEATURES), jnp.float32)
    y2 = jax.block_until_ready(network_forward(x2, packed, tb=64))
    assert y2.shape == (96, OUT_FEATURES)
    assert jnp.allclose(y2, _reference_forward(x2, packed), atol=1e-4, rtol=1e-3), \
        "mismatch vs JAX reference (B=96, tb=64)"

    print("KERNEL_OK")
</pallas_src>

<mosaic_0001>
module attributes {stable_mosaic.version = 11 : i64} {
  func.func @_mlp_kernel(%arg0: i32, %arg1: memref<8x2176xf32, #tpu.memory_space<vmem>>, %arg2: memref<2176x512xbf16, #tpu.memory_space<vmem>>, %arg3: memref<1x512xf32, #tpu.memory_space<vmem>>, %arg4: memref<512x512xbf16, #tpu.memory_space<vmem>>, %arg5: memref<1x512xf32, #tpu.memory_space<vmem>>, %arg6: memref<1x512xf32, #tpu.memory_space<vmem>>, %arg7: memref<512x512xbf16, #tpu.memory_space<vmem>>, %arg8: memref<1x512xf32, #tpu.memory_space<vmem>>, %arg9: memref<1x512xf32, #tpu.memory_space<vmem>>, %arg10: memref<1x512xf32, #tpu.memory_space<vmem>>, %arg11: memref<1x1xf32, #tpu.memory_space<vmem>>, %arg12: memref<8x1xf32, #tpu.memory_space<vmem>>) attributes {dimension_semantics = [#tpu.dimension_semantics<parallel>], iteration_bounds = array<i64: 1>, scalar_prefetch = 0 : i64, scratch_operands = 0 : i64, tpu.core_type = #tpu.core_type<tc>, window_params = [{transform_indices = @transform_0, window_bounds = array<i64: 8, 2176>}, {pipeline_mode = #tpu.pipeline_mode<synchronous>, transform_indices = @transform_1, window_bounds = array<i64: 2176, 512>}, {pipeline_mode = #tpu.pipeline_mode<synchronous>, transform_indices = @transform_2, window_bounds = array<i64: 1, 512>}, {pipeline_mode = #tpu.pipeline_mode<synchronous>, transform_indices = @transform_3, window_bounds = array<i64: 512, 512>}, {pipeline_mode = #tpu.pipeline_mode<synchronous>, transform_indices = @transform_4, window_bounds = array<i64: 1, 512>}, {pipeline_mode = #tpu.pipeline_mode<synchronous>, transform_indices = @transform_5, window_bounds = array<i64: 1, 512>}, {pipeline_mode = #tpu.pipeline_mode<synchronous>, transform_indices = @transform_6, window_bounds = array<i64: 512, 512>}, {pipeline_mode = #tpu.pipeline_mode<synchronous>, transform_indices = @transform_7, window_bounds = array<i64: 1, 512>}, {pipeline_mode = #tpu.pipeline_mode<synchronous>, transform_indices = @transform_8, window_bounds = array<i64: 1, 512>}, {pipeline_mode = #tpu.pipeline_mode<synchronous>, transform_indices = @transform_9, window_bounds = array<i64: 1, 512>}, {pipeline_mode = #tpu.pipeline_mode<synchronous>, transform_indices = @transform_10, window_bounds = array<i64: 1, 1>}, {transform_indices = @transform_11, window_bounds = array<i64: 8, 1>}]} {
    %c0 = arith.constant 0 : index
    %c0_0 = arith.constant 0 : index
    %0 = vector.load %arg1[%c0, %c0_0] : memref<8x2176xf32, #tpu.memory_space<vmem>>, vector<8x2176xf32>
    %1 = arith.truncf %0 : vector<8x2176xf32> to vector<8x2176xbf16>
    %c0_1 = arith.constant 0 : index
    %c0_2 = arith.constant 0 : index
    %2 = vector.load %arg2[%c0_1, %c0_2] : memref<2176x512xbf16, #tpu.memory_space<vmem>>, vector<2176x512xbf16>
    %cst = arith.constant dense<0.000000e+00> : vector<8x512xf32>
    %3 = tpu.matmul %1, %2, %cst {dimension_numbers = #tpu.dot_dimension_numbers<[1], [0], [0], [1], [0, 0, 1, 1], [], []>} : vector<8x2176xbf16>, vector<2176x512xbf16>, vector<8x512xf32> -> vector<8x512xf32>
    %c0_3 = arith.constant 0 : index
    %c0_4 = arith.constant 0 : index
    %4 = vector.load %arg3[%c0_3, %c0_4] : memref<1x512xf32, #tpu.memory_space<vmem>>, vector<1x512xf32>
    %5 = vector.broadcast %4 : vector<1x512xf32> to vector<8x512xf32>
    %6 = arith.addf %3, %5 : vector<8x512xf32>
    %7 = arith.truncf %6 : vector<8x512xf32> to vector<8x512xbf16>
    %c0_5 = arith.constant 0 : index
    %c0_6 = arith.constant 0 : index
    %8 = vector.load %arg4[%c0_5, %c0_6] : memref<512x512xbf16, #tpu.memory_space<vmem>>, vector<512x512xbf16>
    %cst_7 = arith.constant dense<0.000000e+00> : vector<8x512xf32>
    %9 = tpu.matmul %7, %8, %cst_7 {dimension_numbers = #tpu.dot_dimension_numbers<[1], [0], [0], [1], [0, 0, 1, 1], [], []>} : vector<8x512xbf16>, vector<512x512xbf16>, vector<8x512xf32> -> vector<8x512xf32>
    %c0_8 = arith.constant 0 : index
    %c0_9 = arith.constant 0 : index
    %10 = vector.load %arg5[%c0_8, %c0_9] : memref<1x512xf32, #tpu.memory_space<vmem>>, vector<1x512xf32>
    %11 = vector.broadcast %10 : vector<1x512xf32> to vector<8x512xf32>
    %12 = arith.addf %9, %11 : vector<8x512xf32>
    %cst_10 = arith.constant 0.000000e+00 : f32
    %13 = vector.broadcast %cst_10 : f32 to vector<8x512xf32>
    %14 = arith.cmpf oge, %12, %13 : vector<8x512xf32>
    %c0_11 = arith.constant 0 : index
    %c0_12 = arith.constant 0 : index
    %15 = vector.load %arg6[%c0_11, %c0_12] : memref<1x512xf32, #tpu.memory_space<vmem>>, vector<1x512xf32>
    %16 = vector.broadcast %15 : vector<1x512xf32> to vector<8x512xf32>
    %17 = arith.mulf %16, %12 : vector<8x512xf32>
    %18 = arith.select %14, %12, %17 : vector<8x512xi1>, vector<8x512xf32>
    %19 = arith.truncf %18 : vector<8x512xf32> to vector<8x512xbf16>
    %c0_13 = arith.constant 0 : index
    %c0_14 = arith.constant 0 : index
    %20 = vector.load %arg7[%c0_13, %c0_14] : memref<512x512xbf16, #tpu.memory_space<vmem>>, vector<512x512xbf16>
    %cst_15 = arith.constant dense<0.000000e+00> : vector<8x512xf32>
    %21 = tpu.matmul %19, %20, %cst_15 {dimension_numbers = #tpu.dot_dimension_numbers<[1], [0], [0], [1], [0, 0, 1, 1], [], []>} : vector<8x512xbf16>, vector<512x512xbf16>, vector<8x512xf32> -> vector<8x512xf32>
    %c0_16 = arith.constant 0 : index
    %c0_17 = arith.constant 0 : index
    %22 = vector.load %arg8[%c0_16, %c0_17] : memref<1x512xf32, #tpu.memory_space<vmem>>, vector<1x512xf32>
    %23 = vector.broadcast %22 : vector<1x512xf32> to vector<8x512xf32>
    %24 = arith.addf %21, %23 : vector<8x512xf32>
    %cst_18 = arith.constant 0.000000e+00 : f32
    %25 = vector.broadcast %cst_18 : f32 to vector<8x512xf32>
    %26 = arith.cmpf oge, %24, %25 : vector<8x512xf32>
    %c0_19 = arith.constant 0 : index
    %c0_20 = arith.constant 0 : index
    %27 = vector.load %arg9[%c0_19, %c0_20] : memref<1x512xf32, #tpu.memory_space<vmem>>, vector<1x512xf32>
    %28 = vector.broadcast %27 : vector<1x512xf32> to vector<8x512xf32>
    %29 = arith.mulf %28, %24 : vector<8x512xf32>
    %30 = arith.select %26, %24, %29 : vector<8x512xi1>, vector<8x512xf32>
    %c0_21 = arith.constant 0 : index
    %c0_22 = arith.constant 0 : index
    %31 = vector.load %arg10[%c0_21, %c0_22] : memref<1x512xf32, #tpu.memory_space<vmem>>, vector<1x512xf32>
    %32 = vector.broadcast %31 : vector<1x512xf32> to vector<8x512xf32>
    %33 = arith.mulf %30, %32 : vector<8x512xf32>
    %cst_23 = arith.constant dense<0.000000e+00> : vector<8xf32>
    %34 = vector.multi_reduction <add>, %33, %cst_23 [1] : vector<8x512xf32> to vector<8xf32>
    %35 = vector.shape_cast %34 : vector<8xf32> to vector<8x1xf32>
    %c0_24 = arith.constant 0 : index
    %c0_25 = arith.constant 0 : index
    %36 = vector.load %arg11[%c0_24, %c0_25] : memref<1x1xf32, #tpu.memory_space<vmem>>, vector<1x1xf32>
    %37 = vector.broadcast %36 : vector<1x1xf32> to vector<8x1xf32>
    %38 = arith.addf %35, %37 : vector<8x1xf32>
    %c0_26 = arith.constant 0 : index
    %c0_27 = arith.constant 0 : index
    %39 = vector.load %arg12[%c0_26, %c0_27] : memref<8x1xf32, #tpu.memory_space<vmem>>, vector<8x1xf32>
    tpu.vector_store %arg12[%c0_26, %c0_27], %38 {strides = array<i32>} : memref<8x1xf32, #tpu.memory_space<vmem>>, vector<8x1xf32>,
    return
  }
  func.func @transform_0(%arg0: i32) -> (i32, i32) {
    %c0_i32 = arith.constant 0 : i32
    %c0_i32_0 = arith.constant 0 : i32
    return %arg0, %c0_i32 : i32, i32
  }
  func.func @transform_1(%arg0: i32) -> (i32, i32) {
    %c0_i32 = arith.constant 0 : i32
    %c0_i32_0 = arith.constant 0 : i32
    %c0_i32_1 = arith.constant 0 : i32
    return %c0_i32, %c0_i32_0 : i32, i32
  }
  func.func @transform_2(%arg0: i32) -> (i32, i32) {
    %c0_i32 = arith.constant 0 : i32
    %c0_i32_0 = arith.constant 0 : i32
    %c0_i32_1 = arith.constant 0 : i32
    return %c0_i32, %c0_i32_0 : i32, i32
  }
  func.func @transform_3(%arg0: i32) -> (i32, i32) {
    %c0_i32 = arith.constant 0 : i32
    %c0_i32_0 = arith.constant 0 : i32
    %c0_i32_1 = arith.constant 0 : i32
    return %c0_i32, %c0_i32_0 : i32, i32
  }
  func.func @transform_4(%arg0: i32) -> (i32, i32) {
    %c0_i32 = arith.constant 0 : i32
    %c0_i32_0 = arith.constant 0 : i32
    %c0_i32_1 = arith.constant 0 : i32
    return %c0_i32, %c0_i32_0 : i32, i32
  }
  func.func @transform_5(%arg0: i32) -> (i32, i32) {
    %c0_i32 = arith.constant 0 : i32
    %c0_i32_0 = arith.constant 0 : i32
    %c0_i32_1 = arith.constant 0 : i32
    return %c0_i32, %c0_i32_0 : i32, i32
  }
  func.func @transform_6(%arg0: i32) -> (i32, i32) {
    %c0_i32 = arith.constant 0 : i32
    %c0_i32_0 = arith.constant 0 : i32
    %c0_i32_1 = arith.constant 0 : i32
    return %c0_i32, %c0_i32_0 : i32, i32
  }
  func.func @transform_7(%arg0: i32) -> (i32, i32) {
    %c0_i32 = arith.constant 0 : i32
    %c0_i32_0 = arith.constant 0 : i32
    %c0_i32_1 = arith.constant 0 : i32
    return %c0_i32, %c0_i32_0 : i32, i32
  }
  func.func @transform_8(%arg0: i32) -> (i32, i32) {
    %c0_i32 = arith.constant 0 : i32
    %c0_i32_0 = arith.constant 0 : i32
    %c0_i32_1 = arith.constant 0 : i32
    return %c0_i32, %c0_i32_0 : i32, i32
  }
  func.func @transform_9(%arg0: i32) -> (i32, i32) {
    %c0_i32 = arith.constant 0 : i32
    %c0_i32_0 = arith.constant 0 : i32
    %c0_i32_1 = arith.constant 0 : i32
    return %c0_i32, %c0_i32_0 : i32, i32
  }
  func.func @transform_10(%arg0: i32) -> (i32, i32) {
    %c0_i32 = arith.constant 0 : i32
    %c0_i32_0 = arith.constant 0 : i32
    %c0_i32_1 = arith.constant 0 : i32
    return %c0_i32, %c0_i32_0 : i32, i32
  }
  func.func @transform_11(%arg0: i32) -> (i32, i32) {
    %c0_i32 = arith.constant 0 : i32
    %c0_i32_0 = arith.constant 0 : i32
    return %arg0, %c0_i32 : i32, i32
  }
}

</mosaic_0001>

<bundles_post_ra>
// kernel: tpu_custom_call.1
= control target key start
LH: loop header
LB: loop body
LE: loop exit
PB: predicated region body
PF: predicated region fallthrough
CT: control target
= control target key end

     0   :  { %s8853_s0 = inlined_call_operand.hbm [shape: f32[8,2176], index: 0, kind: input, shape index: {}]   ;;  %s8854_s1 = inlined_call_operand.hbm [shape: bf16[2176,512], index: 1, kind: input, shape index: {}]   ;;  %s8855_s2 = inlined_call_operand.hbm [shape: f32[1,512], index: 2, kind: input, shape index: {}]   ;;  %s8856_s3 = inlined_call_operand.hbm [shape: bf16[512,512], index: 3, kind: input, shape index: {}]   ;;  %s8857_s4 = inlined_call_operand.hbm [shape: f32[1,512], index: 4, kind: input, shape index: {}]   ;;  %s8858_s5 = inlined_call_operand.hbm [shape: f32[1,512], index: 5, kind: input, shape index: {}]   ;;  %s8859_s6 = inlined_call_operand.hbm [shape: bf16[512,512], index: 6, kind: input, shape index: {}]   ;;  %s8860_s7 = inlined_call_operand.hbm [shape: f32[1,512], index: 7, kind: input, shape index: {}]   ;;  %s8861_s8 = inlined_call_operand.hbm [shape: f32[1,512], index: 8, kind: input, shape index: {}]   ;;  %s8862_s9 = inlined_call_operand.hbm [shape: f32[1,512], index: 9, kind: input, shape index: {}]   ;;  %s8863_s10 = inlined_call_operand.<no memory space> [shape: f32[1,1], index: 10, kind: input, shape index: {}]   ;;  %s8864_s11 = inlined_call_operand.vmem [shape: f32[8,1], index: 11, kind: output, shape index: {}]  }
   0x1   :  { %v16_v0 = vstv %s8863_s10 }
   0x2   :  { %17 = vst [vmem:[#allocation2] sm:$0x1] %v16_v0 }
   0x3   :  { %18 = vsyncpa [#allocation4], 0 }
   0x4   :  { %19 = vsyncpa [#allocation6], 0 }
   0x5   :  { %20 = vsyncpa [#allocation9], 0 }
   0x6   :  { %21 = vsyncpa [#allocation12], 0 }
   0x7   :  { %22 = vsyncpa [#allocation15], 0 }
   0x8   :  { %23 = vsyncpa [#allocation18], 0  ;;  %s8594_s19 = smov [#allocation5]   ;;  %s8362_s23 = scalar_lea.hbm %s8854_s1, 69632 }
   0x9   :  { %s39_s20 = sshll.u32 %s8594_s19, 4  ;;  %p8363_p0 = scmp.ne.s32.totalorder %s8854_s1, %s8362_s23  ;;  %s40_s20 = int_to_ptr.vmem [resolvable:$true] %s39_s20 }
   0xa   :  { %p8366_p1 = scmp.lt.u32.totalorder %s8362_s23, %s8854_s1 }
   0xc   :  { %p8368_p2 = pnand %p8366_p1, %p8363_p0 }
   0xe   :  { %8371 = shalt.err (!%p8368_p2)
}
   0xf   :  { %s8372_s27 = scalar_lea.vmem %s40_s20, 69632  ;;  %p8377_p4 = scmp.lt.s32.totalorder %s40_s20, %s40_s20 }
  0x10   :  { %p8373_p3 = scmp.ne.s32.totalorder %s40_s20, %s8372_s27  ;;  %p8378_p5 = scmp.lt.s32.totalorder %s8372_s27, %s8372_s27 }
  0x12   :  { %p8379_p6 = por %p8378_p5, %p8377_p4 }
  0x14   :  { %p8380_p7 = pnand %p8379_p6, %p8373_p3 }
  0x16   :  { %8383 = shalt.err (!%p8380_p7)
}
  0x17   :  { %s8595_s28 = smov 256   ;;  %s8596_s29 = smov 16  }
  0x18   :  { %45 = dma.hbm_to_vmem [thread:$0]  %s8854_s1, 69632, %s40_s20, [#allocation6], %s8595_s28, %s8595_s28, %s8596_s29  }
  0x19   :  { %s8597_s13 = smov [#allocation8]   ;;  %s8598_s15 = smov [#allocation11]  }
  0x1a   :  { %s61_s14 = sshll.u32 %s8597_s13, 4  ;;  %s84_s16 = sshll.u32 %s8598_s15, 4  ;;  %s62_s14 = int_to_ptr.vmem [resolvable:$true] %s61_s14  ;;  %s85_s16 = int_to_ptr.vmem [resolvable:$true] %s84_s16 }
  0x1b   :  { %s8384_s19 = scalar_lea.hbm %s8856_s3, 16384 }
  0x1c   :  { %p8385_p8 = scmp.ne.s32.totalorder %s8856_s3, %s8384_s19  ;;  %p8388_p9 = scmp.lt.u32.totalorder %s8384_s19, %s8856_s3 }
  0x1e   :  { %p8390_p10 = pnand %p8388_p9, %p8385_p8 }
  0x20   :  { %8393 = shalt.err (!%p8390_p10)
}
  0x21   :  { %s8394_s1 = scalar_lea.vmem %s62_s14, 16384  ;;  %p8399_p12 = scmp.lt.s32.totalorder %s62_s14, %s62_s14 }
  0x22   :  { %p8395_p11 = scmp.ne.s32.totalorder %s62_s14, %s8394_s1  ;;  %p8400_p13 = scmp.lt.s32.totalorder %s8394_s1, %s8394_s1 }
  0x24   :  { %p8401_p0 = por %p8400_p13, %p8399_p12 }
  0x26   :  { %p8402_p1 = pnand %p8401_p0, %p8395_p11 }
  0x28   :  { %8405 = shalt.err (!%p8402_p1)
}
  0x29   :  { %67 = dma.hbm_to_vmem [thread:$0]  %s8856_s3, 16384, %s62_s14, [#allocation9], %s8595_s28, %s8595_s28, %s8596_s29  }
  0x2a   :  { %s8406_s27 = scalar_lea.hbm %s8858_s5, 64 }
  0x2b   :  { %p8407_p2 = scmp.ne.s32.totalorder %s8858_s5, %s8406_s27  ;;  %p8410_p3 = scmp.lt.u32.totalorder %s8406_s27, %s8858_s5 }
  0x2d   :  { %p8412_p4 = pnand %p8410_p3, %p8407_p2 }
  0x2f   :  { %8415 = shalt.err (!%p8412_p4)
}
  0x30   :  { %s8416_s17 = scalar_lea.vmem %s85_s16, 64  ;;  %p8421_p6 = scmp.lt.s32.totalorder %s85_s16, %s85_s16 }
  0x31   :  { %p8417_p5 = scmp.ne.s32.totalorder %s85_s16, %s8416_s17  ;;  %p8422_p7 = scmp.lt.s32.totalorder %s8416_s17, %s8416_s17 }
  0x33   :  { %p8423_p8 = por %p8422_p7, %p8421_p6 }
  0x35   :  { %p8424_p9 = pnand %p8423_p8, %p8417_p5 }
  0x37   :  { %8427 = shalt.err (!%p8424_p9)
}
  0x38   :  { %87 = dma.hbm_to_vmem [thread:$0]  %s8858_s5, 64, %s85_s16, [#allocation12]  }
  0x39   :  { %s8599_s18 = smov [#allocation14]   ;;  %s8600_s21 = smov [#allocation3]  }
  0x3a   :  { %s106_s19 = sshll.u32 %s8599_s18, 4  ;;  %s30_s22 = sshll.u32 %s8600_s21, 4  ;;  %s107_s19 = int_to_ptr.vmem [resolvable:$true] %s106_s19  ;;  %s31_s22 = int_to_ptr.vmem [resolvable:$true] %s30_s22 }
  0x3b   :  { %s8428_s1 = scalar_lea.hbm %s8860_s7, 64 }
  0x3c   :  { %p8429_p10 = scmp.ne.s32.totalorder %s8860_s7, %s8428_s1  ;;  %p8432_p11 = scmp.lt.u32.totalorder %s8428_s1, %s8860_s7 }
  0x3e   :  { %p8434_p12 = pnand %p8432_p11, %p8429_p10 }
  0x40   :  { %8437 = shalt.err (!%p8434_p12)
}
  0x41   :  { %s8438_s5 = scalar_lea.vmem %s107_s19, 64  ;;  %p8443_p0 = scmp.lt.s32.totalorder %s107_s19, %s107_s19 }
  0x42   :  { %p8439_p13 = scmp.ne.s32.totalorder %s107_s19, %s8438_s5  ;;  %p8444_p1 = scmp.lt.s32.totalorder %s8438_s5, %s8438_s5 }
  0x44   :  { %p8445_p2 = por %p8444_p1, %p8443_p0 }
  0x46   :  { %p8446_p3 = pnand %p8445_p2, %p8439_p13 }
  0x48   :  { %8449 = shalt.err (!%p8446_p3)
}
  0x49   :  { %109 = dma.hbm_to_vmem [thread:$0]  %s8860_s7, 64, %s107_s19, [#allocation15]  }
  0x4a   :  { %s8450_s13 = scalar_lea.hbm %s8853_s0, 2176 }
  0x4b   :  { %p8451_p4 = scmp.ne.s32.totalorder %s8853_s0, %s8450_s13  ;;  %p8454_p5 = scmp.lt.u32.totalorder %s8450_s13, %s8853_s0 }
  0x4d   :  { %p8456_p6 = pnand %p8454_p5, %p8451_p4 }
  0x4f   :  { %8459 = shalt.err (!%p8456_p6)
}
  0x50   :  { %s8460_s18 = scalar_lea.vmem %s31_s22, 2176  ;;  %p8465_p8 = scmp.lt.s32.totalorder %s31_s22, %s31_s22 }
  0x51   :  { %p8461_p7 = scmp.ne.s32.totalorder %s31_s22, %s8460_s18  ;;  %p8466_p9 = scmp.lt.s32.totalorder %s8460_s18, %s8460_s18 }
  0x53   :  { %p8467_p10 = por %p8466_p9, %p8465_p8 }
  0x55   :  { %p8468_p11 = pnand %p8467_p10, %p8461_p7 }
  0x57   :  { %8471 = shalt.err (!%p8468_p11)
}
  0x58   :  { %33 = dma.hbm_to_vmem [thread:$0]  %s8853_s0, 2176, %s31_s22, [#allocation4]  }
  0x59   :  { %s8601_s21 = smov [#allocation7]   ;;  %s8602_s24 = smov [#allocation10]  }
  0x5a   :  { %s52_s23 = sshll.u32 %s8601_s21, 4  ;;  %s74_s1 = sshll.u32 %s8602_s24, 4  ;;  %s53_s23 = int_to_ptr.vmem [resolvable:$true] %s52_s23  ;;  %s75_s1 = int_to_ptr.vmem [resolvable:$true] %s74_s1 }
  0x5b   :  { %s8472_s26 = scalar_lea.hbm %s8855_s2, 64 }
  0x5c   :  { %p8473_p12 = scmp.ne.s32.totalorder %s8855_s2, %s8472_s26  ;;  %p8476_p13 = scmp.lt.u32.totalorder %s8472_s26, %s8855_s2 }
  0x5e   :  { %p8478_p0 = pnand %p8476_p13, %p8473_p12 }
  0x60   :  { %8481 = shalt.err (!%p8478_p0)
}
  0x61   :  { %s8482_s0 = scalar_lea.vmem %s53_s23, 64  ;;  %p8487_p2 = scmp.lt.s32.totalorder %s53_s23, %s53_s23 }
  0x62   :  { %p8483_p1 = scmp.ne.s32.totalorder %s53_s23, %s8482_s0  ;;  %p8488_p3 = scmp.lt.s32.totalorder %s8482_s0, %s8482_s0 }
  0x64   :  { %p8489_p4 = por %p8488_p3, %p8487_p2 }
  0x66   :  { %p8490_p5 = pnand %p8489_p4, %p8483_p1 }
  0x68   :  { %8493 = shalt.err (!%p8490_p5)
}
  0x69   :  { %55 = dma.hbm_to_vmem [thread:$0]  %s8855_s2, 64, %s53_s23, [#allocation6]  }
  0x6a   :  { %s8494_s15 = scalar_lea.hbm %s8857_s4, 64 }
  0x6b   :  { %p8495_p6 = scmp.ne.s32.totalorder %s8857_s4, %s8494_s15  ;;  %p8498_p7 = scmp.lt.u32.totalorder %s8494_s15, %s8857_s4 }
  0x6d   :  { %p8500_p8 = pnand %p8498_p7, %p8495_p6 }
  0x6f   :  { %8503 = shalt.err (!%p8500_p8)
}
  0x70   :  { %s8504_s7 = scalar_lea.vmem %s75_s1, 64  ;;  %p8509_p10 = scmp.lt.s32.totalorder %s75_s1, %s75_s1 }
  0x71   :  { %p8505_p9 = scmp.ne.s32.totalorder %s75_s1, %s8504_s7  ;;  %p8510_p11 = scmp.lt.s32.totalorder %s8504_s7, %s8504_s7 }
  0x73   :  { %p8511_p12 = por %p8510_p11, %p8509_p10 }
  0x75   :  { %p8512_p13 = pnand %p8511_p12, %p8505_p9 }
  0x77   :  { %8515 = shalt.err (!%p8512_p13)
}
  0x78   :  { %77 = dma.hbm_to_vmem [thread:$0]  %s8857_s4, 64, %s75_s1, [#allocation9]  }
  0x79   :  { %s8603_s21 = smov [#allocation13]   ;;  %s8604_s24 = smov [#allocation16]  }
  0x7a   :  { %s93_s23 = sshll.u32 %s8603_s21, 4  ;;  %s116_s20 = sshll.u32 %s8604_s24, 4  ;;  %s94_s23 = int_to_ptr.vmem [resolvable:$true] %s93_s23  ;;  %s117_s20 = int_to_ptr.vmem [resolvable:$true] %s116_s20 }
  0x7b   :  { %s8516_s10 = scalar_lea.hbm %s8859_s6, 16384 }
  0x7c   :  { %p8517_p0 = scmp.ne.s32.totalorder %s8859_s6, %s8516_s10  ;;  %p8520_p1 = scmp.lt.u32.totalorder %s8516_s10, %s8859_s6 }
  0x7e   :  { %p8522_p2 = pnand %p8520_p1, %p8517_p0 }
  0x80   :  { %8525 = shalt.err (!%p8522_p2)
}
  0x81   :  { %s8526_s4 = scalar_lea.vmem %s94_s23, 16384  ;;  %p8531_p4 = scmp.lt.s32.totalorder %s94_s23, %s94_s23 }
  0x82   :  { %p8527_p3 = scmp.ne.s32.totalorder %s94_s23, %s8526_s4  ;;  %p8532_p5 = scmp.lt.s32.totalorder %s8526_s4, %s8526_s4 }
  0x84   :  { %p8533_p6 = por %p8532_p5, %p8531_p4 }
  0x86   :  { %p8534_p7 = pnand %p8533_p6, %p8527_p3 }
  0x88   :  { %8537 = shalt.err (!%p8534_p7)
}
  0x89   :  { %99 = dma.hbm_to_vmem [thread:$0]  %s8859_s6, 16384, %s94_s23, [#allocation12], %s8595_s28, %s8595_s28, %s8596_s29  }
  0x8a   :  { %s8538_s13 = scalar_lea.hbm %s8861_s8, 64 }
  0x8b   :  { %p8539_p8 = scmp.ne.s32.totalorder %s8861_s8, %s8538_s13  ;;  %p8542_p9 = scmp.lt.u32.totalorder %s8538_s13, %s8861_s8 }
  0x8d   :  { %p8544_p10 = pnand %p8542_p9, %p8539_p8 }
  0x8f   :  { %8547 = shalt.err (!%p8544_p10)
}
  0x90   :  { %s8548_s18 = scalar_lea.vmem %s117_s20, 64  ;;  %p8553_p12 = scmp.lt.s32.totalorder %s117_s20, %s117_s20 }
  0x91   :  { %p8549_p11 = scmp.ne.s32.totalorder %s117_s20, %s8548_s18  ;;  %p8554_p13 = scmp.lt.s32.totalorder %s8548_s18, %s8548_s18 }
  0x93   :  { %p8555_p0 = por %p8554_p13, %p8553_p12 }
  0x95   :  { %p8556_p1 = pnand %p8555_p0, %p8549_p11 }
  0x97   :  { %8559 = shalt.err (!%p8556_p1)
}
  0x98   :  { %119 = dma.hbm_to_vmem [thread:$0]  %s8861_s8, 64, %s117_s20, [#allocation15]  }
  0x99   :  { %s8605_s29 = smov [#allocation17]   ;;  %s8560_s21 = scalar_lea.hbm %s8862_s9, 64 }
  0x9a   :  { %s126_s7 = sshll.u32 %s8605_s29, 4  ;;  %p8561_p2 = scmp.ne.s32.totalorder %s8862_s9, %s8560_s21  ;;  %s127_s7 = int_to_ptr.vmem [resolvable:$true] %s126_s7 }
  0x9b   :  { %p8564_p3 = scmp.lt.u32.totalorder %s8560_s21, %s8862_s9 }
  0x9d   :  { %p8566_p4 = pnand %p8564_p3, %p8561_p2 }
  0x9f   :  { %8569 = shalt.err (!%p8566_p4)
}
  0xa0   :  { %s8570_s10 = scalar_lea.vmem %s127_s7, 64  ;;  %p8575_p6 = scmp.lt.s32.totalorder %s127_s7, %s127_s7 }
  0xa1   :  { %p8571_p5 = scmp.ne.s32.totalorder %s127_s7, %s8570_s10  ;;  %p8576_p7 = scmp.lt.s32.totalorder %s8570_s10, %s8570_s10 }
  0xa3   :  { %p8577_p8 = por %p8576_p7, %p8575_p6 }
  0xa5   :  { %p8578_p9 = pnand %p8577_p8, %p8571_p5 }
  0xa7   :  { %8581 = shalt.err (!%p8578_p9)
}
  0xa8   :  { %129 = dma.hbm_to_vmem [thread:$0]  %s8862_s9, 64, %s127_s7, [#allocation18]  }
  0xa9   :  { %8582 = dma.done.wait [#allocation4], 2176  }
  0xaa   :  { %8583 = vsyncadd [#allocation4], 4294965120 }
  0xab   :  { %8584 = dma.done.wait [#allocation6], 69696  }
  0xac   :  { %8585 = vsyncadd [#allocation6], 4294897600 }
  0xad   :  { %8586 = dma.done.wait [#allocation9], 16448  }
  0xae   :  { %8587 = vsyncadd [#allocation9], 4294950848 }
  0xaf   :  { %8588 = dma.done.wait [#allocation12], 16448  }
  0xb0   :  { %8589 = vsyncadd [#allocation12], 4294950848 }
  0xb1   :  { %8590 = dma.done.wait [#allocation15], 128  }
  0xb2   :  { %8591 = vsyncadd [#allocation15], 4294967168 }
  0xb3   :  { %8592 = dma.done.wait [#allocation18], 64  }
  0xb4   :  { %8593 = vsyncadd [#allocation18], 4294967232  ;;  %v7162_v1 = vld [vmem:[#allocation5 + $0x4] ss:$16 sps:$4 sm:$0xff]   ;;  %v7164_v2 = vld [vmem:[#allocation5 + $0xc] ss:$16 sps:$4 sm:$0xff]  }
  0xb5   :  { %3483 = vmatprep.subr.bf16.mxu0 %v7162_v1  ;;  %v7166_v3 = vld [vmem:[#allocation5] ss:$16 sps:$4 sm:$0xff]   ;;  %v7167_v4 = vld [vmem:[#allocation5 + $0x8] ss:$16 sps:$4 sm:$0xff]   ;;  %3852 = vmatprep.subr.bf16.mxu1 %v7164_v2  ;;  %v7168_v5 = vld [vmem:[#allocation5 + $0x24] ss:$16 sps:$4 sm:$0xff]  }
  0xb6   :  { %3484 = vmatpush1.bf16.msra.mxu0 %v7166_v3  ;;  %3853 = vmatpush1.bf16.msra.mxu1 %v7167_v4  ;;  %v7170_v6 = vld [vmem:[#allocation5 + $0x2c] ss:$16 sps:$4 sm:$0xff]   ;;  %v7172_v7 = vld [vmem:[#allocation5 + $0x20] ss:$16 sps:$4 sm:$0xff]   ;;  %v7173_v8 = vld [vmem:[#allocation5 + $0x28] ss:$16 sps:$4 sm:$0xff]  }
  0xb7   :  { %3485 = vmatprep.subr.bf16.mxu0 %v7168_v5  ;;  %3854 = vmatprep.subr.bf16.mxu1 %v7170_v6  ;;  %v7174_v9 = vld [vmem:[#allocation5 + $0x44] ss:$16 sps:$4 sm:$0xff]   ;;  %v7176_v10 = vld [vmem:[#allocation5 + $0x4c] ss:$16 sps:$4 sm:$0xff]   ;;  %v7178_v11 = vld [vmem:[#allocation5 + $0x40] ss:$16 sps:$4 sm:$0xff]  }
  0xb8   :  { %v7179_v12 = vld [vmem:[#allocation5 + $0x48] ss:$16 sps:$4 sm:$0xff]   ;;  %v7180_v13 = vld [vmem:[#allocation5 + $0x64] ss:$16 sps:$4 sm:$0xff]   ;;  %v7182_v14 = vld [vmem:[#allocation5 + $0x6c] ss:$16 sps:$4 sm:$0xff]  }
  0xb9   :  { %v7184_v15 = vld [vmem:[#allocation5 + $0x60] ss:$16 sps:$4 sm:$0xff]   ;;  %v7185_v16 = vld [vmem:[#allocation5 + $0x68] ss:$16 sps:$4 sm:$0xff]   ;;  %v7186_v17 = vld [vmem:[#allocation5 + $0x84] ss:$16 sps:$4 sm:$0xff]  }
  0xba   :  { %3486 = vmatpush1.bf16.msra.mxu0 %v7172_v7  ;;  %3855 = vmatpush1.bf16.msra.mxu1 %v7173_v8  ;;  %v7188_v18 = vld [vmem:[#allocation5 + $0x8c] ss:$16 sps:$4 sm:$0xff]   ;;  %v7190_v19 = vld [vmem:[#allocation5 + $0x80] ss:$16 sps:$4 sm:$0xff]   ;;  %v7191_v20 = vld [vmem:[#allocation5 + $0x88] ss:$16 sps:$4 sm:$0xff]  }
  0xbb   :  { %3487 = vmatprep.subr.bf16.mxu0 %v7174_v9  ;;  %3856 = vmatprep.subr.bf16.mxu1 %v7176_v10  ;;  %v7192_v21 = vld [vmem:[#allocation5 + $0xa4] ss:$16 sps:$4 sm:$0xff]   ;;  %v7194_v22 = vld [vmem:[#allocation5 + $0xac] ss:$16 sps:$4 sm:$0xff]   ;;  %v7196_v23 = vld [vmem:[#allocation5 + $0xa0] ss:$16 sps:$4 sm:$0xff]  }
  0xbc   :  { %v7197_v24 = vld [vmem:[#allocation5 + $0xa8] ss:$16 sps:$4 sm:$0xff]   ;;  %v7198_v25 = vld [vmem:[#allocation5 + $0xc4] ss:$16 sps:$4 sm:$0xff]   ;;  %v7200_v26 = vld [vmem:[#allocation5 + $0xcc] ss:$16 sps:$4 sm:$0xff]  }
  0xbd   :  { %v7202_v27 = vld [vmem:[#allocation5 + $0xc0] ss:$16 sps:$4 sm:$0xff]   ;;  %v7203_v28 = vld [vmem:[#allocation5 + $0xc8] ss:$16 sps:$4 sm:$0xff]   ;;  %v7204_v29 = vld [vmem:[#allocation5 + $0xe4] ss:$16 sps:$4 sm:$0xff]  }
  0xbe   :  { %3488 = vmatpush1.bf16.msra.mxu0 %v7178_v11  ;;  %3857 = vmatpush1.bf16.msra.mxu1 %v7179_v12  ;;  %v7206_v30 = vld [vmem:[#allocation5 + $0xec] ss:$16 sps:$4 sm:$0xff]   ;;  %v7208_v31 = vld [vmem:[#allocation5 + $0xe0] ss:$16 sps:$4 sm:$0xff]   ;;  %v7209_v32 = vld [vmem:[#allocation5 + $0xe8] ss:$16 sps:$4 sm:$0xff]  }
  0xbf   :  { %3489 = vmatprep.subr.bf16.mxu0 %v7180_v13  ;;  %3858 = vmatprep.subr.bf16.mxu1 %v7182_v14  ;;  %v7210_v33 = vld [vmem:[#allocation5 + $0x104] ss:$16 sps:$4 sm:$0xff]   ;;  %v7212_v34 = vld [vmem:[#allocation5 + $0x10c] ss:$16 sps:$4 sm:$0xff]   ;;  %v7214_v35 = vld [vmem:[#allocation5 + $0x100] ss:$16 sps:$4 sm:$0xff]  }
  0xc0   :  { %v7215_v36 = vld [vmem:[#allocation5 + $0x108] ss:$16 sps:$4 sm:$0xff]   ;;  %v7216_v37 = vld [vmem:[#allocation5 + $0x124] ss:$16 sps:$4 sm:$0xff]   ;;  %v7218_v38 = vld [vmem:[#allocation5 + $0x12c] ss:$16 sps:$4 sm:$0xff]  }
  0xc1   :  { %v7220_v39 = vld [vmem:[#allocation5 + $0x120] ss:$16 sps:$4 sm:$0xff]   ;;  %v7221_v40 = vld [vmem:[#allocation5 + $0x128] ss:$16 sps:$4 sm:$0xff]   ;;  %v7222_v41 = vld [vmem:[#allocation5 + $0x144] ss:$16 sps:$4 sm:$0xff]  }
  0xc2   :  { %3490 = vmatpush1.bf16.msra.mxu0 %v7184_v15  ;;  %3859 = vmatpush1.bf16.msra.mxu1 %v7185_v16  ;;  %v7224_v42 = vld [vmem:[#allocation5 + $0x14c] ss:$16 sps:$4 sm:$0xff]   ;;  %v7226_v43 = vld [vmem:[#allocation5 + $0x140] ss:$16 sps:$4 sm:$0xff]   ;;  %v7227_v44 = vld [vmem:[#allocation5 + $0x148] ss:$16 sps:$4 sm:$0xff]  }
  0xc3   :  { %3491 = vmatprep.subr.bf16.mxu0 %v7186_v17  ;;  %3860 = vmatprep.subr.bf16.mxu1 %v7188_v18  ;;  %v7228_v45 = vld [vmem:[#allocation5 + $0x164] ss:$16 sps:$4 sm:$0xff]   ;;  %v7230_v46 = vld [vmem:[#allocation5 + $0x16c] ss:$16 sps:$4 sm:$0xff]   ;;  %v7232_v48 = vld [vmem:[#allocation5 + $0x160] ss:$16 sps:$4 sm:$0xff]  }
  0xc4   :  { %v164_v47 = vld [vmem:[#allocation3 + $0x8] sm:$0xff]  ;;  %v7233_v50 = vld [vmem:[#allocation5 + $0x168] ss:$16 sps:$4 sm:$0xff]   ;;  %v7236_v52 = vld [vmem:[#allocation5 + $0x18c] ss:$16 sps:$4 sm:$0xff]   ;;  %vm6244_vm8 = vcmask 7168  }
  0xc5   :  { %v181_v49 = vpack.c.bf16 %v164_v47, %v164_v47  ;;  %v7234_v51 = vld [vmem:[#allocation5 + $0x184] ss:$16 sps:$4 sm:$0xff]   ;;  %v7238_v53 = vld [vmem:[#allocation5 + $0x180] ss:$16 sps:$4 sm:$0xff]   ;;  %v7239_v54 = vld [vmem:[#allocation5 + $0x188] ss:$16 sps:$4 sm:$0xff]  }
  0xc6   :  { %3492 = vmatpush1.bf16.msra.mxu0 %v7190_v19  ;;  %3861 = vmatpush1.bf16.msra.mxu1 %v7191_v20  ;;  %v7240_v55 = vld [vmem:[#allocation5 + $0x1a4] ss:$16 sps:$4 sm:$0xff]   ;;  %v7242_v56 = vld [vmem:[#allocation5 + $0x1ac] ss:$16 sps:$4 sm:$0xff]   ;;  %v7244_v57 = vld [vmem:[#allocation5 + $0x1a0] ss:$16 sps:$4 sm:$0xff]  }
  0xc7   :  { %3493 = vmatprep.subr.bf16.mxu0 %v7192_v21  ;;  %3862 = vmatprep.subr.bf16.mxu1 %v7194_v22  ;;  %v7245_v58 = vld [vmem:[#allocation5 + $0x1a8] ss:$16 sps:$4 sm:$0xff]   ;;  %v7246_v59 = vld [vmem:[#allocation5 + $0x1c4] ss:$16 sps:$4 sm:$0xff]   ;;  %v7248_v60 = vld [vmem:[#allocation5 + $0x1cc] ss:$16 sps:$4 sm:$0xff]  }
  0xc8   :  { %3515 = vmatprep.mubr.bf16.mxu0 %v181_v49  ;;  %3884 = vmatprep.mubr.bf16.mxu1 %v181_v49  ;;  %v7250_v61 = vld [vmem:[#allocation5 + $0x1c0] ss:$16 sps:$4 sm:$0xff]   ;;  %v7251_v62 = vld [vmem:[#allocation5 + $0x1c8] ss:$16 sps:$4 sm:$0xff]   ;;  %v7252_v63 = vld [vmem:[#allocation5 + $0x1e4] ss:$16 sps:$4 sm:$0xff]  }
  0xc9   :  { %v7254_v0 = vld [vmem:[#allocation5 + $0x1ec] ss:$16 sps:$4 sm:$0xff]   ;;  %v7256_v1 = vld [vmem:[#allocation5 + $0x1e0] ss:$16 sps:$4 sm:$0xff]   ;;  %v7257_v2 = vld [vmem:[#allocation5 + $0x1e8] ss:$16 sps:$4 sm:$0xff]  }
  0xca   :  { %3494 = vmatpush1.bf16.msra.mxu0 %v7196_v23  ;;  %3863 = vmatpush1.bf16.msra.mxu1 %v7197_v24  ;;  %v163_v3 = vld [vmem:[#allocation3] sm:$0xff]  ;;  %v7260_v4 = vld [vmem:[#allocation5 + $0x204] ss:$16 sps:$4 sm:$0xff]   ;;  %v7258_v7 = vld [vmem:[#allocation5 + $0x200] ss:$16 sps:$4 sm:$0xff]  }
  0xcb   :  { %3495 = vmatprep.subr.bf16.mxu0 %v7198_v25  ;;  %3864 = vmatprep.subr.bf16.mxu1 %v7200_v26  ;;  %v7263_v5 = vld [vmem:[#allocation5 + $0x20c] ss:$16 sps:$4 sm:$0xff]   ;;  %v180_v6 = vpack.c.bf16 %v163_v3, %v163_v3  ;;  %v7261_v8 = vld [vmem:[#allocation5 + $0x208] ss:$16 sps:$4 sm:$0xff]   ;;  %v7266_v9 = vld [vmem:[#allocation5 + $0x224] ss:$16 sps:$4 sm:$0xff]  }
  0xcc   :  { %v7269_v10 = vld [vmem:[#allocation5 + $0x22c] ss:$16 sps:$4 sm:$0xff]   ;;  %v7264_v11 = vld [vmem:[#allocation5 + $0x220] ss:$16 sps:$4 sm:$0xff]   ;;  %v7267_v12 = vld [vmem:[#allocation5 + $0x228] ss:$16 sps:$4 sm:$0xff]  }
  0xcd   :  { %v7272_v13 = vld [vmem:[#allocation5 + $0x244] ss:$16 sps:$4 sm:$0xff]   ;;  %v7275_v14 = vld [vmem:[#allocation5 + $0x24c] ss:$16 sps:$4 sm:$0xff]   ;;  %v7270_v15 = vld [vmem:[#allocation5 + $0x240] ss:$16 sps:$4 sm:$0xff]  }
  0xce   :  { %3496 = vmatpush1.bf16.msra.mxu0 %v7202_v27  ;;  %3865 = vmatpush1.bf16.msra.mxu1 %v7203_v28  ;;  %v7273_v16 = vld [vmem:[#allocation5 + $0x248] ss:$16 sps:$4 sm:$0xff]   ;;  %v7278_v17 = vld [vmem:[#allocation5 + $0x264] ss:$16 sps:$4 sm:$0xff]   ;;  %v7281_v18 = vld [vmem:[#allocation5 + $0x26c] ss:$16 sps:$4 sm:$0xff]  }
  0xcf   :  { %3497 = vmatprep.subr.bf16.mxu0 %v7204_v29  ;;  %3866 = vmatprep.subr.bf16.mxu1 %v7206_v30  ;;  %v7276_v19 = vld [vmem:[#allocation5 + $0x260] ss:$16 sps:$4 sm:$0xff]   ;;  %v7279_v20 = vld [vmem:[#allocation5 + $0x268] ss:$16 sps:$4 sm:$0xff]   ;;  %v7284_v21 = vld [vmem:[#allocation5 + $0x284] ss:$16 sps:$4 sm:$0xff]  }
  0xd0   :  { %v7287_v22 = vld [vmem:[#allocation5 + $0x28c] ss:$16 sps:$4 sm:$0xff]   ;;  %v7282_v23 = vld [vmem:[#allocation5 + $0x280] ss:$16 sps:$4 sm:$0xff]   ;;  %v7285_v24 = vld [vmem:[#allocation5 + $0x288] ss:$16 sps:$4 sm:$0xff]  }
  0xd1   :  { %v7290_v25 = vld [vmem:[#allocation5 + $0x2a4] ss:$16 sps:$4 sm:$0xff]   ;;  %v7293_v26 = vld [vmem:[#allocation5 + $0x2ac] ss:$16 sps:$4 sm:$0xff]   ;;  %v7288_v27 = vld [vmem:[#allocation5 + $0x2a0] ss:$16 sps:$4 sm:$0xff]  }
  0xd2   :  { %3498 = vmatpush1.bf16.msra.mxu0 %v7208_v31  ;;  %3867 = vmatpush1.bf16.msra.mxu1 %v7209_v32  ;;  %v7291_v28 = vld [vmem:[#allocation5 + $0x2a8] ss:$16 sps:$4 sm:$0xff]   ;;  %v7296_v29 = vld [vmem:[#allocation5 + $0x2c4] ss:$16 sps:$4 sm:$0xff]   ;;  %v7299_v30 = vld [vmem:[#allocation5 + $0x2cc] ss:$16 sps:$4 sm:$0xff]  }
  0xd3   :  { %3499 = vmatprep.subr.bf16.mxu0 %v7210_v33  ;;  %3868 = vmatprep.subr.bf16.mxu1 %v7212_v34  ;;  %v166_v31 = vld [vmem:[#allocation3 + $0x18] sm:$0xff]  ;;  %v7297_v34 = vld [vmem:[#allocation5 + $0x2c8] ss:$16 sps:$4 sm:$0xff]  }
  0xd4   :  { %v7294_v32 = vld [vmem:[#allocation5 + $0x2c0] ss:$16 sps:$4 sm:$0xff]   ;;  %v183_v33 = vpack.c.bf16 %v166_v31, %v166_v31  ;;  %v7320_v47 = vld [vmem:[#allocation5 + $0x344] ss:$16 sps:$4 sm:$0xff]  }
  0xd5   :  { %v7318_v49 = vld [vmem:[#allocation5 + $0x340] ss:$16 sps:$4 sm:$0xff]   ;;  %v7350_v3 = vld [vmem:[#allocation5 + $0x3e4] ss:$16 sps:$4 sm:$0xff]  }
  0xd6   :  { %3500 = vmatpush1.bf16.msra.mxu0 %v7214_v35  ;;  %3869 = vmatpush1.bf16.msra.mxu1 %v7215_v36  ;;  %v7302_v35 = vld [vmem:[#allocation5 + $0x2e4] ss:$16 sps:$4 sm:$0xff]   ;;  %v7305_v36 = vld [vmem:[#allocation5 + $0x2ec] ss:$16 sps:$4 sm:$0xff]  }
  0xd7   :  { %3501 = vmatprep.subr.bf16.mxu0 %v7216_v37  ;;  %3870 = vmatprep.subr.bf16.mxu1 %v7218_v38  ;;  %v7300_v37 = vld [vmem:[#allocation5 + $0x2e0] ss:$16 sps:$4 sm:$0xff]   ;;  %v7303_v38 = vld [vmem:[#allocation5 + $0x2e8] ss:$16 sps:$4 sm:$0xff]   ;;  %v7386_v31 = vld [vmem:[#allocation5 + $0x4a4] ss:$16 sps:$4 sm:$0xff]  }
  0xda   :  { %3502 = vmatpush1.bf16.msra.mxu0 %v7220_v39  ;;  %3871 = vmatpush1.bf16.msra.mxu1 %v7221_v40  ;;  %v7308_v39 = vld [vmem:[#allocation5 + $0x304] ss:$16 sps:$4 sm:$0xff]   ;;  %v7311_v40 = vld [vmem:[#allocation5 + $0x30c] ss:$16 sps:$4 sm:$0xff]  }
  0xdb   :  { %3503 = vmatprep.subr.bf16.mxu0 %v7222_v41  ;;  %3872 = vmatprep.subr.bf16.mxu1 %v7224_v42  ;;  %v7306_v41 = vld [vmem:[#allocation5 + $0x300] ss:$16 sps:$4 sm:$0xff]   ;;  %v7309_v42 = vld [vmem:[#allocation5 + $0x308] ss:$16 sps:$4 sm:$0xff]  }
  0xde   :  { %3504 = vmatpush1.bf16.msra.mxu0 %v7226_v43  ;;  %3873 = vmatpush1.bf16.msra.mxu1 %v7227_v44  ;;  %v7314_v43 = vld [vmem:[#allocation5 + $0x324] ss:$16 sps:$4 sm:$0xff]   ;;  %v7317_v44 = vld [vmem:[#allocation5 + $0x32c] ss:$16 sps:$4 sm:$0xff]  }
  0xdf   :  { %3505 = vmatprep.subr.bf16.mxu0 %v7228_v45  ;;  %3874 = vmatprep.subr.bf16.mxu1 %v7230_v46  ;;  %v7312_v45 = vld [vmem:[#allocation5 + $0x320] ss:$16 sps:$4 sm:$0xff]   ;;  %v7315_v46 = vld [vmem:[#allocation5 + $0x328] ss:$16 sps:$4 sm:$0xff]  }
  0xe2   :  { %3506 = vmatpush1.bf16.msra.mxu0 %v7232_v48  ;;  %3875 = vmatpush1.bf16.msra.mxu1 %v7233_v50  ;;  %v7323_v48 = vld [vmem:[#allocation5 + $0x34c] ss:$16 sps:$4 sm:$0xff]   ;;  %v7321_v50 = vld [vmem:[#allocation5 + $0x348] ss:$16 sps:$4 sm:$0xff]  }
  0xe3   :  { %3507 = vmatprep.subr.bf16.mxu0 %v7234_v51  ;;  %3876 = vmatprep.subr.bf16.mxu1 %v7236_v52  ;;  %v7326_v51 = vld [vmem:[#allocation5 + $0x364] ss:$16 sps:$4 sm:$0xff]   ;;  %v7329_v52 = vld [vmem:[#allocation5 + $0x36c] ss:$16 sps:$4 sm:$0xff]  }
  0xe6   :  { %3508 = vmatpush1.bf16.msra.mxu0 %v7238_v53  ;;  %3877 = vmatpush1.bf16.msra.mxu1 %v7239_v54  ;;  %v7324_v53 = vld [vmem:[#allocation5 + $0x360] ss:$16 sps:$4 sm:$0xff]   ;;  %v7327_v54 = vld [vmem:[#allocation5 + $0x368] ss:$16 sps:$4 sm:$0xff]  }
  0xe7   :  { %3509 = vmatprep.subr.bf16.mxu0 %v7240_v55  ;;  %3878 = vmatprep.subr.bf16.mxu1 %v7242_v56  ;;  %v7332_v55 = vld [vmem:[#allocation5 + $0x384] ss:$16 sps:$4 sm:$0xff]   ;;  %v7335_v56 = vld [vmem:[#allocation5 + $0x38c] ss:$16 sps:$4 sm:$0xff]  }
  0xea   :  { %3510 = vmatpush1.bf16.msra.mxu0 %v7244_v57  ;;  %3879 = vmatpush1.bf16.msra.mxu1 %v7245_v58  ;;  %v7330_v57 = vld [vmem:[#allocation5 + $0x380] ss:$16 sps:$4 sm:$0xff]   ;;  %v7333_v58 = vld [vmem:[#allocation5 + $0x388] ss:$16 sps:$4 sm:$0xff]  }
  0xeb   :  { %3511 = vmatprep.subr.bf16.mxu0 %v7246_v59  ;;  %3880 = vmatprep.subr.bf16.mxu1 %v7248_v60  ;;  %v7338_v59 = vld [vmem:[#allocation5 + $0x3a4] ss:$16 sps:$4 sm:$0xff]   ;;  %v7341_v60 = vld [vmem:[#allocation5 + $0x3ac] ss:$16 sps:$4 sm:$0xff]  }
  0xee   :  { %3512 = vmatpush1.bf16.msra.mxu0 %v7250_v61  ;;  %3881 = vmatpush1.bf16.msra.mxu1 %v7251_v62  ;;  %v7336_v61 = vld [vmem:[#allocation5 + $0x3a0] ss:$16 sps:$4 sm:$0xff]   ;;  %v7339_v62 = vld [vmem:[#allocation5 + $0x3a8] ss:$16 sps:$4 sm:$0xff]  }
  0xef   :  { %3513 = vmatprep.subr.bf16.mxu0 %v7252_v63  ;;  %3882 = vmatprep.subr.bf16.mxu1 %v7254_v0  ;;  %v7344_v63 = vld [vmem:[#allocation5 + $0x3c4] ss:$16 sps:$4 sm:$0xff]   ;;  %v7347_v0 = vld [vmem:[#allocation5 + $0x3cc] ss:$16 sps:$4 sm:$0xff]  }
  0xf2   :  { %3514 = vmatpush1.bf16.msra.mxu0 %v7256_v1  ;;  %3883 = vmatpush1.bf16.msra.mxu1 %v7257_v2  ;;  %v7342_v1 = vld [vmem:[#allocation5 + $0x3c0] ss:$16 sps:$4 sm:$0xff]   ;;  %v7345_v2 = vld [vmem:[#allocation5 + $0x3c8] ss:$16 sps:$4 sm:$0xff]  }
  0xf3   :  { %3524 = vmatprep.subr.bf16.mxu0 %v7260_v4  ;;  %3893 = vmatprep.subr.bf16.mxu1 %v7263_v5  ;;  %v7353_v4 = vld [vmem:[#allocation5 + $0x3ec] ss:$16 sps:$4 sm:$0xff]   ;;  %v7348_v5 = vld [vmem:[#allocation5 + $0x3e0] ss:$16 sps:$4 sm:$0xff]  }
  0xf5   :  { %3516 = vmatmul.mubr.bf16.vlgmr.msra.gmra.mrb[0].mxu0 %v180_v6  ;;  %3885 = vmatmul.mubr.bf16.vlgmr.msra.gmra.mrb[0].mxu1 %v180_v6  ;;  %v7351_v6 = vld [vmem:[#allocation5 + $0x3e8] ss:$16 sps:$4 sm:$0xff]  }
  0xf6   :  { %3525 = vmatpush1.bf16.msra.mxu0 %v7258_v7  ;;  %3894 = vmatpush1.bf16.msra.mxu1 %v7261_v8  ;;  %v7356_v7 = vld [vmem:[#allocation5 + $0x404] ss:$16 sps:$4 sm:$0xff]   ;;  %v165_v8 = vld [vmem:[#allocation3 + $0x10] sm:$0xff] }
  0xf7   :  { %3526 = vmatprep.subr.bf16.mxu0 %v7266_v9  ;;  %3895 = vmatprep.subr.bf16.mxu1 %v7269_v10  ;;  %v7359_v9 = vld [vmem:[#allocation5 + $0x40c] ss:$16 sps:$4 sm:$0xff]   ;;  %v7354_v10 = vld [vmem:[#allocation5 + $0x400] ss:$16 sps:$4 sm:$0xff]  }
  0xf8   :  { %3556 = vmatprep.mubr.bf16.mxu0 %v183_v33  ;;  %3925 = vmatprep.mubr.bf16.mxu1 %v183_v33  ;;  %v7384_v33 = vld [vmem:[#allocation5 + $0x4a0] ss:$16 sps:$4 sm:$0xff]  }
  0xfa   :  { %3527 = vmatpush1.bf16.msra.mxu0 %v7264_v11  ;;  %3896 = vmatpush1.bf16.msra.mxu1 %v7267_v12  ;;  %v7357_v11 = vld [vmem:[#allocation5 + $0x408] ss:$16 sps:$4 sm:$0xff]   ;;  %v182_v12 = vpack.c.bf16 %v165_v8, %v165_v8  ;;  %v7449_v8 = vld [vmem:[#allocation5 + $0x5ec] ss:$16 sps:$4 sm:$0xff]  }
  0xfb   :  { %3528 = vmatprep.subr.bf16.mxu0 %v7272_v13  ;;  %3897 = vmatprep.subr.bf16.mxu1 %v7275_v14  ;;  %v7362_v13 = vld [vmem:[#allocation5 + $0x424] ss:$16 sps:$4 sm:$0xff]   ;;  %v7365_v14 = vld [vmem:[#allocation5 + $0x42c] ss:$16 sps:$4 sm:$0xff]  }
  0xfe   :  { %3529 = vmatpush1.bf16.msra.mxu0 %v7270_v15  ;;  %3898 = vmatpush1.bf16.msra.mxu1 %v7273_v16  ;;  %v168_v15 = vld [vmem:[#allocation3 + $0x28] sm:$0xff] }
  0xff   :  { %3530 = vmatprep.subr.bf16.mxu0 %v7278_v17  ;;  %3899 = vmatprep.subr.bf16.mxu1 %v7281_v18  ;;  %v185_v16 = vpack.c.bf16 %v168_v15, %v168_v15  ;;  %v7360_v17 = vld [vmem:[#allocation5 + $0x420] ss:$16 sps:$4 sm:$0xff]   ;;  %v7363_v18 = vld [vmem:[#allocation5 + $0x428] ss:$16 sps:$4 sm:$0xff]  }
 0x100   :  { %v7453_v15 = vld [vmem:[#allocation5 + $0x608] ss:$16 sps:$4 sm:$0xff]  }
 0x102   :  { %3531 = vmatpush1.bf16.msra.mxu0 %v7276_v19  ;;  %3900 = vmatpush1.bf16.msra.mxu1 %v7279_v20  ;;  %v7368_v19 = vld [vmem:[#allocation5 + $0x444] ss:$16 sps:$4 sm:$0xff]   ;;  %v7371_v20 = vld [vmem:[#allocation5 + $0x44c] ss:$16 sps:$4 sm:$0xff]  }
 0x103   :  { %3532 = vmatprep.subr.bf16.mxu0 %v7284_v21  ;;  %3901 = vmatprep.subr.bf16.mxu1 %v7287_v22  ;;  %v7366_v21 = vld [vmem:[#allocation5 + $0x440] ss:$16 sps:$4 sm:$0xff]   ;;  %v7369_v22 = vld [vmem:[#allocation5 + $0x448] ss:$16 sps:$4 sm:$0xff]  }
 0x106   :  { %3533 = vmatpush1.bf16.msra.mxu0 %v7282_v23  ;;  %3902 = vmatpush1.bf16.msra.mxu1 %v7285_v24  ;;  %v7374_v23 = vld [vmem:[#allocation5 + $0x464] ss:$16 sps:$4 sm:$0xff]   ;;  %v7377_v24 = vld [vmem:[#allocation5 + $0x46c] ss:$16 sps:$4 sm:$0xff]  }
 0x107   :  { %3534 = vmatprep.subr.bf16.mxu0 %v7290_v25  ;;  %3903 = vmatprep.subr.bf16.mxu1 %v7293_v26  ;;  %v7372_v25 = vld [vmem:[#allocation5 + $0x460] ss:$16 sps:$4 sm:$0xff]   ;;  %v7375_v26 = vld [vmem:[#allocation5 + $0x468] ss:$16 sps:$4 sm:$0xff]  }
 0x10a   :  { %3535 = vmatpush1.bf16.msra.mxu0 %v7288_v27  ;;  %3904 = vmatpush1.bf16.msra.mxu1 %v7291_v28  ;;  %v7380_v27 = vld [vmem:[#allocation5 + $0x484] ss:$16 sps:$4 sm:$0xff]   ;;  %v7383_v28 = vld [vmem:[#allocation5 + $0x48c] ss:$16 sps:$4 sm:$0xff]  }
 0x10b   :  { %3536 = vmatprep.subr.bf16.mxu0 %v7296_v29  ;;  %3905 = vmatprep.subr.bf16.mxu1 %v7299_v30  ;;  %v7378_v29 = vld [vmem:[#allocation5 + $0x480] ss:$16 sps:$4 sm:$0xff]   ;;  %v7381_v30 = vld [vmem:[#allocation5 + $0x488] ss:$16 sps:$4 sm:$0xff]  }
 0x10e   :  { %3537 = vmatpush1.bf16.msra.mxu0 %v7294_v32  ;;  %3906 = vmatpush1.bf16.msra.mxu1 %v7297_v34  ;;  %v7389_v32 = vld [vmem:[#allocation5 + $0x4ac] ss:$16 sps:$4 sm:$0xff]   ;;  %v7387_v34 = vld [vmem:[#allocation5 + $0x4a8] ss:$16 sps:$4 sm:$0xff]  }
 0x10f   :  { %3538 = vmatprep.subr.bf16.mxu0 %v7302_v35  ;;  %3907 = vmatprep.subr.bf16.mxu1 %v7305_v36  ;;  %v7392_v35 = vld [vmem:[#allocation5 + $0x4c4] ss:$16 sps:$4 sm:$0xff]   ;;  %v7395_v36 = vld [vmem:[#allocation5 + $0x4cc] ss:$16 sps:$4 sm:$0xff]  }
 0x112   :  { %3539 = vmatpush1.bf16.msra.mxu0 %v7300_v37  ;;  %3908 = vmatpush1.bf16.msra.mxu1 %v7303_v38  ;;  %v7390_v37 = vld [vmem:[#allocation5 + $0x4c0] ss:$16 sps:$4 sm:$0xff]   ;;  %v7393_v38 = vld [vmem:[#allocation5 + $0x4c8] ss:$16 sps:$4 sm:$0xff]  }
 0x113   :  { %3540 = vmatprep.subr.bf16.mxu0 %v7308_v39  ;;  %3909 = vmatprep.subr.bf16.mxu1 %v7311_v40  ;;  %v7398_v39 = vld [vmem:[#allocation5 + $0x4e4] ss:$16 sps:$4 sm:$0xff]   ;;  %v7401_v40 = vld [vmem:[#allocation5 + $0x4ec] ss:$16 sps:$4 sm:$0xff]  }
 0x116   :  { %3541 = vmatpush1.bf16.msra.mxu0 %v7306_v41  ;;  %3910 = vmatpush1.bf16.msra.mxu1 %v7309_v42  ;;  %v7396_v41 = vld [vmem:[#allocation5 + $0x4e0] ss:$16 sps:$4 sm:$0xff]   ;;  %v7399_v42 = vld [vmem:[#allocation5 + $0x4e8] ss:$16 sps:$4 sm:$0xff]  }
 0x117   :  { %3542 = vmatprep.subr.bf16.mxu0 %v7314_v43  ;;  %3911 = vmatprep.subr.bf16.mxu1 %v7317_v44  ;;  %v7404_v43 = vld [vmem:[#allocation5 + $0x504] ss:$16 sps:$4 sm:$0xff]   ;;  %v7407_v44 = vld [vmem:[#allocation5 + $0x50c] ss:$16 sps:$4 sm:$0xff]  }
 0x11a   :  { %3543 = vmatpush1.bf16.msra.mxu0 %v7312_v45  ;;  %3912 = vmatpush1.bf16.msra.mxu1 %v7315_v46  ;;  %v7402_v45 = vld [vmem:[#allocation5 + $0x500] ss:$16 sps:$4 sm:$0xff]   ;;  %v7405_v46 = vld [vmem:[#allocation5 + $0x508] ss:$16 sps:$4 sm:$0xff]  }
 0x11b   :  { %3544 = vmatprep.subr.bf16.mxu0 %v7320_v47  ;;  %3913 = vmatprep.subr.bf16.mxu1 %v7323_v48  ;;  %v7410_v47 = vld [vmem:[#allocation5 + $0x524] ss:$16 sps:$4 sm:$0xff]   ;;  %v7413_v48 = vld [vmem:[#allocation5 + $0x52c] ss:$16 sps:$4 sm:$0xff]  }
 0x11e   :  { %3545 = vmatpush1.bf16.msra.mxu0 %v7318_v49  ;;  %3914 = vmatpush1.bf16.msra.mxu1 %v7321_v50  ;;  %v7408_v49 = vld [vmem:[#allocation5 + $0x520] ss:$16 sps:$4 sm:$0xff]   ;;  %v7411_v50 = vld [vmem:[#allocation5 + $0x528] ss:$16 sps:$4 sm:$0xff]  }
 0x11f   :  { %3546 = vmatprep.subr.bf16.mxu0 %v7326_v51  ;;  %3915 = vmatprep.subr.bf16.mxu1 %v7329_v52  ;;  %v7416_v51 = vld [vmem:[#allocation5 + $0x544] ss:$16 sps:$4 sm:$0xff]   ;;  %v7419_v52 = vld [vmem:[#allocation5 + $0x54c] ss:$16 sps:$4 sm:$0xff]  }
 0x122   :  { %3547 = vmatpush1.bf16.msra.mxu0 %v7324_v53  ;;  %3916 = vmatpush1.bf16.msra.mxu1 %v7327_v54  ;;  %v7414_v53 = vld [vmem:[#allocation5 + $0x540] ss:$16 sps:$4 sm:$0xff]   ;;  %v7417_v54 = vld [vmem:[#allocation5 + $0x548] ss:$16 sps:$4 sm:$0xff]  }
 0x123   :  { %3548 = vmatprep.subr.bf16.mxu0 %v7332_v55  ;;  %3917 = vmatprep.subr.bf16.mxu1 %v7335_v56  ;;  %v7422_v55 = vld [vmem:[#allocation5 + $0x564] ss:$16 sps:$4 sm:$0xff]   ;;  %v7425_v56 = vld [vmem:[#allocation5 + $0x56c] ss:$16 sps:$4 sm:$0xff]  }
 0x126   :  { %3549 = vmatpush1.bf16.msra.mxu0 %v7330_v57  ;;  %3918 = vmatpush1.bf16.msra.mxu1 %v7333_v58  ;;  %v7420_v57 = vld [vmem:[#allocation5 + $0x560] ss:$16 sps:$4 sm:$0xff]   ;;  %v7423_v58 = vld [vmem:[#allocation5 + $0x568] ss:$16 sps:$4 sm:$0xff]  }
 0x127   :  { %3550 = vmatprep.subr.bf16.mxu0 %v7338_v59  ;;  %3919 = vmatprep.subr.bf16.mxu1 %v7341_v60  ;;  %v7428_v59 = vld [vmem:[#allocation5 + $0x584] ss:$16 sps:$4 sm:$0xff]   ;;  %v7431_v60 = vld [vmem:[#allocation5 + $0x58c] ss:$16 sps:$4 sm:$0xff]  }
 0x12a   :  { %3551 = vmatpush1.bf16.msra.mxu0 %v7336_v61  ;;  %3920 = vmatpush1.bf16.msra.mxu1 %v7339_v62  ;;  %v7426_v61 = vld [vmem:[#allocation5 + $0x580] ss:$16 sps:$4 sm:$0xff]   ;;  %v7429_v62 = vld [vmem:[#allocation5 + $0x588] ss:$16 sps:$4 sm:$0xff]  }
 0x12b   :  { %3552 = vmatprep.subr.bf16.mxu0 %v7344_v63  ;;  %3921 = vmatprep.subr.bf16.mxu1 %v7347_v0  ;;  %v7434_v63 = vld [vmem:[#allocation5 + $0x5a4] ss:$16 sps:$4 sm:$0xff]   ;;  %v7437_v0 = vld [vmem:[#allocation5 + $0x5ac] ss:$16 sps:$4 sm:$0xff]  }
 0x12e   :  { %3553 = vmatpush1.bf16.msra.mxu0 %v7342_v1  ;;  %3922 = vmatpush1.bf16.msra.mxu1 %v7345_v2  ;;  %v7432_v1 = vld [vmem:[#allocation5 + $0x5a0] ss:$16 sps:$4 sm:$0xff]   ;;  %v7435_v2 = vld [vmem:[#allocation5 + $0x5a8] ss:$16 sps:$4 sm:$0xff]  }
 0x12f   :  { %3554 = vmatprep.subr.bf16.mxu0 %v7350_v3  ;;  %3923 = vmatprep.subr.bf16.mxu1 %v7353_v4  ;;  %v7440_v3 = vld [vmem:[#allocation5 + $0x5c4] ss:$16 sps:$4 sm:$0xff]   ;;  %v7443_v4 = vld [vmem:[#allocation5 + $0x5cc] ss:$16 sps:$4 sm:$0xff]  }
 0x132   :  { %3555 = vmatpush1.bf16.msra.mxu0 %v7348_v5  ;;  %3924 = vmatpush1.bf16.msra.mxu1 %v7351_v6  ;;  %v7438_v5 = vld [vmem:[#allocation5 + $0x5c0] ss:$16 sps:$4 sm:$0xff]   ;;  %v7441_v6 = vld [vmem:[#allocation5 + $0x5c8] ss:$16 sps:$4 sm:$0xff]  }
 0x133   :  { %3565 = vmatprep.subr.bf16.mxu0 %v7356_v7  ;;  %3934 = vmatprep.subr.bf16.mxu1 %v7359_v9  ;;  %v7446_v7 = vld [vmem:[#allocation5 + $0x5e4] ss:$16 sps:$4 sm:$0xff]   ;;  %v7444_v9 = vld [vmem:[#allocation5 + $0x5e0] ss:$16 sps:$4 sm:$0xff]  }
 0x135   :  { %3557 = vmatmul.mubr.bf16.vlgmr.msra.gmra.mrb[0].mxu0 %v182_v12  ;;  %3926 = vmatmul.mubr.bf16.vlgmr.msra.gmra.mrb[0].mxu1 %v182_v12  ;;  %v167_v12 = vld [vmem:[#allocation3 + $0x20] sm:$0xff] }
 0x136   :  { %3566 = vmatpush1.bf16.msra.mxu0 %v7354_v10  ;;  %3935 = vmatpush1.bf16.msra.mxu1 %v7357_v11  ;;  %v7447_v10 = vld [vmem:[#allocation5 + $0x5e8] ss:$16 sps:$4 sm:$0xff]   ;;  %v7452_v11 = vld [vmem:[#allocation5 + $0x604] ss:$16 sps:$4 sm:$0xff]  }
 0x137   :  { %3567 = vmatprep.subr.bf16.mxu0 %v7362_v13  ;;  %3936 = vmatprep.subr.bf16.mxu1 %v7365_v14  ;;  %v7455_v13 = vld [vmem:[#allocation5 + $0x60c] ss:$16 sps:$4 sm:$0xff]   ;;  %v7450_v14 = vld [vmem:[#allocation5 + $0x600] ss:$16 sps:$4 sm:$0xff]  }
 0x138   :  { %3597 = vmatprep.mubr.bf16.mxu0 %v185_v16  ;;  %3966 = vmatprep.mubr.bf16.mxu1 %v185_v16  ;;  %v184_v16 = vpack.c.bf16 %v167_v12, %v167_v12  ;;  %v7545_v12 = vld [vmem:[#allocation5 + $0x7ec] ss:$16 sps:$4 sm:$0xff]  }
 0x13a   :  { %3568 = vmatpush1.bf16.msra.mxu0 %v7360_v17  ;;  %3937 = vmatpush1.bf16.msra.mxu1 %v7363_v18  ;;  %v170_v17 = vld [vmem:[#allocation3 + $0x38] sm:$0xff] }
 0x13b   :  { %3569 = vmatprep.subr.bf16.mxu0 %v7368_v19  ;;  %3938 = vmatprep.subr.bf16.mxu1 %v7371_v20  ;;  %v7458_v18 = vld [vmem:[#allocation5 + $0x624] ss:$16 sps:$4 sm:$0xff]   ;;  %v7461_v19 = vld [vmem:[#allocation5 + $0x62c] ss:$16 sps:$4 sm:$0xff]   ;;  %v187_v20 = vpack.c.bf16 %v170_v17, %v170_v17 }
 0x13c   :  { %v7551_v17 = vld [vmem:[#allocation5 + $0x80c] ss:$16 sps:$4 sm:$0xff]  }
 0x13e   :  { %3570 = vmatpush1.bf16.msra.mxu0 %v7366_v21  ;;  %3939 = vmatpush1.bf16.msra.mxu1 %v7369_v22  ;;  %v7456_v21 = vld [vmem:[#allocation5 + $0x620] ss:$16 sps:$4 sm:$0xff]   ;;  %v7459_v22 = vld [vmem:[#allocation5 + $0x628] ss:$16 sps:$4 sm:$0xff]  }
 0x13f   :  { %3571 = vmatprep.subr.bf16.mxu0 %v7374_v23  ;;  %3940 = vmatprep.subr.bf16.mxu1 %v7377_v24  ;;  %v7464_v23 = vld [vmem:[#allocation5 + $0x644] ss:$16 sps:$4 sm:$0xff]   ;;  %v7467_v24 = vld [vmem:[#allocation5 + $0x64c] ss:$16 sps:$4 sm:$0xff]  }
 0x142   :  { %3572 = vmatpush1.bf16.msra.mxu0 %v7372_v25  ;;  %3941 = vmatpush1.bf16.msra.mxu1 %v7375_v26  ;;  %v7462_v25 = vld [vmem:[#allocation5 + $0x640] ss:$16 sps:$4 sm:$0xff]   ;;  %v7465_v26 = vld [vmem:[#allocation5 + $0x648] ss:$16 sps:$4 sm:$0xff]  }
 0x143   :  { %3573 = vmatprep.subr.bf16.mxu0 %v7380_v27  ;;  %3942 = vmatprep.subr.bf16.mxu1 %v7383_v28  ;;  %v7470_v27 = vld [vmem:[#allocation5 + $0x664] ss:$16 sps:$4 sm:$0xff]   ;;  %v7473_v28 = vld [vmem:[#allocation5 + $0x66c] ss:$16 sps:$4 sm:$0xff]  }
 0x146   :  { %3574 = vmatpush1.bf16.msra.mxu0 %v7378_v29  ;;  %3943 = vmatpush1.bf16.msra.mxu1 %v7381_v30  ;;  %v7468_v29 = vld [vmem:[#allocation5 + $0x660] ss:$16 sps:$4 sm:$0xff]   ;;  %v7471_v30 = vld [vmem:[#allocation5 + $0x668] ss:$16 sps:$4 sm:$0xff]  }
 0x147   :  { %3575 = vmatprep.subr.bf16.mxu0 %v7386_v31  ;;  %3944 = vmatprep.subr.bf16.mxu1 %v7389_v32  ;;  %v7476_v31 = vld [vmem:[#allocation5 + $0x684] ss:$16 sps:$4 sm:$0xff]   ;;  %v7479_v32 = vld [vmem:[#allocation5 + $0x68c] ss:$16 sps:$4 sm:$0xff]  }
 0x14a   :  { %3576 = vmatpush1.bf16.msra.mxu0 %v7384_v33  ;;  %3945 = vmatpush1.bf16.msra.mxu1 %v7387_v34  ;;  %v7474_v33 = vld [vmem:[#allocation5 + $0x680] ss:$16 sps:$4 sm:$0xff]   ;;  %v7477_v34 = vld [vmem:[#allocation5 + $0x688] ss:$16 sps:$4 sm:$0xff]  }
 0x14b   :  { %3577 = vmatprep.subr.bf16.mxu0 %v7392_v35  ;;  %3946 = vmatprep.subr.bf16.mxu1 %v7395_v36  ;;  %v7482_v35 = vld [vmem:[#allocation5 + $0x6a4] ss:$16 sps:$4 sm:$0xff]   ;;  %v7485_v36 = vld [vmem:[#allocation5 + $0x6ac] ss:$16 sps:$4 sm:$0xff]  }
 0x14e   :  { %3578 = vmatpush1.bf16.msra.mxu0 %v7390_v37  ;;  %3947 = vmatpush1.bf16.msra.mxu1 %v7393_v38  ;;  %v7480_v37 = vld [vmem:[#allocation5 + $0x6a0] ss:$16 sps:$4 sm:$0xff]   ;;  %v7483_v38 = vld [vmem:[#allocation5 + $0x6a8] ss:$16 sps:$4 sm:$0xff]  }
 0x14f   :  { %3579 = vmatprep.subr.bf16.mxu0 %v7398_v39  ;;  %3948 = vmatprep.subr.bf16.mxu1 %v7401_v40  ;;  %v7488_v39 = vld [vmem:[#allocation5 + $0x6c4] ss:$16 sps:$4 sm:$0xff]   ;;  %v7491_v40 = vld [vmem:[#allocation5 + $0x6cc] ss:$16 sps:$4 sm:$0xff]  }
 0x152   :  { %3580 = vmatpush1.bf16.msra.mxu0 %v7396_v41  ;;  %3949 = vmatpush1.bf16.msra.mxu1 %v7399_v42  ;;  %v7486_v41 = vld [vmem:[#allocation5 + $0x6c0] ss:$16 sps:$4 sm:$0xff]   ;;  %v7489_v42 = vld [vmem:[#allocation5 + $0x6c8] ss:$16 sps:$4 sm:$0xff]  }
 0x153   :  { %3581 = vmatprep.subr.bf16.mxu0 %v7404_v43  ;;  %3950 = vmatprep.subr.bf16.mxu1 %v7407_v44  ;;  %v7494_v43 = vld [vmem:[#allocation5 + $0x6e4] ss:$16 sps:$4 sm:$0xff]   ;;  %v7497_v44 = vld [vmem:[#allocation5 + $0x6ec] ss:$16 sps:$4 sm:$0xff]  }
 0x156   :  { %3582 = vmatpush1.bf16.msra.mxu0 %v7402_v45  ;;  %3951 = vmatpush1.bf16.msra.mxu1 %v7405_v46  ;;  %v7492_v45 = vld [vmem:[#allocation5 + $0x6e0] ss:$16 sps:$4 sm:$0xff]   ;;  %v7495_v46 = vld [vmem:[#allocation5 + $0x6e8] ss:$16 sps:$4 sm:$0xff]  }
 0x157   :  { %3583 = vmatprep.subr.bf16.mxu0 %v7410_v47  ;;  %3952 = vmatprep.subr.bf16.mxu1 %v7413_v48  ;;  %v7500_v47 = vld [vmem:[#allocation5 + $0x704] ss:$16 sps:$4 sm:$0xff]   ;;  %v7503_v48 = vld [vmem:[#allocation5 + $0x70c] ss:$16 sps:$4 sm:$0xff]  }
 0x15a   :  { %3584 = vmatpush1.bf16.msra.mxu0 %v7408_v49  ;;  %3953 = vmatpush1.bf16.msra.mxu1 %v7411_v50  ;;  %v7498_v49 = vld [vmem:[#allocation5 + $0x700] ss:$16 sps:$4 sm:$0xff]   ;;  %v7501_v50 = vld [vmem:[#allocation5 + $0x708] ss:$16 sps:$4 sm:$0xff]  }
 0x15b   :  { %3585 = vmatprep.subr.bf16.mxu0 %v7416_v51  ;;  %3954 = vmatprep.subr.bf16.mxu1 %v7419_v52  ;;  %v7506_v51 = vld [vmem:[#allocation5 + $0x724] ss:$16 sps:$4 sm:$0xff]   ;;  %v7509_v52 = vld [vmem:[#allocation5 + $0x72c] ss:$16 sps:$4 sm:$0xff]  }
 0x15e   :  { %3586 = vmatpush1.bf16.msra.mxu0 %v7414_v53  ;;  %3955 = vmatpush1.bf16.msra.mxu1 %v7417_v54  ;;  %v7504_v53 = vld [vmem:[#allocation5 + $0x720] ss:$16 sps:$4 sm:$0xff]   ;;  %v7507_v54 = vld [vmem:[#allocation5 + $0x728] ss:$16 sps:$4 sm:$0xff]  }
 0x15f   :  { %3587 = vmatprep.subr.bf16.mxu0 %v7422_v55  ;;  %3956 = vmatprep.subr.bf16.mxu1 %v7425_v56  ;;  %v7512_v55 = vld [vmem:[#allocation5 + $0x744] ss:$16 sps:$4 sm:$0xff]   ;;  %v7515_v56 = vld [vmem:[#allocation5 + $0x74c] ss:$16 sps:$4 sm:$0xff]  }
 0x162   :  { %3588 = vmatpush1.bf16.msra.mxu0 %v7420_v57  ;;  %3957 = vmatpush1.bf16.msra.mxu1 %v7423_v58  ;;  %v7510_v57 = vld [vmem:[#allocation5 + $0x740] ss:$16 sps:$4 sm:$0xff]   ;;  %v7513_v58 = vld [vmem:[#allocation5 + $0x748] ss:$16 sps:$4 sm:$0xff]  }
 0x163   :  { %3589 = vmatprep.subr.bf16.mxu0 %v7428_v59  ;;  %3958 = vmatprep.subr.bf16.mxu1 %v7431_v60  ;;  %v7518_v59 = vld [vmem:[#allocation5 + $0x764] ss:$16 sps:$4 sm:$0xff]   ;;  %v7521_v60 = vld [vmem:[#allocation5 + $0x76c] ss:$16 sps:$4 sm:$0xff]  }
 0x166   :  { %3590 = vmatpush1.bf16.msra.mxu0 %v7426_v61  ;;  %3959 = vmatpush1.bf16.msra.mxu1 %v7429_v62  ;;  %v7516_v61 = vld [vmem:[#allocation5 + $0x760] ss:$16 sps:$4 sm:$0xff]   ;;  %v7519_v62 = vld [vmem:[#allocation5 + $0x768] ss:$16 sps:$4 sm:$0xff]  }
 0x167   :  { %3591 = vmatprep.subr.bf16.mxu0 %v7434_v63  ;;  %3960 = vmatprep.subr.bf16.mxu1 %v7437_v0  ;;  %v7524_v63 = vld [vmem:[#allocation5 + $0x784] ss:$16 sps:$4 sm:$0xff]   ;;  %v7527_v0 = vld [vmem:[#allocation5 + $0x78c] ss:$16 sps:$4 sm:$0xff]  }
 0x16a   :  { %3592 = vmatpush1.bf16.msra.mxu0 %v7432_v1  ;;  %3961 = vmatpush1.bf16.msra.mxu1 %v7435_v2  ;;  %v7522_v1 = vld [vmem:[#allocation5 + $0x780] ss:$16 sps:$4 sm:$0xff]   ;;  %v7525_v2 = vld [vmem:[#allocation5 + $0x788] ss:$16 sps:$4 sm:$0xff]  }
 0x16b   :  { %3593 = vmatprep.subr.bf16.mxu0 %v7440_v3  ;;  %3962 = vmatprep.subr.bf16.mxu1 %v7443_v4  ;;  %v7530_v3 = vld [vmem:[#allocation5 + $0x7a4] ss:$16 sps:$4 sm:$0xff]   ;;  %v7533_v4 = vld [vmem:[#allocation5 + $0x7ac] ss:$16 sps:$4 sm:$0xff]  }
 0x16e   :  { %3594 = vmatpush1.bf16.msra.mxu0 %v7438_v5  ;;  %3963 = vmatpush1.bf16.msra.mxu1 %v7441_v6  ;;  %v7528_v5 = vld [vmem:[#allocation5 + $0x7a0] ss:$16 sps:$4 sm:$0xff]   ;;  %v7531_v6 = vld [vmem:[#allocation5 + $0x7a8] ss:$16 sps:$4 sm:$0xff]  }
 0x16f   :  { %3595 = vmatprep.subr.bf16.mxu0 %v7446_v7  ;;  %3964 = vmatprep.subr.bf16.mxu1 %v7449_v8  ;;  %v7536_v7 = vld [vmem:[#allocation5 + $0x7c4] ss:$16 sps:$4 sm:$0xff]   ;;  %v7539_v8 = vld [vmem:[#allocation5 + $0x7cc] ss:$16 sps:$4 sm:$0xff]  }
 0x172   :  { %3596 = vmatpush1.bf16.msra.mxu0 %v7444_v9  ;;  %3965 = vmatpush1.bf16.msra.mxu1 %v7447_v10  ;;  %v7534_v9 = vld [vmem:[#allocation5 + $0x7c0] ss:$16 sps:$4 sm:$0xff]   ;;  %v7537_v10 = vld [vmem:[#allocation5 + $0x7c8] ss:$16 sps:$4 sm:$0xff]  }
 0x173   :  { %3606 = vmatprep.subr.bf16.mxu0 %v7452_v11  ;;  %3975 = vmatprep.subr.bf16.mxu1 %v7455_v13  ;;  %v7542_v11 = vld [vmem:[#allocation5 + $0x7e4] ss:$16 sps:$4 sm:$0xff]   ;;  %v7540_v13 = vld [vmem:[#allocation5 + $0x7e0] ss:$16 sps:$4 sm:$0xff]  }
 0x175   :  { %3598 = vmatmul.mubr.bf16.vlgmr.msra.gmra.mrb[0].mxu0 %v184_v16  ;;  %3967 = vmatmul.mubr.bf16.vlgmr.msra.gmra.mrb[0].mxu1 %v184_v16  ;;  %v7548_v16 = vld [vmem:[#allocation5 + $0x804] ss:$16 sps:$4 sm:$0xff]  }
 0x176   :  { %3607 = vmatpush1.bf16.msra.mxu0 %v7450_v14  ;;  %3976 = vmatpush1.bf16.msra.mxu1 %v7453_v15  ;;  %v7543_v14 = vld [vmem:[#allocation5 + $0x7e8] ss:$16 sps:$4 sm:$0xff]  }
 0x177   :  { %3608 = vmatprep.subr.bf16.mxu0 %v7458_v18  ;;  %3977 = vmatprep.subr.bf16.mxu1 %v7461_v19  ;;  %v169_v15 = vld [vmem:[#allocation3 + $0x30] sm:$0xff]  ;;  %v172_v19 = vld [vmem:[#allocation3 + $0x48] sm:$0xff] }
 0x178   :  { %3638 = vmatprep.mubr.bf16.mxu0 %v187_v20  ;;  %4007 = vmatprep.mubr.bf16.mxu1 %v187_v20  ;;  %v186_v18 = vpack.c.bf16 %v169_v15, %v169_v15  ;;  %v7546_v20 = vld [vmem:[#allocation5 + $0x800] ss:$16 sps:$4 sm:$0xff]   ;;  %v7638_v15 = vld [vmem:[#allocation5 + $0x9e4] ss:$16 sps:$4 sm:$0xff]  }
 0x17a   :  { %3609 = vmatpush1.bf16.msra.mxu0 %v7456_v21  ;;  %3978 = vmatpush1.bf16.msra.mxu1 %v7459_v22  ;;  %v7549_v21 = vld [vmem:[#allocation5 + $0x808] ss:$16 sps:$4 sm:$0xff]   ;;  %v7554_v22 = vld [vmem:[#allocation5 + $0x824] ss:$16 sps:$4 sm:$0xff]  }
 0x17b   :  { %3610 = vmatprep.subr.bf16.mxu0 %v7464_v23  ;;  %3979 = vmatprep.subr.bf16.mxu1 %v7467_v24  ;;  %v7557_v23 = vld [vmem:[#allocation5 + $0x82c] ss:$16 sps:$4 sm:$0xff]   ;;  %v189_v24 = vpack.c.bf16 %v172_v19, %v172_v19  ;;  %v7644_v19 = vld [vmem:[#allocation5 + $0xa04] ss:$16 sps:$4 sm:$0xff]  }
 0x17e   :  { %3611 = vmatpush1.bf16.msra.mxu0 %v7462_v25  ;;  %3980 = vmatpush1.bf16.msra.mxu1 %v7465_v26  ;;  %v7552_v25 = vld [vmem:[#allocation5 + $0x820] ss:$16 sps:$4 sm:$0xff]   ;;  %v7555_v26 = vld [vmem:[#allocation5 + $0x828] ss:$16 sps:$4 sm:$0xff]  }
 0x17f   :  { %3612 = vmatprep.subr.bf16.mxu0 %v7470_v27  ;;  %3981 = vmatprep.subr.bf16.mxu1 %v7473_v28  ;;  %v7560_v27 = vld [vmem:[#allocation5 + $0x844] ss:$16 sps:$4 sm:$0xff]   ;;  %v7563_v28 = vld [vmem:[#allocation5 + $0x84c] ss:$16 sps:$4 sm:$0xff]  }
 0x182   :  { %3613 = vmatpush1.bf16.msra.mxu0 %v7468_v29  ;;  %3982 = vmatpush1.bf16.msra.mxu1 %v7471_v30  ;;  %v7558_v29 = vld [vmem:[#allocation5 + $0x840] ss:$16 sps:$4 sm:$0xff]   ;;  %v7561_v30 = vld [vmem:[#allocation5 + $0x848] ss:$16 sps:$4 sm:$0xff]  }
 0x183   :  { %3614 = vmatprep.subr.bf16.mxu0 %v7476_v31  ;;  %3983 = vmatprep.subr.bf16.mxu1 %v7479_v32  ;;  %v7566_v31 = vld [vmem:[#allocation5 + $0x864] ss:$16 sps:$4 sm:$0xff]   ;;  %v7569_v32 = vld [vmem:[#allocation5 + $0x86c] ss:$16 sps:$4 sm:$0xff]  }
 0x186   :  { %3615 = vmatpush1.bf16.msra.mxu0 %v7474_v33  ;;  %3984 = vmatpush1.bf16.msra.mxu1 %v7477_v34  ;;  %v7564_v33 = vld [vmem:[#allocation5 + $0x860] ss:$16 sps:$4 sm:$0xff]   ;;  %v7567_v34 = vld [vmem:[#allocation5 + $0x868] ss:$16 sps:$4 sm:$0xff]  }
 0x187   :  { %3616 = vmatprep.subr.bf16.mxu0 %v7482_v35  ;;  %3985 = vmatprep.subr.bf16.mxu1 %v7485_v36  ;;  %v7572_v35 = vld [vmem:[#allocation5 + $0x884] ss:$16 sps:$4 sm:$0xff]   ;;  %v7575_v36 = vld [vmem:[#allocation5 + $0x88c] ss:$16 sps:$4 sm:$0xff]  }
 0x18a   :  { %3617 = vmatpush1.bf16.msra.mxu0 %v7480_v37  ;;  %3986 = vmatpush1.bf16.msra.mxu1 %v7483_v38  ;;  %v7570_v37 = vld [vmem:[#allocation5 + $0x880] ss:$16 sps:$4 sm:$0xff]   ;;  %v7573_v38 = vld [vmem:[#allocation5 + $0x888] ss:$16 sps:$4 sm:$0xff]  }
 0x18b   :  { %3618 = vmatprep.subr.bf16.mxu0 %v7488_v39  ;;  %3987 = vmatprep.subr.bf16.mxu1 %v7491_v40  ;;  %v7578_v39 = vld [vmem:[#allocation5 + $0x8a4] ss:$16 sps:$4 sm:$0xff]   ;;  %v7581_v40 = vld [vmem:[#allocation5 + $0x8ac] ss:$16 sps:$4 sm:$0xff]  }
 0x18e   :  { %3619 = vmatpush1.bf16.msra.mxu0 %v7486_v41  ;;  %3988 = vmatpush1.bf16.msra.mxu1 %v7489_v42  ;;  %v7576_v41 = vld [vmem:[#allocation5 + $0x8a0] ss:$16 sps:$4 sm:$0xff]   ;;  %v7579_v42 = vld [vmem:[#allocation5 + $0x8a8] ss:$16 sps:$4 sm:$0xff]  }
 0x18f   :  { %3620 = vmatprep.subr.bf16.mxu0 %v7494_v43  ;;  %3989 = vmatprep.subr.bf16.mxu1 %v7497_v44  ;;  %v7584_v43 = vld [vmem:[#allocation5 + $0x8c4] ss:$16 sps:$4 sm:$0xff]   ;;  %v7587_v44 = vld [vmem:[#allocation5 + $0x8cc] ss:$16 sps:$4 sm:$0xff]  }
 0x192   :  { %3621 = vmatpush1.bf16.msra.mxu0 %v7492_v45  ;;  %3990 = vmatpush1.bf16.msra.mxu1 %v7495_v46  ;;  %v7582_v45 = vld [vmem:[#allocation5 + $0x8c0] ss:$16 sps:$4 sm:$0xff]   ;;  %v7585_v46 = vld [vmem:[#allocation5 + $0x8c8] ss:$16 sps:$4 sm:$0xff]  }
 0x193   :  { %3622 = vmatprep.subr.bf16.mxu0 %v7500_v47  ;;  %3991 = vmatprep.subr.bf16.mxu1 %v7503_v48  ;;  %v7590_v47 = vld [vmem:[#allocation5 + $0x8e4] ss:$16 sps:$4 sm:$0xff]   ;;  %v7593_v48 = vld [vmem:[#allocation5 + $0x8ec] ss:$16 sps:$4 sm:$0xff]  }
 0x196   :  { %3623 = vmatpush1.bf16.msra.mxu0 %v7498_v49  ;;  %3992 = vmatpush1.bf16.msra.mxu1 %v7501_v50  ;;  %v7588_v49 = vld [vmem:[#allocation5 + $0x8e0] ss:$16 sps:$4 sm:$0xff]   ;;  %v7591_v50 = vld [vmem:[#allocation5 + $0x8e8] ss:$16 sps:$4 sm:$0xff]  }
 0x197   :  { %3624 = vmatprep.subr.bf16.mxu0 %v7506_v51  ;;  %3993 = vmatprep.subr.bf16.mxu1 %v7509_v52  ;;  %v7596_v51 = vld [vmem:[#allocation5 + $0x904] ss:$16 sps:$4 sm:$0xff]   ;;  %v7599_v52 = vld [vmem:[#allocation5 + $0x90c] ss:$16 sps:$4 sm:$0xff]  }
 0x19a   :  { %3625 = vmatpush1.bf16.msra.mxu0 %v7504_v53  ;;  %3994 = vmatpush1.bf16.msra.mxu1 %v7507_v54  ;;  %v7594_v53 = vld [vmem:[#allocation5 + $0x900] ss:$16 sps:$4 sm:$0xff]   ;;  %v7597_v54 = vld [vmem:[#allocation5 + $0x908] ss:$16 sps:$4 sm:$0xff]  }
 0x19b   :  { %3626 = vmatprep.subr.bf16.mxu0 %v7512_v55  ;;  %3995 = vmatprep.subr.bf16.mxu1 %v7515_v56  ;;  %v7602_v55 = vld [vmem:[#allocation5 + $0x924] ss:$16 sps:$4 sm:$0xff]   ;;  %v7605_v56 = vld [vmem:[#allocation5 + $0x92c] ss:$16 sps:$4 sm:$0xff]  }
 0x19e   :  { %3627 = vmatpush1.bf16.msra.mxu0 %v7510_v57  ;;  %3996 = vmatpush1.bf16.msra.mxu1 %v7513_v58  ;;  %v7600_v57 = vld [vmem:[#allocation5 + $0x920] ss:$16 sps:$4 sm:$0xff]   ;;  %v7603_v58 = vld [vmem:[#allocation5 + $0x928] ss:$16 sps:$4 sm:$0xff]  }
 0x19f   :  { %3628 = vmatprep.subr.bf16.mxu0 %v7518_v59  ;;  %3997 = vmatprep.subr.bf16.mxu1 %v7521_v60  ;;  %v7608_v59 = vld [vmem:[#allocation5 + $0x944] ss:$16 sps:$4 sm:$0xff]   ;;  %v7611_v60 = vld [vmem:[#allocation5 + $0x94c] ss:$16 sps:$4 sm:$0xff]  }
 0x1a2   :  { %3629 = vmatpush1.bf16.msra.mxu0 %v7516_v61  ;;  %3998 = vmatpush1.bf16.msra.mxu1 %v7519_v62  ;;  %v7606_v61 = vld [vmem:[#allocation5 + $0x940] ss:$16 sps:$4 sm:$0xff]   ;;  %v7609_v62 = vld [vmem:[#allocation5 + $0x948] ss:$16 sps:$4 sm:$0xff]  }
 0x1a3   :  { %3630 = vmatprep.subr.bf16.mxu0 %v7524_v63  ;;  %3999 = vmatprep.subr.bf16.mxu1 %v7527_v0  ;;  %v7614_v63 = vld [vmem:[#allocation5 + $0x964] ss:$16 sps:$4 sm:$0xff]   ;;  %v7617_v0 = vld [vmem:[#allocation5 + $0x96c] ss:$16 sps:$4 sm:$0xff]  }
 0x1a6   :  { %3631 = vmatpush1.bf16.msra.mxu0 %v7522_v1  ;;  %4000 = vmatpush1.bf16.msra.mxu1 %v7525_v2  ;;  %v7612_v1 = vld [vmem:[#allocation5 + $0x960] ss:$16 sps:$4 sm:$0xff]   ;;  %v7615_v2 = vld [vmem:[#allocation5 + $0x968] ss:$16 sps:$4 sm:$0xff]  }
 0x1a7   :  { %3632 = vmatprep.subr.bf16.mxu0 %v7530_v3  ;;  %4001 = vmatprep.subr.bf16.mxu1 %v7533_v4  ;;  %v7620_v3 = vld [vmem:[#allocation5 + $0x984] ss:$16 sps:$4 sm:$0xff]   ;;  %v7623_v4 = vld [vmem:[#allocation5 + $0x98c] ss:$16 sps:$4 sm:$0xff]  }
 0x1aa   :  { %3633 = vmatpush1.bf16.msra.mxu0 %v7528_v5  ;;  %4002 = vmatpush1.bf16.msra.mxu1 %v7531_v6  ;;  %v7618_v5 = vld [vmem:[#allocation5 + $0x980] ss:$16 sps:$4 sm:$0xff]   ;;  %v7621_v6 = vld [vmem:[#allocation5 + $0x988] ss:$16 sps:$4 sm:$0xff]  }
 0x1ab   :  { %3634 = vmatprep.subr.bf16.mxu0 %v7536_v7  ;;  %4003 = vmatprep.subr.bf16.mxu1 %v7539_v8  ;;  %v7626_v7 = vld [vmem:[#allocation5 + $0x9a4] ss:$16 sps:$4 sm:$0xff]   ;;  %v7629_v8 = vld [vmem:[#allocation5 + $0x9ac] ss:$16 sps:$4 sm:$0xff]  }
 0x1ae   :  { %3635 = vmatpush1.bf16.msra.mxu0 %v7534_v9  ;;  %4004 = vmatpush1.bf16.msra.mxu1 %v7537_v10  ;;  %v7624_v9 = vld [vmem:[#allocation5 + $0x9a0] ss:$16 sps:$4 sm:$0xff]   ;;  %v7627_v10 = vld [vmem:[#allocation5 + $0x9a8] ss:$16 sps:$4 sm:$0xff]  }
 0x1af   :  { %3636 = vmatprep.subr.bf16.mxu0 %v7542_v11  ;;  %4005 = vmatprep.subr.bf16.mxu1 %v7545_v12  ;;  %v7632_v11 = vld [vmem:[#allocation5 + $0x9c4] ss:$16 sps:$4 sm:$0xff]   ;;  %v7635_v12 = vld [vmem:[#allocation5 + $0x9cc] ss:$16 sps:$4 sm:$0xff]  }
 0x1b2   :  { %3637 = vmatpush1.bf16.msra.mxu0 %v7540_v13  ;;  %4006 = vmatpush1.bf16.msra.mxu1 %v7543_v14  ;;  %v7630_v13 = vld [vmem:[#allocation5 + $0x9c0] ss:$16 sps:$4 sm:$0xff]   ;;  %v7633_v14 = vld [vmem:[#allocation5 + $0x9c8] ss:$16 sps:$4 sm:$0xff]  }
 0x1b3   :  { %3647 = vmatprep.subr.bf16.mxu0 %v7548_v16  ;;  %4016 = vmatprep.subr.bf16.mxu1 %v7551_v17  ;;  %v7641_v16 = vld [vmem:[#allocation5 + $0x9ec] ss:$16 sps:$4 sm:$0xff]   ;;  %v7636_v17 = vld [vmem:[#allocation5 + $0x9e0] ss:$16 sps:$4 sm:$0xff]  }
 0x1b5   :  { %3639 = vmatmul.mubr.bf16.vlgmr.msra.gmra.mrb[0].mxu0 %v186_v18  ;;  %4008 = vmatmul.mubr.bf16.vlgmr.msra.gmra.mrb[0].mxu1 %v186_v18  ;;  %v7639_v18 = vld [vmem:[#allocation5 + $0x9e8] ss:$16 sps:$4 sm:$0xff]  }
 0x1b6   :  { %3648 = vmatpush1.bf16.msra.mxu0 %v7546_v20  ;;  %4017 = vmatpush1.bf16.msra.mxu1 %v7549_v21  ;;  %v171_v20 = vld [vmem:[#allocation3 + $0x40] sm:$0xff] }
 0x1b7   :  { %3649 = vmatprep.subr.bf16.mxu0 %v7554_v22  ;;  %4018 = vmatprep.subr.bf16.mxu1 %v7557_v23  ;;  %v7647_v21 = vld [vmem:[#allocation5 + $0xa0c] ss:$16 sps:$4 sm:$0xff]   ;;  %v174_v22 = vld [vmem:[#allocation3 + $0x58] sm:$0xff]  ;;  %v188_v23 = vpack.c.bf16 %v171_v20, %v171_v20 }
 0x1b8   :  { %3679 = vmatprep.mubr.bf16.mxu0 %v189_v24  ;;  %4048 = vmatprep.mubr.bf16.mxu1 %v189_v24  ;;  %v7642_v24 = vld [vmem:[#allocation5 + $0xa00] ss:$16 sps:$4 sm:$0xff]   ;;  %v7737_v20 = vld [vmem:[#allocation5 + $0xbec] ss:$16 sps:$4 sm:$0xff]  }
 0x1ba   :  { %3650 = vmatpush1.bf16.msra.mxu0 %v7552_v25  ;;  %4019 = vmatpush1.bf16.msra.mxu1 %v7555_v26  ;;  %v7645_v25 = vld [vmem:[#allocation5 + $0xa08] ss:$16 sps:$4 sm:$0xff]   ;;  %v7650_v26 = vld [vmem:[#allocation5 + $0xa24] ss:$16 sps:$4 sm:$0xff]  }
 0x1bb   :  { %3651 = vmatprep.subr.bf16.mxu0 %v7560_v27  ;;  %4020 = vmatprep.subr.bf16.mxu1 %v7563_v28  ;;  %v7653_v27 = vld [vmem:[#allocation5 + $0xa2c] ss:$16 sps:$4 sm:$0xff]   ;;  %v191_v28 = vpack.c.bf16 %v174_v22, %v174_v22  ;;  %v7735_v22 = vld [vmem:[#allocation5 + $0xbe8] ss:$16 sps:$4 sm:$0xff]  }
 0x1be   :  { %3652 = vmatpush1.bf16.msra.mxu0 %v7558_v29  ;;  %4021 = vmatpush1.bf16.msra.mxu1 %v7561_v30  ;;  %v7648_v29 = vld [vmem:[#allocation5 + $0xa20] ss:$16 sps:$4 sm:$0xff]   ;;  %v7651_v30 = vld [vmem:[#allocation5 + $0xa28] ss:$16 sps:$4 sm:$0xff]  }
 0x1bf   :  { %3653 = vmatprep.subr.bf16.mxu0 %v7566_v31  ;;  %4022 = vmatprep.subr.bf16.mxu1 %v7569_v32  ;;  %v7656_v31 = vld [vmem:[#allocation5 + $0xa44] ss:$16 sps:$4 sm:$0xff]   ;;  %v7659_v32 = vld [vmem:[#allocation5 + $0xa4c] ss:$16 sps:$4 sm:$0xff]  }
 0x1c2   :  { %3654 = vmatpush1.bf16.msra.mxu0 %v7564_v33  ;;  %4023 = vmatpush1.bf16.msra.mxu1 %v7567_v34  ;;  %v7654_v33 = vld [vmem:[#allocation5 + $0xa40] ss:$16 sps:$4 sm:$0xff]   ;;  %v7657_v34 = vld [vmem:[#allocation5 + $0xa48] ss:$16 sps:$4 sm:$0xff]  }
 0x1c3   :  { %3655 = vmatprep.subr.bf16.mxu0 %v7572_v35  ;;  %4024 = vmatprep.subr.bf16.mxu1 %v7575_v36  ;;  %v7662_v35 = vld [vmem:[#allocation5 + $0xa64] ss:$16 sps:$4 sm:$0xff]   ;;  %v7665_v36 = vld [vmem:[#allocation5 + $0xa6c] ss:$16 sps:$4 sm:$0xff]  }
 0x1c6   :  { %3656 = vmatpush1.bf16.msra.mxu0 %v7570_v37  ;;  %4025 = vmatpush1.bf16.msra.mxu1 %v7573_v38  ;;  %v7660_v37 = vld [vmem:[#allocation5 + $0xa60] ss:$16 sps:$4 sm:$0xff]   ;;  %v7663_v38 = vld [vmem:[#allocation5 + $0xa68] ss:$16 sps:$4 sm:$0xff]  }
 0x1c7   :  { %3657 = vmatprep.subr.bf16.mxu0 %v7578_v39  ;;  %4026 = vmatprep.subr.bf16.mxu1 %v7581_v40  ;;  %v7668_v39 = vld [vmem:[#allocation5 + $0xa84] ss:$16 sps:$4 sm:$0xff]   ;;  %v7671_v40 = vld [vmem:[#allocation5 + $0xa8c] ss:$16 sps:$4 sm:$0xff]  }
 0x1ca   :  { %3658 = vmatpush1.bf16.msra.mxu0 %v7576_v41  ;;  %4027 = vmatpush1.bf16.msra.mxu1 %v7579_v42  ;;  %v7666_v41 = vld [vmem:[#allocation5 + $0xa80] ss:$16 sps:$4 sm:$0xff]   ;;  %v7669_v42 = vld [vmem:[#allocation5 + $0xa88] ss:$16 sps:$4 sm:$0xff]  }
 0x1cb   :  { %3659 = vmatprep.subr.bf16.mxu0 %v7584_v43  ;;  %4028 = vmatprep.subr.bf16.mxu1 %v7587_v44  ;;  %v7674_v43 = vld [vmem:[#allocation5 + $0xaa4] ss:$16 sps:$4 sm:$0xff]   ;;  %v7677_v44 = vld [vmem:[#allocation5 + $0xaac] ss:$16 sps:$4 sm:$0xff]  }
 0x1ce   :  { %3660 = vmatpush1.bf16.msra.mxu0 %v7582_v45  ;;  %4029 = vmatpush1.bf16.msra.mxu1 %v7585_v46  ;;  %v7672_v45 = vld [vmem:[#allocation5 + $0xaa0] ss:$16 sps:$4 sm:$0xff]   ;;  %v7675_v46 = vld [vmem:[#allocation5 + $0xaa8] ss:$16 sps:$4 sm:$0xff]  }
 0x1cf   :  { %3661 = vmatprep.subr.bf16.mxu0 %v7590_v47  ;;  %4030 = vmatprep.subr.bf16.mxu1 %v7593_v48  ;;  %v7680_v47 = vld [vmem:[#allocation5 + $0xac4] ss:$16 sps:$4 sm:$0xff]   ;;  %v7683_v48 = vld [vmem:[#allocation5 + $0xacc] ss:$16 sps:$4 sm:$0xff]  }
 0x1d2   :  { %3662 = vmatpush1.bf16.msra.mxu0 %v7588_v49  ;;  %4031 = vmatpush1.bf16.msra.mxu1 %v7591_v50  ;;  %v7678_v49 = vld [vmem:[#allocation5 + $0xac0] ss:$16 sps:$4 sm:$0xff]   ;;  %v7681_v50 = vld [vmem:[#allocation5 + $0xac8] ss:$16 sps:$4 sm:$0xff]  }
 0x1d3   :  { %3663 = vmatprep.subr.bf16.mxu0 %v7596_v51  ;;  %4032 = vmatprep.subr.bf16.mxu1 %v7599_v52  ;;  %v7686_v51 = vld [vmem:[#allocation5 + $0xae4] ss:$16 sps:$4 sm:$0xff]   ;;  %v7689_v52 = vld [vmem:[#allocation5 + $0xaec] ss:$16 sps:$4 sm:$0xff]  }
 0x1d6   :  { %3664 = vmatpush1.bf16.msra.mxu0 %v7594_v53  ;;  %4033 = vmatpush1.bf16.msra.mxu1 %v7597_v54  ;;  %v7684_v53 = vld [vmem:[#allocation5 + $0xae0] ss:$16 sps:$4 sm:$0xff]   ;;  %v7687_v54 = vld [vmem:[#allocation5 + $0xae8] ss:$16 sps:$4 sm:$0xff]  }
 0x1d7   :  { %3665 = vmatprep.subr.bf16.mxu0 %v7602_v55  ;;  %4034 = vmatprep.subr.bf16.mxu1 %v7605_v56  ;;  %v7692_v55 = vld [vmem:[#allocation5 + $0xb04] ss:$16 sps:$4 sm:$0xff]   ;;  %v7695_v56 = vld [vmem:[#allocation5 + $0xb0c] ss:$16 sps:$4 sm:$0xff]  }
 0x1da   :  { %3666 = vmatpush1.bf16.msra.mxu0 %v7600_v57  ;;  %4035 = vmatpush1.bf16.msra.mxu1 %v7603_v58  ;;  %v7690_v57 = vld [vmem:[#allocation5 + $0xb00] ss:$16 sps:$4 sm:$0xff]   ;;  %v7693_v58 = vld [vmem:[#allocation5 + $0xb08] ss:$16 sps:$4 sm:$0xff]  }
 0x1db   :  { %3667 = vmatprep.subr.bf16.mxu0 %v7608_v59  ;;  %4036 = vmatprep.subr.bf16.mxu1 %v7611_v60  ;;  %v7698_v59 = vld [vmem:[#allocation5 + $0xb24] ss:$16 sps:$4 sm:$0xff]   ;;  %v7701_v60 = vld [vmem:[#allocation5 + $0xb2c] ss:$16 sps:$4 sm:$0xff]  }
 0x1de   :  { %3668 = vmatpush1.bf16.msra.mxu0 %v7606_v61  ;;  %4037 = vmatpush1.bf16.msra.mxu1 %v7609_v62  ;;  %v7696_v61 = vld [vmem:[#allocation5 + $0xb20] ss:$16 sps:$4 sm:$0xff]   ;;  %v7699_v62 = vld [vmem:[#allocation5 + $0xb28] ss:$16 sps:$4 sm:$0xff]  }
 0x1df   :  { %3669 = vmatprep.subr.bf16.mxu0 %v7614_v63  ;;  %4038 = vmatprep.subr.bf16.mxu1 %v7617_v0  ;;  %v7704_v63 = vld [vmem:[#allocation5 + $0xb44] ss:$16 sps:$4 sm:$0xff]   ;;  %v7707_v0 = vld [vmem:[#allocation5 + $0xb4c] ss:$16 sps:$4 sm:$0xff]  }
 0x1e2   :  { %3670 = vmatpush1.bf16.msra.mxu0 %v7612_v1  ;;  %4039 = vmatpush1.bf16.msra.mxu1 %v7615_v2  ;;  %v7702_v1 = vld [vmem:[#allocation5 + $0xb40] ss:$16 sps:$4 sm:$0xff]   ;;  %v7705_v2 = vld [vmem:[#allocation5 + $0xb48] ss:$16 sps:$4 sm:$0xff]  }
 0x1e3   :  { %3671 = vmatprep.subr.bf16.mxu0 %v7620_v3  ;;  %4040 = vmatprep.subr.bf16.mxu1 %v7623_v4  ;;  %v7710_v3 = vld [vmem:[#allocation5 + $0xb64] ss:$16 sps:$4 sm:$0xff]   ;;  %v7713_v4 = vld [vmem:[#allocation5 + $0xb6c] ss:$16 sps:$4 sm:$0xff]  }
 0x1e6   :  { %3672 = vmatpush1.bf16.msra.mxu0 %v7618_v5  ;;  %4041 = vmatpush1.bf16.msra.mxu1 %v7621_v6  ;;  %v7708_v5 = vld [vmem:[#allocation5 + $0xb60] ss:$16 sps:$4 sm:$0xff]   ;;  %v7711_v6 = vld [vmem:[#allocation5 + $0xb68] ss:$16 sps:$4 sm:$0xff]  }
 0x1e7   :  { %3673 = vmatprep.subr.bf16.mxu0 %v7626_v7  ;;  %4042 = vmatprep.subr.bf16.mxu1 %v7629_v8  ;;  %v7716_v7 = vld [vmem:[#allocation5 + $0xb84] ss:$16 sps:$4 sm:$0xff]   ;;  %v7719_v8 = vld [vmem:[#allocation5 + $0xb8c] ss:$16 sps:$4 sm:$0xff]  }
 0x1ea   :  { %3674 = vmatpush1.bf16.msra.mxu0 %v7624_v9  ;;  %4043 = vmatpush1.bf16.msra.mxu1 %v7627_v10  ;;  %v7714_v9 = vld [vmem:[#allocation5 + $0xb80] ss:$16 sps:$4 sm:$0xff]   ;;  %v7717_v10 = vld [vmem:[#allocation5 + $0xb88] ss:$16 sps:$4 sm:$0xff]  }
 0x1eb   :  { %3675 = vmatprep.subr.bf16.mxu0 %v7632_v11  ;;  %4044 = vmatprep.subr.bf16.mxu1 %v7635_v12  ;;  %v7722_v11 = vld [vmem:[#allocation5 + $0xba4] ss:$16 sps:$4 sm:$0xff]   ;;  %v7725_v12 = vld [vmem:[#allocation5 + $0xbac] ss:$16 sps:$4 sm:$0xff]  }
 0x1ee   :  { %3676 = vmatpush1.bf16.msra.mxu0 %v7630_v13  ;;  %4045 = vmatpush1.bf16.msra.mxu1 %v7633_v14  ;;  %v7720_v13 = vld [vmem:[#allocation5 + $0xba0] ss:$16 sps:$4 sm:$0xff]   ;;  %v7723_v14 = vld [vmem:[#allocation5 + $0xba8] ss:$16 sps:$4 sm:$0xff]  }
 0x1ef   :  { %3677 = vmatprep.subr.bf16.mxu0 %v7638_v15  ;;  %4046 = vmatprep.subr.bf16.mxu1 %v7641_v16  ;;  %v7728_v15 = vld [vmem:[#allocation5 + $0xbc4] ss:$16 sps:$4 sm:$0xff]   ;;  %v7731_v16 = vld [vmem:[#allocation5 + $0xbcc] ss:$16 sps:$4 sm:$0xff]  }
 0x1f2   :  { %3678 = vmatpush1.bf16.msra.mxu0 %v7636_v17  ;;  %4047 = vmatpush1.bf16.msra.mxu1 %v7639_v18  ;;  %v7726_v17 = vld [vmem:[#allocation5 + $0xbc0] ss:$16 sps:$4 sm:$0xff]   ;;  %v7729_v18 = vld [vmem:[#allocation5 + $0xbc8] ss:$16 sps:$4 sm:$0xff]  }
 0x1f3   :  { %3688 = vmatprep.subr.bf16.mxu0 %v7644_v19  ;;  %4057 = vmatprep.subr.bf16.mxu1 %v7647_v21  ;;  %v7734_v19 = vld [vmem:[#allocation5 + $0xbe4] ss:$16 sps:$4 sm:$0xff]   ;;  %v7732_v21 = vld [vmem:[#allocation5 + $0xbe0] ss:$16 sps:$4 sm:$0xff]  }
 0x1f5   :  { %3680 = vmatmul.mubr.bf16.vlgmr.msra.gmra.mrb[0].mxu0 %v188_v23  ;;  %4049 = vmatmul.mubr.bf16.vlgmr.msra.gmra.mrb[0].mxu1 %v188_v23  ;;  %v7740_v23 = vld [vmem:[#allocation5 + $0xc04] ss:$16 sps:$4 sm:$0xff]  }
 0x1f6   :  { %3689 = vmatpush1.bf16.msra.mxu0 %v7642_v24  ;;  %4058 = vmatpush1.bf16.msra.mxu1 %v7645_v25  ;;  %v173_v24 = vld [vmem:[#allocation3 + $0x50] sm:$0xff] }
 0x1f7   :  { %3690 = vmatprep.subr.bf16.mxu0 %v7650_v26  ;;  %4059 = vmatprep.subr.bf16.mxu1 %v7653_v27  ;;  %v7743_v25 = vld [vmem:[#allocation5 + $0xc0c] ss:$16 sps:$4 sm:$0xff]   ;;  %v176_v26 = vld [vmem:[#allocation3 + $0x68] sm:$0xff]  ;;  %v190_v27 = vpack.c.bf16 %v173_v24, %v173_v24 }
 0x1f8   :  { %3720 = vmatprep.mubr.bf16.mxu0 %v191_v28  ;;  %4089 = vmatprep.mubr.bf16.mxu1 %v191_v28  ;;  %v7738_v28 = vld [vmem:[#allocation5 + $0xc00] ss:$16 sps:$4 sm:$0xff]   ;;  %v7833_v24 = vld [vmem:[#allocation5 + $0xdec] ss:$16 sps:$4 sm:$0xff]  }
 0x1fa   :  { %3691 = vmatpush1.bf16.msra.mxu0 %v7648_v29  ;;  %4060 = vmatpush1.bf16.msra.mxu1 %v7651_v30  ;;  %v7741_v29 = vld [vmem:[#allocation5 + $0xc08] ss:$16 sps:$4 sm:$0xff]   ;;  %v7746_v30 = vld [vmem:[#allocation5 + $0xc24] ss:$16 sps:$4 sm:$0xff]  }
 0x1fb   :  { %3692 = vmatprep.subr.bf16.mxu0 %v7656_v31  ;;  %4061 = vmatprep.subr.bf16.mxu1 %v7659_v32  ;;  %v7749_v31 = vld [vmem:[#allocation5 + $0xc2c] ss:$16 sps:$4 sm:$0xff]   ;;  %v193_v32 = vpack.c.bf16 %v176_v26, %v176_v26  ;;  %v7831_v26 = vld [vmem:[#allocation5 + $0xde8] ss:$16 sps:$4 sm:$0xff]  }
 0x1fe   :  { %3693 = vmatpush1.bf16.msra.mxu0 %v7654_v33  ;;  %4062 = vmatpush1.bf16.msra.mxu1 %v7657_v34  ;;  %v7744_v33 = vld [vmem:[#allocation5 + $0xc20] ss:$16 sps:$4 sm:$0xff]   ;;  %v7747_v34 = vld [vmem:[#allocation5 + $0xc28] ss:$16 sps:$4 sm:$0xff]  }
 0x1ff   :  { %3694 = vmatprep.subr.bf16.mxu0 %v7662_v35  ;;  %4063 = vmatprep.subr.bf16.mxu1 %v7665_v36  ;;  %v7752_v35 = vld [vmem:[#allocation5 + $0xc44] ss:$16 sps:$4 sm:$0xff]   ;;  %v7755_v36 = vld [vmem:[#allocation5 + $0xc4c] ss:$16 sps:$4 sm:$0xff]  }
 0x202   :  { %3695 = vmatpush1.bf16.msra.mxu0 %v7660_v37  ;;  %4064 = vmatpush1.bf16.msra.mxu1 %v7663_v38  ;;  %v7750_v37 = vld [vmem:[#allocation5 + $0xc40] ss:$16 sps:$4 sm:$0xff]   ;;  %v7753_v38 = vld [vmem:[#allocation5 + $0xc48] ss:$16 sps:$4 sm:$0xff]  }
 0x203   :  { %3696 = vmatprep.subr.bf16.mxu0 %v7668_v39  ;;  %4065 = vmatprep.subr.bf16.mxu1 %v7671_v40  ;;  %v7758_v39 = vld [vmem:[#allocation5 + $0xc64] ss:$16 sps:$4 sm:$0xff]   ;;  %v7761_v40 = vld [vmem:[#allocation5 + $0xc6c] ss:$16 sps:$4 sm:$0xff]  }
 0x206   :  { %3697 = vmatpush1.bf16.msra.mxu0 %v7666_v41  ;;  %4066 = vmatpush1.bf16.msra.mxu1 %v7669_v42  ;;  %v7756_v41 = vld [vmem:[#allocation5 + $0xc60] ss:$16 sps:$4 sm:$0xff]   ;;  %v7759_v42 = vld [vmem:[#allocation5 + $0xc68] ss:$16 sps:$4 sm:$0xff]  }
 0x207   :  { %3698 = vmatprep.subr.bf16.mxu0 %v7674_v43  ;;  %4067 = vmatprep.subr.bf16.mxu1 %v7677_v44  ;;  %v7764_v43 = vld [vmem:[#allocation5 + $0xc84] ss:$16 sps:$4 sm:$0xff]   ;;  %v7767_v44 = vld [vmem:[#allocation5 + $0xc8c] ss:$16 sps:$4 sm:$0xff]  }
 0x20a   :  { %3699 = vmatpush1.bf16.msra.mxu0 %v7672_v45  ;;  %4068 = vmatpush1.bf16.msra.mxu1 %v7675_v46  ;;  %v7762_v45 = vld [vmem:[#allocation5 + $0xc80] ss:$16 sps:$4 sm:$0xff]   ;;  %v7765_v46 = vld [vmem:[#allocation5 + $0xc88] ss:$16 sps:$4 sm:$0xff]  }
 0x20b   :  { %3700 = vmatprep.subr.bf16.mxu0 %v7680_v47  ;;  %4069 = vmatprep.subr.bf16.mxu1 %v7683_v48  ;;  %v7770_v47 = vld [vmem:[#allocation5 + $0xca4] ss:$16 sps:$4 sm:$0xff]   ;;  %v7773_v48 = vld [vmem:[#allocation5 + $0xcac] ss:$16 sps:$4 sm:$0xff]  }
 0x20e   :  { %3701 = vmatpush1.bf16.msra.mxu0 %v7678_v49  ;;  %4070 = vmatpush1.bf16.msra.mxu1 %v7681_v50  ;;  %v7768_v49 = vld [vmem:[#allocation5 + $0xca0] ss:$16 sps:$4 sm:$0xff]   ;;  %v7771_v50 = vld [vmem:[#allocation5 + $0xca8] ss:$16 sps:$4 sm:$0xff]  }
 0x20f   :  { %3702 = vmatprep.subr.bf16.mxu0 %v7686_v51  ;;  %4071 = vmatprep.subr.bf16.mxu1 %v7689_v52  ;;  %v7776_v51 = vld [vmem:[#allocation5 + $0xcc4] ss:$16 sps:$4 sm:$0xff]   ;;  %v7779_v52 = vld [vmem:[#allocation5 + $0xccc] ss:$16 sps:$4 sm:$0xff]  }
 0x212   :  { %3703 = vmatpush1.bf16.msra.mxu0 %v7684_v53  ;;  %4072 = vmatpush1.bf16.msra.mxu1 %v7687_v54  ;;  %v7774_v53 = vld [vmem:[#allocation5 + $0xcc0] ss:$16 sps:$4 sm:$0xff]   ;;  %v7777_v54 = vld [vmem:[#allocation5 + $0xcc8] ss:$16 sps:$4 sm:$0xff]  }
 0x213   :  { %3704 = vmatprep.subr.bf16.mxu0 %v7692_v55  ;;  %4073 = vmatprep.subr.bf16.mxu1 %v7695_v56  ;;  %v7782_v55 = vld [vmem:[#allocation5 + $0xce4] ss:$16 sps:$4 sm:$0xff]   ;;  %v7785_v56 = vld [vmem:[#allocation5 + $0xcec] ss:$16 sps:$4 sm:$0xff]  }
 0x216   :  { %3705 = vmatpush1.bf16.msra.mxu0 %v7690_v57  ;;  %4074 = vmatpush1.bf16.msra.mxu1 %v7693_v58  ;;  %v7780_v57 = vld [vmem:[#allocation5 + $0xce0] ss:$16 sps:$4 sm:$0xff]   ;;  %v7783_v58 = vld [vmem:[#allocation5 + $0xce8] ss:$16 sps:$4 sm:$0xff]  }
 0x217   :  { %3706 = vmatprep.subr.bf16.mxu0 %v7698_v59  ;;  %4075 = vmatprep.subr.bf16.mxu1 %v7701_v60  ;;  %v7788_v59 = vld [vmem:[#allocation5 + $0xd04] ss:$16 sps:$4 sm:$0xff]   ;;  %v7791_v60 = vld [vmem:[#allocation5 + $0xd0c] ss:$16 sps:$4 sm:$0xff]  }
 0x21a   :  { %3707 = vmatpush1.bf16.msra.mxu0 %v7696_v61  ;;  %4076 = vmatpush1.bf16.msra.mxu1 %v7699_v62  ;;  %v7786_v61 = vld [vmem:[#allocation5 + $0xd00] ss:$16 sps:$4 sm:$0xff]   ;;  %v7789_v62 = vld [vmem:[#allocation5 + $0xd08] ss:$16 sps:$4 sm:$0xff]  }
 0x21b   :  { %3708 = vmatprep.subr.bf16.mxu0 %v7704_v63  ;;  %4077 = vmatprep.subr.bf16.mxu1 %v7707_v0  ;;  %v7794_v63 = vld [vmem:[#allocation5 + $0xd24] ss:$16 sps:$4 sm:$0xff]   ;;  %v7797_v0 = vld [vmem:[#allocation5 + $0xd2c] ss:$16 sps:$4 sm:$0xff]  }
 0x21e   :  { %3709 = vmatpush1.bf16.msra.mxu0 %v7702_v1  ;;  %4078 = vmatpush1.bf16.msra.mxu1 %v7705_v2  ;;  %v7792_v1 = vld [vmem:[#allocation5 + $0xd20] ss:$16 sps:$4 sm:$0xff]   ;;  %v7795_v2 = vld [vmem:[#allocation5 + $0xd28] ss:$16 sps:$4 sm:$0xff]  }
 0x21f   :  { %3710 = vmatprep.subr.bf16.mxu0 %v7710_v3  ;;  %4079 = vmatprep.subr.bf16.mxu1 %v7713_v4  ;;  %v7800_v3 = vld [vmem:[#allocation5 + $0xd44] ss:$16 sps:$4 sm:$0xff]   ;;  %v7803_v4 = vld [vmem:[#allocation5 + $0xd4c] ss:$16 sps:$4 sm:$0xff]  }
 0x222   :  { %3711 = vmatpush1.bf16.msra.mxu0 %v7708_v5  ;;  %4080 = vmatpush1.bf16.msra.mxu1 %v7711_v6  ;;  %v7798_v5 = vld [vmem:[#allocation5 + $0xd40] ss:$16 sps:$4 sm:$0xff]   ;;  %v7801_v6 = vld [vmem:[#allocation5 + $0xd48] ss:$16 sps:$4 sm:$0xff]  }
 0x223   :  { %3712 = vmatprep.subr.bf16.mxu0 %v7716_v7  ;;  %4081 = vmatprep.subr.bf16.mxu1 %v7719_v8  ;;  %v7806_v7 = vld [vmem:[#allocation5 + $0xd64] ss:$16 sps:$4 sm:$0xff]   ;;  %v7809_v8 = vld [vmem:[#allocation5 + $0xd6c] ss:$16 sps:$4 sm:$0xff]  }
 0x226   :  { %3713 = vmatpush1.bf16.msra.mxu0 %v7714_v9  ;;  %4082 = vmatpush1.bf16.msra.mxu1 %v7717_v10  ;;  %v7804_v9 = vld [vmem:[#allocation5 + $0xd60] ss:$16 sps:$4 sm:$0xff]   ;;  %v7807_v10 = vld [vmem:[#allocation5 + $0xd68] ss:$16 sps:$4 sm:$0xff]  }
 0x227   :  { %3714 = vmatprep.subr.bf16.mxu0 %v7722_v11  ;;  %4083 = vmatprep.subr.bf16.mxu1 %v7725_v12  ;;  %v7812_v11 = vld [vmem:[#allocation5 + $0xd84] ss:$16 sps:$4 sm:$0xff]   ;;  %v7815_v12 = vld [vmem:[#allocation5 + $0xd8c] ss:$16 sps:$4 sm:$0xff]  }
 0x22a   :  { %3715 = vmatpush1.bf16.msra.mxu0 %v7720_v13  ;;  %4084 = vmatpush1.bf16.msra.mxu1 %v7723_v14  ;;  %v7810_v13 = vld [vmem:[#allocation5 + $0xd80] ss:$16 sps:$4 sm:$0xff]   ;;  %v7813_v14 = vld [vmem:[#allocation5 + $0xd88] ss:$16 sps:$4 sm:$0xff]  }
 0x22b   :  { %3716 = vmatprep.subr.bf16.mxu0 %v7728_v15  ;;  %4085 = vmatprep.subr.bf16.mxu1 %v7731_v16  ;;  %v7818_v15 = vld [vmem:[#allocation5 + $0xda4] ss:$16 sps:$4 sm:$0xff]   ;;  %v7821_v16 = vld [vmem:[#allocation5 + $0xdac] ss:$16 sps:$4 sm:$0xff]  }
 0x22e   :  { %3717 = vmatpush1.bf16.msra.mxu0 %v7726_v17  ;;  %4086 = vmatpush1.bf16.msra.mxu1 %v7729_v18  ;;  %v7816_v17 = vld [vmem:[#allocation5 + $0xda0] ss:$16 sps:$4 sm:$0xff]   ;;  %v7819_v18 = vld [vmem:[#allocation5 + $0xda8] ss:$16 sps:$4 sm:$0xff]  }
 0x22f   :  { %3718 = vmatprep.subr.bf16.mxu0 %v7734_v19  ;;  %4087 = vmatprep.subr.bf16.mxu1 %v7737_v20  ;;  %v7824_v19 = vld [vmem:[#allocation5 + $0xdc4] ss:$16 sps:$4 sm:$0xff]   ;;  %v7827_v20 = vld [vmem:[#allocation5 + $0xdcc] ss:$16 sps:$4 sm:$0xff]  }
 0x232   :  { %3719 = vmatpush1.bf16.msra.mxu0 %v7732_v21  ;;  %4088 = vmatpush1.bf16.msra.mxu1 %v7735_v22  ;;  %v7822_v21 = vld [vmem:[#allocation5 + $0xdc0] ss:$16 sps:$4 sm:$0xff]   ;;  %v7825_v22 = vld [vmem:[#allocation5 + $0xdc8] ss:$16 sps:$4 sm:$0xff]  }
 0x233   :  { %3729 = vmatprep.subr.bf16.mxu0 %v7740_v23  ;;  %4098 = vmatprep.subr.bf16.mxu1 %v7743_v25  ;;  %v7830_v23 = vld [vmem:[#allocation5 + $0xde4] ss:$16 sps:$4 sm:$0xff]   ;;  %v7828_v25 = vld [vmem:[#allocation5 + $0xde0] ss:$16 sps:$4 sm:$0xff]  }
 0x235   :  { %3721 = vmatmul.mubr.bf16.vlgmr.msra.gmra.mrb[0].mxu0 %v190_v27  ;;  %4090 = vmatmul.mubr.bf16.vlgmr.msra.gmra.mrb[0].mxu1 %v190_v27  ;;  %v7836_v27 = vld [vmem:[#allocation5 + $0xe04] ss:$16 sps:$4 sm:$0xff]  }
 0x236   :  { %3730 = vmatpush1.bf16.msra.mxu0 %v7738_v28  ;;  %4099 = vmatpush1.bf16.msra.mxu1 %v7741_v29  ;;  %v175_v28 = vld [vmem:[#allocation3 + $0x60] sm:$0xff] }
 0x237   :  { %3731 = vmatprep.subr.bf16.mxu0 %v7746_v30  ;;  %4100 = vmatprep.subr.bf16.mxu1 %v7749_v31  ;;  %v7839_v29 = vld [vmem:[#allocation5 + $0xe0c] ss:$16 sps:$4 sm:$0xff]   ;;  %v178_v30 = vld [vmem:[#allocation3 + $0x78] sm:$0xff]  ;;  %v192_v31 = vpack.c.bf16 %v175_v28, %v175_v28 }
 0x238   :  { %3761 = vmatprep.mubr.bf16.mxu0 %v193_v32  ;;  %4130 = vmatprep.mubr.bf16.mxu1 %v193_v32  ;;  %v7834_v32 = vld [vmem:[#allocation5 + $0xe00] ss:$16 sps:$4 sm:$0xff]   ;;  %v7929_v28 = vld [vmem:[#allocation5 + $0xfec] ss:$16 sps:$4 sm:$0xff]  }
 0x23a   :  { %3732 = vmatpush1.bf16.msra.mxu0 %v7744_v33  ;;  %4101 = vmatpush1.bf16.msra.mxu1 %v7747_v34  ;;  %v7837_v33 = vld [vmem:[#allocation5 + $0xe08] ss:$16 sps:$4 sm:$0xff]   ;;  %v7842_v34 = vld [vmem:[#allocation5 + $0xe24] ss:$16 sps:$4 sm:$0xff]  }
 0x23b   :  { %3733 = vmatprep.subr.bf16.mxu0 %v7752_v35  ;;  %4102 = vmatprep.subr.bf16.mxu1 %v7755_v36  ;;  %v7845_v35 = vld [vmem:[#allocation5 + $0xe2c] ss:$16 sps:$4 sm:$0xff]   ;;  %v195_v36 = vpack.c.bf16 %v178_v30, %v178_v30  ;;  %v7927_v30 = vld [vmem:[#allocation5 + $0xfe8] ss:$16 sps:$4 sm:$0xff]  }
 0x23e   :  { %3734 = vmatpush1.bf16.msra.mxu0 %v7750_v37  ;;  %4103 = vmatpush1.bf16.msra.mxu1 %v7753_v38  ;;  %v7840_v37 = vld [vmem:[#allocation5 + $0xe20] ss:$16 sps:$4 sm:$0xff]   ;;  %v7843_v38 = vld [vmem:[#allocation5 + $0xe28] ss:$16 sps:$4 sm:$0xff]  }
 0x23f   :  { %3735 = vmatprep.subr.bf16.mxu0 %v7758_v39  ;;  %4104 = vmatprep.subr.bf16.mxu1 %v7761_v40  ;;  %v7848_v39 = vld [vmem:[#allocation5 + $0xe44] ss:$16 sps:$4 sm:$0xff]   ;;  %v7851_v40 = vld [vmem:[#allocation5 + $0xe4c] ss:$16 sps:$4 sm:$0xff]  }
 0x242   :  { %3736 = vmatpush1.bf16.msra.mxu0 %v7756_v41  ;;  %4105 = vmatpush1.bf16.msra.mxu1 %v7759_v42  ;;  %v7846_v41 = vld [vmem:[#allocation5 + $0xe40] ss:$16 sps:$4 sm:$0xff]   ;;  %v7849_v42 = vld [vmem:[#allocation5 + $0xe48] ss:$16 sps:$4 sm:$0xff]  }
 0x243   :  { %3737 = vmatprep.subr.bf16.mxu0 %v7764_v43  ;;  %4106 = vmatprep.subr.bf16.mxu1 %v7767_v44  ;;  %v7854_v43 = vld [vmem:[#allocation5 + $0xe64] ss:$16 sps:$4 sm:$0xff]   ;;  %v7857_v44 = vld [vmem:[#allocation5 + $0xe6c] ss:$16 sps:$4 sm:$0xff]  }
 0x246   :  { %3738 = vmatpush1.bf16.msra.mxu0 %v7762_v45  ;;  %4107 = vmatpush1.bf16.msra.mxu1 %v7765_v46  ;;  %v7852_v45 = vld [vmem:[#allocation5 + $0xe60] ss:$16 sps:$4 sm:$0xff]   ;;  %v7855_v46 = vld [vmem:[#allocation5 + $0xe68] ss:$16 sps:$4 sm:$0xff]  }
 0x247   :  { %3739 = vmatprep.subr.bf16.mxu0 %v7770_v47  ;;  %4108 = vmatprep.subr.bf16.mxu1 %v7773_v48  ;;  %v7860_v47 = vld [vmem:[#allocation5 + $0xe84] ss:$16 sps:$4 sm:$0xff]   ;;  %v7863_v48 = vld [vmem:[#allocation5 + $0xe8c] ss:$16 sps:$4 sm:$0xff]  }
 0x24a   :  { %3740 = vmatpush1.bf16.msra.mxu0 %v7768_v49  ;;  %4109 = vmatpush1.bf16.msra.mxu1 %v7771_v50  ;;  %v7858_v49 = vld [vmem:[#allocation5 + $0xe80] ss:$16 sps:$4 sm:$0xff]   ;;  %v7861_v50 = vld [vmem:[#allocation5 + $0xe88] ss:$16 sps:$4 sm:$0xff]  }
 0x24b   :  { %3741 = vmatprep.subr.bf16.mxu0 %v7776_v51  ;;  %4110 = vmatprep.subr.bf16.mxu1 %v7779_v52  ;;  %v7866_v51 = vld [vmem:[#allocation5 + $0xea4] ss:$16 sps:$4 sm:$0xff]   ;;  %v7869_v52 = vld [vmem:[#allocation5 + $0xeac] ss:$16 sps:$4 sm:$0xff]  }
 0x24e   :  { %3742 = vmatpush1.bf16.msra.mxu0 %v7774_v53  ;;  %4111 = vmatpush1.bf16.msra.mxu1 %v7777_v54  ;;  %v7864_v53 = vld [vmem:[#allocation5 + $0xea0] ss:$16 sps:$4 sm:$0xff]   ;;  %v7867_v54 = vld [vmem:[#allocation5 + $0xea8] ss:$16 sps:$4 sm:$0xff]  }
 0x24f   :  { %3743 = vmatprep.subr.bf16.mxu0 %v7782_v55  ;;  %4112 = vmatprep.subr.bf16.mxu1 %v7785_v56  ;;  %v7872_v55 = vld [vmem:[#allocation5 + $0xec4] ss:$16 sps:$4 sm:$0xff]   ;;  %v7875_v56 = vld [vmem:[#allocation5 + $0xecc] ss:$16 sps:$4 sm:$0xff]  }
 0x252   :  { %3744 = vmatpush1.bf16.msra.mxu0 %v7780_v57  ;;  %4113 = vmatpush1.bf16.msra.mxu1 %v7783_v58  ;;  %v7870_v57 = vld [vmem:[#allocation5 + $0xec0] ss:$16 sps:$4 sm:$0xff]   ;;  %v7873_v58 = vld [vmem:[#allocation5 + $0xec8] ss:$16 sps:$4 sm:$0xff]  }
 0x253   :  { %3745 = vmatprep.subr.bf16.mxu0 %v7788_v59  ;;  %4114 = vmatprep.subr.bf16.mxu1 %v7791_v60  ;;  %v7878_v59 = vld [vmem:[#allocation5 + $0xee4] ss:$16 sps:$4 sm:$0xff]   ;;  %v7881_v60 = vld [vmem:[#allocation5 + $0xeec] ss:$16 sps:$4 sm:$0xff]  }
 0x256   :  { %3746 = vmatpush1.bf16.msra.mxu0 %v7786_v61  ;;  %4115 = vmatpush1.bf16.msra.mxu1 %v7789_v62  ;;  %v7876_v61 = vld [vmem:[#allocation5 + $0xee0] ss:$16 sps:$4 sm:$0xff]   ;;  %v7879_v62 = vld [vmem:[#allocation5 + $0xee8] ss:$16 sps:$4 sm:$0xff]  }
 0x257   :  { %3747 = vmatprep.subr.bf16.mxu0 %v7794_v63  ;;  %4116 = vmatprep.subr.bf16.mxu1 %v7797_v0  ;;  %v7884_v63 = vld [vmem:[#allocation5 + $0xf04] ss:$16 sps:$4 sm:$0xff]   ;;  %v7887_v0 = vld [vmem:[#allocation5 + $0xf0c] ss:$16 sps:$4 sm:$0xff]  }
 0x25a   :  { %3748 = vmatpush1.bf16.msra.mxu0 %v7792_v1  ;;  %4117 = vmatpush1.bf16.msra.mxu1 %v7795_v2  ;;  %v7882_v1 = vld [vmem:[#allocation5 + $0xf00] ss:$16 sps:$4 sm:$0xff]   ;;  %v7885_v2 = vld [vmem:[#allocation5 + $0xf08] ss:$16 sps:$4 sm:$0xff]  }
 0x25b   :  { %3749 = vmatprep.subr.bf16.mxu0 %v7800_v3  ;;  %4118 = vmatprep.subr.bf16.mxu1 %v7803_v4  ;;  %v7890_v3 = vld [vmem:[#allocation5 + $0xf24] ss:$16 sps:$4 sm:$0xff]   ;;  %v7893_v4 = vld [vmem:[#allocation5 + $0xf2c] ss:$16 sps:$4 sm:$0xff]  }
 0x25e   :  { %3750 = vmatpush1.bf16.msra.mxu0 %v7798_v5  ;;  %4119 = vmatpush1.bf16.msra.mxu1 %v7801_v6  ;;  %v7888_v5 = vld [vmem:[#allocation5 + $0xf20] ss:$16 sps:$4 sm:$0xff]   ;;  %v7891_v6 = vld [vmem:[#allocation5 + $0xf28] ss:$16 sps:$4 sm:$0xff]  }
 0x25f   :  { %3751 = vmatprep.subr.bf16.mxu0 %v7806_v7  ;;  %4120 = vmatprep.subr.bf16.mxu1 %v7809_v8  ;;  %v7896_v7 = vld [vmem:[#allocation5 + $0xf44] ss:$16 sps:$4 sm:$0xff]   ;;  %v7899_v8 = vld [vmem:[#allocation5 + $0xf4c] ss:$16 sps:$4 sm:$0xff]  }
 0x262   :  { %3752 = vmatpush1.bf16.msra.mxu0 %v7804_v9  ;;  %4121 = vmatpush1.bf16.msra.mxu1 %v7807_v10  ;;  %v7894_v9 = vld [vmem:[#allocation5 + $0xf40] ss:$16 sps:$4 sm:$0xff]   ;;  %v7897_v10 = vld [vmem:[#allocation5 + $0xf48] ss:$16 sps:$4 sm:$0xff]  }
 0x263   :  { %3753 = vmatprep.subr.bf16.mxu0 %v7812_v11  ;;  %4122 = vmatprep.subr.bf16.mxu1 %v7815_v12  ;;  %v7902_v11 = vld [vmem:[#allocation5 + $0xf64] ss:$16 sps:$4 sm:$0xff]   ;;  %v7905_v12 = vld [vmem:[#allocation5 + $0xf6c] ss:$16 sps:$4 sm:$0xff]  }
 0x266   :  { %3754 = vmatpush1.bf16.msra.mxu0 %v7810_v13  ;;  %4123 = vmatpush1.bf16.msra.mxu1 %v7813_v14  ;;  %v7900_v13 = vld [vmem:[#allocation5 + $0xf60] ss:$16 sps:$4 sm:$0xff]   ;;  %v7903_v14 = vld [vmem:[#allocation5 + $0xf68] ss:$16 sps:$4 sm:$0xff]  }
 0x267   :  { %3755 = vmatprep.subr.bf16.mxu0 %v7818_v15  ;;  %4124 = vmatprep.subr.bf16.mxu1 %v7821_v16  ;;  %v7908_v15 = vld [vmem:[#allocation5 + $0xf84] ss:$16 sps:$4 sm:$0xff]   ;;  %v7911_v16 = vld [vmem:[#allocation5 + $0xf8c] ss:$16 sps:$4 sm:$0xff]  }
 0x26a   :  { %3756 = vmatpush1.bf16.msra.mxu0 %v7816_v17  ;;  %4125 = vmatpush1.bf16.msra.mxu1 %v7819_v18  ;;  %v7906_v17 = vld [vmem:[#allocation5 + $0xf80] ss:$16 sps:$4 sm:$0xff]   ;;  %v7909_v18 = vld [vmem:[#allocation5 + $0xf88] ss:$16 sps:$4 sm:$0xff]  }
 0x26b   :  { %3757 = vmatprep.subr.bf16.mxu0 %v7824_v19  ;;  %4126 = vmatprep.subr.bf16.mxu1 %v7827_v20  ;;  %v7914_v19 = vld [vmem:[#allocation5 + $0xfa4] ss:$16 sps:$4 sm:$0xff]   ;;  %v7917_v20 = vld [vmem:[#allocation5 + $0xfac] ss:$16 sps:$4 sm:$0xff]  }
 0x26e   :  { %3758 = vmatpush1.bf16.msra.mxu0 %v7822_v21  ;;  %4127 = vmatpush1.bf16.msra.mxu1 %v7825_v22  ;;  %v7912_v21 = vld [vmem:[#allocation5 + $0xfa0] ss:$16 sps:$4 sm:$0xff]   ;;  %v7915_v22 = vld [vmem:[#allocation5 + $0xfa8] ss:$16 sps:$4 sm:$0xff]  }
 0x26f   :  { %3759 = vmatprep.subr.bf16.mxu0 %v7830_v23  ;;  %4128 = vmatprep.subr.bf16.mxu1 %v7833_v24  ;;  %v7920_v23 = vld [vmem:[#allocation5 + $0xfc4] ss:$16 sps:$4 sm:$0xff]   ;;  %v7923_v24 = vld [vmem:[#allocation5 + $0xfcc] ss:$16 sps:$4 sm:$0xff]  }
 0x272   :  { %3760 = vmatpush1.bf16.msra.mxu0 %v7828_v25  ;;  %4129 = vmatpush1.bf16.msra.mxu1 %v7831_v26  ;;  %v7918_v25 = vld [vmem:[#allocation5 + $0xfc0] ss:$16 sps:$4 sm:$0xff]   ;;  %v7921_v26 = vld [vmem:[#allocation5 + $0xfc8] ss:$16 sps:$4 sm:$0xff]  }
 0x273   :  { %3770 = vmatprep.subr.bf16.mxu0 %v7836_v27  ;;  %4139 = vmatprep.subr.bf16.mxu1 %v7839_v29  ;;  %v7926_v27 = vld [vmem:[#allocation5 + $0xfe4] ss:$16 sps:$4 sm:$0xff]   ;;  %v7924_v29 = vld [vmem:[#allocation5 + $0xfe0] ss:$16 sps:$4 sm:$0xff]  }
 0x275   :  { %3762 = vmatmul.mubr.bf16.vlgmr.msra.gmra.mrb[0].mxu0 %v192_v31  ;;  %4131 = vmatmul.mubr.bf16.vlgmr.msra.gmra.mrb[0].mxu1 %v192_v31  ;;  %v177_v31 = vld [vmem:[#allocation3 + $0x70] sm:$0xff] }
 0x276   :  { %3771 = vmatpush1.bf16.msra.mxu0 %v7834_v32  ;;  %4140 = vmatpush1.bf16.msra.mxu1 %v7837_v33  ;;  %v7932_v32 = vld [vmem:[#allocation5 + $0x1004] ss:$16 sps:$4 sm:$0xff]   ;;  %v7935_v33 = vld [vmem:[#allocation5 + $0x100c] ss:$16 sps:$4 sm:$0xff]  }
 0x277   :  { %3772 = vmatprep.subr.bf16.mxu0 %v7842_v34  ;;  %4141 = vmatprep.subr.bf16.mxu1 %v7845_v35  ;;  %v194_v34 = vpack.c.bf16 %v177_v31, %v177_v31  ;;  %v7930_v35 = vld [vmem:[#allocation5 + $0x1000] ss:$16 sps:$4 sm:$0xff]   ;;  %v8017_v31 = vld [vmem:[#allocation8 + $0xc8] ss:$16 sps:$4 sm:$0xff]  }
 0x278   :  { %3802 = vmatprep.mubr.bf16.mxu0 %v195_v36  ;;  %4171 = vmatprep.mubr.bf16.mxu1 %v195_v36  ;;  %v7933_v36 = vld [vmem:[#allocation5 + $0x1008] ss:$16 sps:$4 sm:$0xff]  }
 0x27a   :  { %3773 = vmatpush1.bf16.msra.mxu0 %v7840_v37  ;;  %4142 = vmatpush1.bf16.msra.mxu1 %v7843_v38  ;;  %v7938_v37 = vld [vmem:[#allocation5 + $0x1024] ss:$16 sps:$4 sm:$0xff]   ;;  %v7941_v38 = vld [vmem:[#allocation5 + $0x102c] ss:$16 sps:$4 sm:$0xff]  }
 0x27b   :  { %3774 = vmatprep.subr.bf16.mxu0 %v7848_v39  ;;  %4143 = vmatprep.subr.bf16.mxu1 %v7851_v40  ;;  %v7936_v39 = vld [vmem:[#allocation5 + $0x1020] ss:$16 sps:$4 sm:$0xff]   ;;  %v7939_v40 = vld [vmem:[#allocation5 + $0x1028] ss:$16 sps:$4 sm:$0xff]  }
 0x27e   :  { %3775 = vmatpush1.bf16.msra.mxu0 %v7846_v41  ;;  %4144 = vmatpush1.bf16.msra.mxu1 %v7849_v42  ;;  %v7944_v41 = vld [vmem:[#allocation5 + $0x1044] ss:$16 sps:$4 sm:$0xff]   ;;  %v7947_v42 = vld [vmem:[#allocation5 + $0x104c] ss:$16 sps:$4 sm:$0xff]  }
 0x27f   :  { %3776 = vmatprep.subr.bf16.mxu0 %v7854_v43  ;;  %4145 = vmatprep.subr.bf16.mxu1 %v7857_v44  ;;  %v8606_v43 = vmov 0   ;;  %v7942_v44 = vld [vmem:[#allocation5 + $0x1040] ss:$16 sps:$4 sm:$0xff]  }
 0x282   :  { %3777 = vmatpush1.bf16.msra.mxu0 %v7852_v45  ;;  %4146 = vmatpush1.bf16.msra.mxu1 %v7855_v46  ;;  %v7945_v45 = vld [vmem:[#allocation5 + $0x1048] ss:$16 sps:$4 sm:$0xff]   ;;  %v7950_v46 = vld [vmem:[#allocation5 + $0x1064] ss:$16 sps:$4 sm:$0xff]  }
 0x283   :  { %3778 = vmatprep.subr.bf16.mxu0 %v7860_v47  ;;  %4147 = vmatprep.subr.bf16.mxu1 %v7863_v48  ;;  %v7953_v47 = vld [vmem:[#allocation5 + $0x106c] ss:$16 sps:$4 sm:$0xff]   ;;  %v7948_v48 = vld [vmem:[#allocation5 + $0x1060] ss:$16 sps:$4 sm:$0xff]  }
 0x286   :  { %3779 = vmatpush1.bf16.msra.mxu0 %v7858_v49  ;;  %4148 = vmatpush1.bf16.msra.mxu1 %v7861_v50  ;;  %v7951_v49 = vld [vmem:[#allocation5 + $0x1068] ss:$16 sps:$4 sm:$0xff]   ;;  %v7956_v50 = vld [vmem:[#allocation5 + $0x1084] ss:$16 sps:$4 sm:$0xff]  }
 0x287   :  { %3780 = vmatprep.subr.bf16.mxu0 %v7866_v51  ;;  %4149 = vmatprep.subr.bf16.mxu1 %v7869_v52  ;;  %v7959_v51 = vld [vmem:[#allocation5 + $0x108c] ss:$16 sps:$4 sm:$0xff]   ;;  %v7954_v52 = vld [vmem:[#allocation5 + $0x1080] ss:$16 sps:$4 sm:$0xff]  }
 0x28a   :  { %3781 = vmatpush1.bf16.msra.mxu0 %v7864_v53  ;;  %4150 = vmatpush1.bf16.msra.mxu1 %v7867_v54  ;;  %v7957_v53 = vld [vmem:[#allocation5 + $0x1088] ss:$16 sps:$4 sm:$0xff]   ;;  %v7962_v54 = vld [vmem:[#allocation5 + $0x10a4] ss:$16 sps:$4 sm:$0xff]  }
 0x28b   :  { %3782 = vmatprep.subr.bf16.mxu0 %v7872_v55  ;;  %4151 = vmatprep.subr.bf16.mxu1 %v7875_v56  ;;  %v7965_v55 = vld [vmem:[#allocation5 + $0x10ac] ss:$16 sps:$4 sm:$0xff]   ;;  %v7960_v56 = vld [vmem:[#allocation5 + $0x10a0] ss:$16 sps:$4 sm:$0xff]  }
 0x28e   :  { %3783 = vmatpush1.bf16.msra.mxu0 %v7870_v57  ;;  %4152 = vmatpush1.bf16.msra.mxu1 %v7873_v58  ;;  %v7963_v57 = vld [vmem:[#allocation5 + $0x10a8] ss:$16 sps:$4 sm:$0xff]   ;;  %v7968_v58 = vld [vmem:[#allocation5 + $0x10c4] ss:$16 sps:$4 sm:$0xff]  }
 0x28f   :  { %3784 = vmatprep.subr.bf16.mxu0 %v7878_v59  ;;  %4153 = vmatprep.subr.bf16.mxu1 %v7881_v60  ;;  %v7971_v59 = vld [vmem:[#allocation5 + $0x10cc] ss:$16 sps:$4 sm:$0xff]   ;;  %v7966_v60 = vld [vmem:[#allocation5 + $0x10c0] ss:$16 sps:$4 sm:$0xff]  }
 0x292   :  { %3785 = vmatpush1.bf16.msra.mxu0 %v7876_v61  ;;  %4154 = vmatpush1.bf16.msra.mxu1 %v7879_v62  ;;  %v7969_v61 = vld [vmem:[#allocation5 + $0x10c8] ss:$16 sps:$4 sm:$0xff]   ;;  %v7974_v62 = vld [vmem:[#allocation5 + $0x10e4] ss:$16 sps:$4 sm:$0xff]  }
 0x293   :  { %3786 = vmatprep.subr.bf16.mxu0 %v7884_v63  ;;  %4155 = vmatprep.subr.bf16.mxu1 %v7887_v0  ;;  %v7977_v63 = vld [vmem:[#allocation5 + $0x10ec] ss:$16 sps:$4 sm:$0xff]   ;;  %v7972_v0 = vld [vmem:[#allocation5 + $0x10e0] ss:$16 sps:$4 sm:$0xff]  }
 0x296   :  { %3787 = vmatpush1.bf16.msra.mxu0 %v7882_v1  ;;  %4156 = vmatpush1.bf16.msra.mxu1 %v7885_v2  ;;  %v7975_v1 = vld [vmem:[#allocation5 + $0x10e8] ss:$16 sps:$4 sm:$0xff]  }
 0x297   :  { %3788 = vmatprep.subr.bf16.mxu0 %v7890_v3  ;;  %4157 = vmatprep.subr.bf16.mxu1 %v7893_v4  ;;  %v179_v2 = vld [vmem:[#allocation3 + $0x80] sm:$0xff]  ;;  %v7983_v4 = vld [vmem:[#allocation8 + $0xc] ss:$16 sps:$4 sm:$0xff]  }
 0x298   :  { %v7980_v3 = vld [vmem:[#allocation8 + $0x4] ss:$16 sps:$4 sm:$0xff]  }
 0x29a   :  { %3789 = vmatpush1.bf16.msra.mxu0 %v7888_v5  ;;  %4158 = vmatpush1.bf16.msra.mxu1 %v7891_v6  ;;  %v196_v5 = vpack.c.bf16 %v179_v2, %v179_v2  ;;  %v7978_v6 = vld [vmem:[#allocation8] ss:$16 sps:$4 sm:$0xff]  }
 0x29b   :  { %3790 = vmatprep.subr.bf16.mxu0 %v7896_v7  ;;  %4159 = vmatprep.subr.bf16.mxu1 %v7899_v8  ;;  %v7981_v7 = vld [vmem:[#allocation8 + $0x8] ss:$16 sps:$4 sm:$0xff]   ;;  %v7986_v8 = vld [vmem:[#allocation8 + $0x24] ss:$16 sps:$4 sm:$0xff]   ;;  %v8068_v2 = vld [vmem:[#allocation8 + $0x1e0] ss:$16 sps:$4 sm:$0xff]  }
 0x29e   :  { %3791 = vmatpush1.bf16.msra.mxu0 %v7894_v9  ;;  %4160 = vmatpush1.bf16.msra.mxu1 %v7897_v10  ;;  %v7989_v9 = vld [vmem:[#allocation8 + $0x2c] ss:$16 sps:$4 sm:$0xff]   ;;  %v7984_v10 = vld [vmem:[#allocation8 + $0x20] ss:$16 sps:$4 sm:$0xff]  }
 0x29f   :  { %3792 = vmatprep.subr.bf16.mxu0 %v7902_v11  ;;  %4161 = vmatprep.subr.bf16.mxu1 %v7905_v12  ;;  %v7987_v11 = vld [vmem:[#allocation8 + $0x28] ss:$16 sps:$4 sm:$0xff]   ;;  %v7992_v12 = vld [vmem:[#allocation8 + $0x44] ss:$16 sps:$4 sm:$0xff]  }
 0x2a2   :  { %3793 = vmatpush1.bf16.msra.mxu0 %v7900_v13  ;;  %4162 = vmatpush1.bf16.msra.mxu1 %v7903_v14  ;;  %v7995_v13 = vld [vmem:[#allocation8 + $0x4c] ss:$16 sps:$4 sm:$0xff]   ;;  %v7990_v14 = vld [vmem:[#allocation8 + $0x40] ss:$16 sps:$4 sm:$0xff]  }
 0x2a3   :  { %3794 = vmatprep.subr.bf16.mxu0 %v7908_v15  ;;  %4163 = vmatprep.subr.bf16.mxu1 %v7911_v16  ;;  %v7993_v15 = vld [vmem:[#allocation8 + $0x48] ss:$16 sps:$4 sm:$0xff]   ;;  %v7998_v16 = vld [vmem:[#allocation8 + $0x64] ss:$16 sps:$4 sm:$0xff]  }
 0x2a6   :  { %3795 = vmatpush1.bf16.msra.mxu0 %v7906_v17  ;;  %4164 = vmatpush1.bf16.msra.mxu1 %v7909_v18  ;;  %v8001_v17 = vld [vmem:[#allocation8 + $0x6c] ss:$16 sps:$4 sm:$0xff]   ;;  %v7996_v18 = vld [vmem:[#allocation8 + $0x60] ss:$16 sps:$4 sm:$0xff]  }
 0x2a7   :  { %3796 = vmatprep.subr.bf16.mxu0 %v7914_v19  ;;  %4165 = vmatprep.subr.bf16.mxu1 %v7917_v20  ;;  %v7999_v19 = vld [vmem:[#allocation8 + $0x68] ss:$16 sps:$4 sm:$0xff]   ;;  %v8004_v20 = vld [vmem:[#allocation8 + $0x84] ss:$16 sps:$4 sm:$0xff]  }
 0x2aa   :  { %3797 = vmatpush1.bf16.msra.mxu0 %v7912_v21  ;;  %4166 = vmatpush1.bf16.msra.mxu1 %v7915_v22  ;;  %v8007_v21 = vld [vmem:[#allocation8 + $0x8c] ss:$16 sps:$4 sm:$0xff]   ;;  %v8002_v22 = vld [vmem:[#allocation8 + $0x80] ss:$16 sps:$4 sm:$0xff]  }
 0x2ab   :  { %3798 = vmatprep.subr.bf16.mxu0 %v7920_v23  ;;  %4167 = vmatprep.subr.bf16.mxu1 %v7923_v24  ;;  %v8005_v23 = vld [vmem:[#allocation8 + $0x88] ss:$16 sps:$4 sm:$0xff]   ;;  %v8010_v24 = vld [vmem:[#allocation8 + $0xa4] ss:$16 sps:$4 sm:$0xff]  }
 0x2ae   :  { %3799 = vmatpush1.bf16.msra.mxu0 %v7918_v25  ;;  %4168 = vmatpush1.bf16.msra.mxu1 %v7921_v26  ;;  %v8013_v25 = vld [vmem:[#allocation8 + $0xac] ss:$16 sps:$4 sm:$0xff]   ;;  %v8008_v26 = vld [vmem:[#allocation8 + $0xa0] ss:$16 sps:$4 sm:$0xff]  }
 0x2af   :  { %3800 = vmatprep.subr.bf16.mxu0 %v7926_v27  ;;  %4169 = vmatprep.subr.bf16.mxu1 %v7929_v28  ;;  %v8011_v27 = vld [vmem:[#allocation8 + $0xa8] ss:$16 sps:$4 sm:$0xff]   ;;  %v8016_v28 = vld [vmem:[#allocation8 + $0xc4] ss:$16 sps:$4 sm:$0xff]  }
 0x2b2   :  { %3801 = vmatpush1.bf16.msra.mxu0 %v7924_v29  ;;  %4170 = vmatpush1.bf16.msra.mxu1 %v7927_v30  ;;  %v8019_v29 = vld [vmem:[#allocation8 + $0xcc] ss:$16 sps:$4 sm:$0xff]   ;;  %v8014_v30 = vld [vmem:[#allocation8 + $0xc0] ss:$16 sps:$4 sm:$0xff]  }
 0x2b3   :  { %3811 = vmatprep.subr.bf16.mxu0 %v7932_v32  ;;  %4180 = vmatprep.subr.bf16.mxu1 %v7935_v33  ;;  %v8022_v32 = vld [vmem:[#allocation8 + $0xe4] ss:$16 sps:$4 sm:$0xff]   ;;  %v8025_v33 = vld [vmem:[#allocation8 + $0xec] ss:$16 sps:$4 sm:$0xff]  }
 0x2b5   :  { %3803 = vmatmul.mubr.bf16.vlgmr.msra.gmra.mrb[0].mxu0 %v194_v34  ;;  %4172 = vmatmul.mubr.bf16.vlgmr.msra.gmra.mrb[0].mxu1 %v194_v34  ;;  %v8020_v34 = vld [vmem:[#allocation8 + $0xe0] ss:$16 sps:$4 sm:$0xff]  }
 0x2b6   :  { %3812 = vmatpush1.bf16.msra.mxu0 %v7930_v35  ;;  %4181 = vmatpush1.bf16.msra.mxu1 %v7933_v36  ;;  %v8023_v35 = vld [vmem:[#allocation8 + $0xe8] ss:$16 sps:$4 sm:$0xff]   ;;  %v8028_v36 = vld [vmem:[#allocation8 + $0x104] ss:$16 sps:$4 sm:$0xff]  }
 0x2b7   :  { %3813 = vmatprep.subr.bf16.mxu0 %v7938_v37  ;;  %4182 = vmatprep.subr.bf16.mxu1 %v7941_v38  ;;  %v8031_v37 = vld [vmem:[#allocation8 + $0x10c] ss:$16 sps:$4 sm:$0xff]   ;;  %v8026_v38 = vld [vmem:[#allocation8 + $0x100] ss:$16 sps:$4 sm:$0xff]  }
 0x2b8   :  { %3843 = vmatprep.mubr.bf16.mxu0 %v8606_v43  ;;  %4212 = vmatprep.mubr.bf16.mxu1 %v8606_v43  ;;  %v8035_v43 = vld [vmem:[#allocation8 + $0x128] ss:$16 sps:$4 sm:$0xff]  }
 0x2ba   :  { %3814 = vmatpush1.bf16.msra.mxu0 %v7936_v39  ;;  %4183 = vmatpush1.bf16.msra.mxu1 %v7939_v40  ;;  %v8029_v39 = vld [vmem:[#allocation8 + $0x108] ss:$16 sps:$4 sm:$0xff]   ;;  %v8034_v40 = vld [vmem:[#allocation8 + $0x124] ss:$16 sps:$4 sm:$0xff]  }
 0x2bb   :  { %3815 = vmatprep.subr.bf16.mxu0 %v7944_v41  ;;  %4184 = vmatprep.subr.bf16.mxu1 %v7947_v42  ;;  %v8037_v41 = vld [vmem:[#allocation8 + $0x12c] ss:$16 sps:$4 sm:$0xff]   ;;  %v8032_v42 = vld [vmem:[#allocation8 + $0x120] ss:$16 sps:$4 sm:$0xff]  }
 0x2be   :  { %3816 = vmatpush1.bf16.msra.mxu0 %v7942_v44  ;;  %4185 = vmatpush1.bf16.msra.mxu1 %v7945_v45  ;;  %v8040_v44 = vld [vmem:[#allocation8 + $0x144] ss:$16 sps:$4 sm:$0xff]   ;;  %v8043_v45 = vld [vmem:[#allocation8 + $0x14c] ss:$16 sps:$4 sm:$0xff]  }
 0x2bf   :  { %3817 = vmatprep.subr.bf16.mxu0 %v7950_v46  ;;  %4186 = vmatprep.subr.bf16.mxu1 %v7953_v47  ;;  %v8038_v46 = vld [vmem:[#allocation8 + $0x140] ss:$16 sps:$4 sm:$0xff]   ;;  %v8041_v47 = vld [vmem:[#allocation8 + $0x148] ss:$16 sps:$4 sm:$0xff]  }
 0x2c2   :  { %3818 = vmatpush1.bf16.msra.mxu0 %v7948_v48  ;;  %4187 = vmatpush1.bf16.msra.mxu1 %v7951_v49  ;;  %v8046_v48 = vld [vmem:[#allocation8 + $0x164] ss:$16 sps:$4 sm:$0xff]   ;;  %v8049_v49 = vld [vmem:[#allocation8 + $0x16c] ss:$16 sps:$4 sm:$0xff]  }
 0x2c3   :  { %3819 = vmatprep.subr.bf16.mxu0 %v7956_v50  ;;  %4188 = vmatprep.subr.bf16.mxu1 %v7959_v51  ;;  %v8044_v50 = vld [vmem:[#allocation8 + $0x160] ss:$16 sps:$4 sm:$0xff]   ;;  %v8047_v51 = vld [vmem:[#allocation8 + $0x168] ss:$16 sps:$4 sm:$0xff]  }
 0x2c6   :  { %3820 = vmatpush1.bf16.msra.mxu0 %v7954_v52  ;;  %4189 = vmatpush1.bf16.msra.mxu1 %v7957_v53  ;;  %v8052_v52 = vld [vmem:[#allocation8 + $0x184] ss:$16 sps:$4 sm:$0xff]   ;;  %v8055_v53 = vld [vmem:[#allocation8 + $0x18c] ss:$16 sps:$4 sm:$0xff]  }
 0x2c7   :  { %3821 = vmatprep.subr.bf16.mxu0 %v7962_v54  ;;  %4190 = vmatprep.subr.bf16.mxu1 %v7965_v55  ;;  %v8050_v54 = vld [vmem:[#allocation8 + $0x180] ss:$16 sps:$4 sm:$0xff]   ;;  %v8053_v55 = vld [vmem:[#allocation8 + $0x188] ss:$16 sps:$4 sm:$0xff]  }
 0x2ca   :  { %3822 = vmatpush1.bf16.msra.mxu0 %v7960_v56  ;;  %4191 = vmatpush1.bf16.msra.mxu1 %v7963_v57  ;;  %v8058_v56 = vld [vmem:[#allocation8 + $0x1a4] ss:$16 sps:$4 sm:$0xff]   ;;  %v8061_v57 = vld [vmem:[#allocation8 + $0x1ac] ss:$16 sps:$4 sm:$0xff]  }
 0x2cb   :  { %3823 = vmatprep.subr.bf16.mxu0 %v7968_v58  ;;  %4192 = vmatprep.subr.bf16.mxu1 %v7971_v59  ;;  %v8056_v58 = vld [vmem:[#allocation8 + $0x1a0] ss:$16 sps:$4 sm:$0xff]   ;;  %v8059_v59 = vld [vmem:[#allocation8 + $0x1a8] ss:$16 sps:$4 sm:$0xff]  }
 0x2ce   :  { %3824 = vmatpush1.bf16.msra.mxu0 %v7966_v60  ;;  %4193 = vmatpush1.bf16.msra.mxu1 %v7969_v61  ;;  %v8064_v60 = vld [vmem:[#allocation8 + $0x1c4] ss:$16 sps:$4 sm:$0xff]   ;;  %v8067_v61 = vld [vmem:[#allocation8 + $0x1cc] ss:$16 sps:$4 sm:$0xff]  }
 0x2cf   :  { %3825 = vmatprep.subr.bf16.mxu0 %v7974_v62  ;;  %4194 = vmatprep.subr.bf16.mxu1 %v7977_v63  ;;  %v8062_v62 = vld [vmem:[#allocation8 + $0x1c0] ss:$16 sps:$4 sm:$0xff]   ;;  %v8065_v63 = vld [vmem:[#allocation8 + $0x1c8] ss:$16 sps:$4 sm:$0xff]  }
 0x2d2   :  { %3826 = vmatpush1.bf16.msra.mxu0 %v7972_v0  ;;  %4195 = vmatpush1.bf16.msra.mxu1 %v7975_v1  ;;  %v8070_v0 = vld [vmem:[#allocation8 + $0x1e4] ss:$16 sps:$4 sm:$0xff]   ;;  %v8073_v1 = vld [vmem:[#allocation8 + $0x1ec] ss:$16 sps:$4 sm:$0xff]  }
 0x2d3   :  { %5015 = vmatprep.subr.bf16.mxu0 %v7980_v3  ;;  %5097 = vmatprep.subr.bf16.mxu1 %v7983_v4  ;;  %v8071_v3 = vld [vmem:[#allocation8 + $0x1e8] ss:$16 sps:$4 sm:$0xff]   ;;  %v8076_v4 = vld [vmem:[#allocation8 + $0x204] ss:$16 sps:$4 sm:$0xff]  }
 0x2d5   :  { %3844 = vmatmul.mubr.bf16.vlgmr.msra.gmra.mrb[0].mxu0 %v196_v5  ;;  %4213 = vmatmul.mubr.bf16.vlgmr.msra.gmra.mrb[0].mxu1 %v196_v5  ;;  %v8079_v5 = vld [vmem:[#allocation8 + $0x20c] ss:$16 sps:$4 sm:$0xff]  }
 0x2d6   :  { %5016 = vmatpush1.bf16.msra.mxu0 %v7978_v6  ;;  %5098 = vmatpush1.bf16.msra.mxu1 %v7981_v7  ;;  %v743_v6 = vlaneseq }
 0x2d7   :  { %5017 = vmatprep.subr.bf16.mxu0 %v7986_v8  ;;  %5099 = vmatprep.subr.bf16.mxu1 %v7989_v9  ;;  %v8804_v9 = vld [vmem:[#allocation7] sm:$0xf] }
 0x2d8   :  { %v8799_v7 = vshrl.u32 %v743_v6, 7  ;;  %v8137_v6 = vld [vmem:[#allocation8 + $0x348] ss:$16 sps:$4 sm:$0xff]  }
 0x2da   :  { %5018 = vmatpush1.bf16.msra.mxu0 %v7984_v10  ;;  %5100 = vmatpush1.bf16.msra.mxu1 %v7987_v11  ;;  %v8802_v8 = vsub.s32 0, %v8799_v7  ;;  %v8807_v10 = vsub.s32 1, %v8799_v7  ;;  %v8810_v11 = vsub.s32 3, %v8799_v7 }
 0x2db   :  { %5019 = vmatprep.subr.bf16.mxu0 %v7992_v12  ;;  %5101 = vmatprep.subr.bf16.mxu1 %v7995_v13 }
 0x2dc   :  { %v746_v12 = vrot.slane %v8804_v9, %v8802_v8  ;;  %v750_v13 = vrot.slane %v8804_v9, %v8807_v10 }
 0x2de   :  { %5020 = vmatpush1.bf16.msra.mxu0 %v7990_v14  ;;  %5102 = vmatpush1.bf16.msra.mxu1 %v7993_v15  ;;  %v758_v14 = vrot.slane %v8804_v9, %v8810_v11 }
 0x2df   :  { %5021 = vmatprep.subr.bf16.mxu0 %v7998_v16  ;;  %5103 = vmatprep.subr.bf16.mxu1 %v8001_v17 }
 0x2e2   :  { %5022 = vmatpush1.bf16.msra.mxu0 %v7996_v18  ;;  %5104 = vmatpush1.bf16.msra.mxu1 %v7999_v19 }
 0x2e3   :  { %5023 = vmatprep.subr.bf16.mxu0 %v8004_v20  ;;  %5105 = vmatprep.subr.bf16.mxu1 %v8007_v21 }
 0x2e6   :  { %5024 = vmatpush1.bf16.msra.mxu0 %v8002_v22  ;;  %5106 = vmatpush1.bf16.msra.mxu1 %v8005_v23 }
 0x2e7   :  { %5025 = vmatprep.subr.bf16.mxu0 %v8010_v24  ;;  %5107 = vmatprep.subr.bf16.mxu1 %v8013_v25 }
 0x2ea   :  { %5026 = vmatpush1.bf16.msra.mxu0 %v8008_v26  ;;  %5108 = vmatpush1.bf16.msra.mxu1 %v8011_v27  ;;  %v8074_v27 = vld [vmem:[#allocation8 + $0x200] ss:$16 sps:$4 sm:$0xff]  }
 0x2eb   :  { %5027 = vmatprep.subr.bf16.mxu0 %v8016_v28  ;;  %5109 = vmatprep.subr.bf16.mxu1 %v8019_v29  ;;  %v8077_v28 = vld [vmem:[#allocation8 + $0x208] ss:$16 sps:$4 sm:$0xff]  }
 0x2ee   :  { %5028 = vmatpush1.bf16.msra.mxu0 %v8014_v30  ;;  %5110 = vmatpush1.bf16.msra.mxu1 %v8017_v31  ;;  %v8082_v30 = vld [vmem:[#allocation8 + $0x224] ss:$16 sps:$4 sm:$0xff]   ;;  %v8085_v31 = vld [vmem:[#allocation8 + $0x22c] ss:$16 sps:$4 sm:$0xff]  }
 0x2ef   :  { %5029 = vmatprep.subr.bf16.mxu0 %v8022_v32  ;;  %5111 = vmatprep.subr.bf16.mxu1 %v8025_v33  ;;  %v8080_v33 = vld [vmem:[#allocation8 + $0x220] ss:$16 sps:$4 sm:$0xff]  }
 0x2f2   :  { %5030 = vmatpush1.bf16.msra.mxu0 %v8020_v34  ;;  %5112 = vmatpush1.bf16.msra.mxu1 %v8023_v35  ;;  %v8083_v34 = vld [vmem:[#allocation8 + $0x228] ss:$16 sps:$4 sm:$0xff]   ;;  %v8088_v35 = vld [vmem:[#allocation8 + $0x244] ss:$16 sps:$4 sm:$0xff]  }
 0x2f3   :  { %5031 = vmatprep.subr.bf16.mxu0 %v8028_v36  ;;  %5113 = vmatprep.subr.bf16.mxu1 %v8031_v37  ;;  %v8091_v36 = vld [vmem:[#allocation8 + $0x24c] ss:$16 sps:$4 sm:$0xff]   ;;  %v8086_v37 = vld [vmem:[#allocation8 + $0x240] ss:$16 sps:$4 sm:$0xff]  }
 0x2f6   :  { %5032 = vmatpush1.bf16.msra.mxu0 %v8026_v38  ;;  %5114 = vmatpush1.bf16.msra.mxu1 %v8029_v39  ;;  %v8089_v38 = vld [vmem:[#allocation8 + $0x248] ss:$16 sps:$4 sm:$0xff]   ;;  %v8094_v39 = vld [vmem:[#allocation8 + $0x264] ss:$16 sps:$4 sm:$0xff]  }
 0x2f7   :  { %5033 = vmatprep.subr.bf16.mxu0 %v8034_v40  ;;  %5115 = vmatprep.subr.bf16.mxu1 %v8037_v41  ;;  %v8097_v40 = vld [vmem:[#allocation8 + $0x26c] ss:$16 sps:$4 sm:$0xff]   ;;  %v8092_v41 = vld [vmem:[#allocation8 + $0x260] ss:$16 sps:$4 sm:$0xff]  }
 0x2fa   :  { %5034 = vmatpush1.bf16.msra.mxu0 %v8032_v42  ;;  %5116 = vmatpush1.bf16.msra.mxu1 %v8035_v43  ;;  %v8095_v42 = vld [vmem:[#allocation8 + $0x268] ss:$16 sps:$4 sm:$0xff]   ;;  %v8100_v43 = vld [vmem:[#allocation8 + $0x284] ss:$16 sps:$4 sm:$0xff]  }
 0x2fb   :  { %5035 = vmatprep.subr.bf16.mxu0 %v8040_v44  ;;  %5117 = vmatprep.subr.bf16.mxu1 %v8043_v45  ;;  %v8103_v44 = vld [vmem:[#allocation8 + $0x28c] ss:$16 sps:$4 sm:$0xff]   ;;  %v8098_v45 = vld [vmem:[#allocation8 + $0x280] ss:$16 sps:$4 sm:$0xff]  }
 0x2fe   :  { %5036 = vmatpush1.bf16.msra.mxu0 %v8038_v46  ;;  %5118 = vmatpush1.bf16.msra.mxu1 %v8041_v47  ;;  %v8101_v46 = vld [vmem:[#allocation8 + $0x288] ss:$16 sps:$4 sm:$0xff]   ;;  %v8106_v47 = vld [vmem:[#allocation8 + $0x2a4] ss:$16 sps:$4 sm:$0xff]  }
 0x2ff   :  { %5037 = vmatprep.subr.bf16.mxu0 %v8046_v48  ;;  %5119 = vmatprep.subr.bf16.mxu1 %v8049_v49  ;;  %v8109_v48 = vld [vmem:[#allocation8 + $0x2ac] ss:$16 sps:$4 sm:$0xff]   ;;  %v8104_v49 = vld [vmem:[#allocation8 + $0x2a0] ss:$16 sps:$4 sm:$0xff]  }
 0x302   :  { %5038 = vmatpush1.bf16.msra.mxu0 %v8044_v50  ;;  %5120 = vmatpush1.bf16.msra.mxu1 %v8047_v51  ;;  %v8107_v50 = vld [vmem:[#allocation8 + $0x2a8] ss:$16 sps:$4 sm:$0xff]   ;;  %v8112_v51 = vld [vmem:[#allocation8 + $0x2c4] ss:$16 sps:$4 sm:$0xff]  }
 0x303   :  { %5039 = vmatprep.subr.bf16.mxu0 %v8052_v52  ;;  %5121 = vmatprep.subr.bf16.mxu1 %v8055_v53  ;;  %v8115_v52 = vld [vmem:[#allocation8 + $0x2cc] ss:$16 sps:$4 sm:$0xff]   ;;  %v8110_v53 = vld [vmem:[#allocation8 + $0x2c0] ss:$16 sps:$4 sm:$0xff]  }
 0x306   :  { %5040 = vmatpush1.bf16.msra.mxu0 %v8050_v54  ;;  %5122 = vmatpush1.bf16.msra.mxu1 %v8053_v55  ;;  %v8113_v54 = vld [vmem:[#allocation8 + $0x2c8] ss:$16 sps:$4 sm:$0xff]   ;;  %v8118_v55 = vld [vmem:[#allocation8 + $0x2e4] ss:$16 sps:$4 sm:$0xff]  }
 0x307   :  { %5041 = vmatprep.subr.bf16.mxu0 %v8058_v56  ;;  %5123 = vmatprep.subr.bf16.mxu1 %v8061_v57  ;;  %v8121_v56 = vld [vmem:[#allocation8 + $0x2ec] ss:$16 sps:$4 sm:$0xff]   ;;  %v8116_v57 = vld [vmem:[#allocation8 + $0x2e0] ss:$16 sps:$4 sm:$0xff]  }
 0x30a   :  { %5042 = vmatpush1.bf16.msra.mxu0 %v8056_v58  ;;  %5124 = vmatpush1.bf16.msra.mxu1 %v8059_v59  ;;  %v8119_v58 = vld [vmem:[#allocation8 + $0x2e8] ss:$16 sps:$4 sm:$0xff]   ;;  %v8124_v59 = vld [vmem:[#allocation8 + $0x304] ss:$16 sps:$4 sm:$0xff]  }
 0x30b   :  { %5043 = vmatprep.subr.bf16.mxu0 %v8064_v60  ;;  %5125 = vmatprep.subr.bf16.mxu1 %v8067_v61  ;;  %v8127_v60 = vld [vmem:[#allocation8 + $0x30c] ss:$16 sps:$4 sm:$0xff]   ;;  %v8122_v61 = vld [vmem:[#allocation8 + $0x300] ss:$16 sps:$4 sm:$0xff]  }
 0x30e   :  { %5044 = vmatpush1.bf16.msra.mxu0 %v8062_v62  ;;  %5126 = vmatpush1.bf16.msra.mxu1 %v8065_v63  ;;  %v8125_v62 = vld [vmem:[#allocation8 + $0x308] ss:$16 sps:$4 sm:$0xff]   ;;  %v8130_v63 = vld [vmem:[#allocation8 + $0x324] ss:$16 sps:$4 sm:$0xff]  }
 0x30f   :  { %5045 = vmatprep.subr.bf16.mxu0 %v8070_v0  ;;  %5127 = vmatprep.subr.bf16.mxu1 %v8073_v1  ;;  %v8133_v0 = vld [vmem:[#allocation8 + $0x32c] ss:$16 sps:$4 sm:$0xff]   ;;  %v8128_v1 = vld [vmem:[#allocation8 + $0x320] ss:$16 sps:$4 sm:$0xff]  }
 0x312   :  { %5046 = vmatpush1.bf16.msra.mxu0 %v8068_v2  ;;  %5128 = vmatpush1.bf16.msra.mxu1 %v8071_v3  ;;  %v8131_v2 = vld [vmem:[#allocation8 + $0x328] ss:$16 sps:$4 sm:$0xff]   ;;  %v8136_v3 = vld [vmem:[#allocation8 + $0x344] ss:$16 sps:$4 sm:$0xff]  }
 0x313   :  { %5056 = vmatprep.subr.bf16.mxu0 %v8076_v4  ;;  %5138 = vmatprep.subr.bf16.mxu1 %v8079_v5  ;;  %v8139_v4 = vld [vmem:[#allocation8 + $0x34c] ss:$16 sps:$4 sm:$0xff]   ;;  %v8134_v5 = vld [vmem:[#allocation8 + $0x340] ss:$16 sps:$4 sm:$0xff]  }
 0x3a8   :  { %v3845_v15 = vpop.f32.mrb[0].mxu0  ;;  %v8818_v16 = vpop.f32.mrb[0].mxu1 }
 0x3a9   :  { %v7057_v17 = vadd.f32 %v3845_v15, %v746_v12  ;;  %v3847_v18 = vpop.f32.mrb[1].mxu0  ;;  %v4216_v19 = vpop.f32.mrb[1].mxu1  ;;  %v8142_v12 = vld [vmem:[#allocation8 + $0x364] ss:$16 sps:$4 sm:$0xff]   ;;  %v8143_v15 = vld [vmem:[#allocation8 + $0x368] ss:$16 sps:$4 sm:$0xff]  }
 0x3aa   :  { %v7058_v20 = vadd.f32 %v3847_v18, %v750_v13  ;;  %v3849_v21 = vpop.f32.mrb[2].mxu0  ;;  %v4218_v22 = vpop.f32.mrb[2].mxu1  ;;  %v7060_v23 = vadd.f32 %v4216_v19, %v758_v14  ;;  %v8145_v13 = vld [vmem:[#allocation8 + $0x36c] ss:$16 sps:$4 sm:$0xff]   ;;  %v8140_v14 = vld [vmem:[#allocation8 + $0x360] ss:$16 sps:$4 sm:$0xff]  }
 0x3ab   :  { %v3850_v24 = vpop.f32.mrb[3].mxu0  ;;  %v4219_v25 = vpop.f32.mrb[3].mxu1  ;;  %v4221_v29 = vpack.c.bf16 %v7057_v17, %v7057_v17  ;;  %v8148_v17 = vld [vmem:[#allocation8 + $0x384] ss:$16 sps:$4 sm:$0xff]   ;;  %v8151_v18 = vld [vmem:[#allocation8 + $0x38c] ss:$16 sps:$4 sm:$0xff]  }
 0x3ac   :  { %v4222_v26 = vpack.c.bf16 %v7058_v20, %v7058_v20  ;;  %v4224_v32 = vpack.c.bf16 %v7060_v23, %v7060_v23  ;;  %v8146_v19 = vld [vmem:[#allocation8 + $0x380] ss:$16 sps:$4 sm:$0xff]   ;;  %v8149_v20 = vld [vmem:[#allocation8 + $0x388] ss:$16 sps:$4 sm:$0xff]   ;;  %v8154_v21 = vld [vmem:[#allocation8 + $0x3a4] ss:$16 sps:$4 sm:$0xff]  }
 0x3ad   :  { %v8157_v22 = vld [vmem:[#allocation8 + $0x3ac] ss:$16 sps:$4 sm:$0xff]   ;;  %v8152_v23 = vld [vmem:[#allocation8 + $0x3a0] ss:$16 sps:$4 sm:$0xff]   ;;  %v8155_v24 = vld [vmem:[#allocation8 + $0x3a8] ss:$16 sps:$4 sm:$0xff]  }
 0x3ae   :  { %5047 = vmatprep.mubr.bf16.mxu0 %v4222_v26  ;;  %5129 = vmatprep.mubr.bf16.mxu1 %v4222_v26  ;;  %v8821_v25 = vsub.s32 2, %v8799_v7  ;;  %v8160_v26 = vld [vmem:[#allocation8 + $0x3c4] ss:$16 sps:$4 sm:$0xff]   ;;  %v8167_v7 = vld [vmem:[#allocation8 + $0x3e8] ss:$16 sps:$4 sm:$0xff]  }
 0x3af   :  { %5048 = vmatmul.mubr.bf16.vlgmr.msra.gmra.mrb[4].mxu0 %v4221_v29  ;;  %5130 = vmatmul.mubr.bf16.vlgmr.msra.gmra.mrb[4].mxu1 %v4221_v29  ;;  %v8161_v29 = vld [vmem:[#allocation8 + $0x3c8] ss:$16 sps:$4 sm:$0xff]  }
 0x3b0   :  { %5057 = vmatpush1.bf16.msra.mxu0 %v8074_v27  ;;  %5139 = vmatpush1.bf16.msra.mxu1 %v8077_v28  ;;  %v8163_v27 = vld [vmem:[#allocation8 + $0x3cc] ss:$16 sps:$4 sm:$0xff]   ;;  %v8158_v28 = vld [vmem:[#allocation8 + $0x3c0] ss:$16 sps:$4 sm:$0xff]  }
 0x3b1   :  { %5088 = vmatprep.mubr.bf16.mxu0 %v4224_v32  ;;  %5170 = vmatprep.mubr.bf16.mxu1 %v4224_v32  ;;  %v8169_v32 = vld [vmem:[#allocation8 + $0x3ec] ss:$16 sps:$4 sm:$0xff]  }
 0x3b2   :  { %5058 = vmatprep.subr.bf16.mxu0 %v8082_v30  ;;  %5140 = vmatprep.subr.bf16.mxu1 %v8085_v31  ;;  %v754_v30 = vrot.slane %v8804_v9, %v8821_v25  ;;  %v8166_v31 = vld [vmem:[#allocation8 + $0x3e4] ss:$16 sps:$4 sm:$0xff]   ;;  %v8178_v9 = vld [vmem:[#allocation13 + $0x24] ss:$16 sps:$4 sm:$0xff]  }
 0x3b4   :  { %5059 = vmatpush1.bf16.msra.mxu0 %v8080_v33  ;;  %5141 = vmatpush1.bf16.msra.mxu1 %v8083_v34  ;;  %v8164_v33 = vld [vmem:[#allocation8 + $0x3e0] ss:$16 sps:$4 sm:$0xff]   ;;  %v7059_v34 = vadd.f32 %v8818_v16, %v754_v30  ;;  %v8184_v16 = vld [vmem:[#allocation13 + $0x44] ss:$16 sps:$4 sm:$0xff]   ;;  %v8253_v30 = vld [vmem:[#allocation13 + $0x1ac] ss:$16 sps:$4 sm:$0xff]  }
 0x3b5   :  { %5060 = vmatprep.subr.bf16.mxu0 %v8088_v35  ;;  %5142 = vmatprep.subr.bf16.mxu1 %v8091_v36  ;;  %v8172_v35 = vld [vmem:[#allocation13 + $0x4] ss:$16 sps:$4 sm:$0xff]   ;;  %v8175_v36 = vld [vmem:[#allocation13 + $0xc] ss:$16 sps:$4 sm:$0xff]  }
 0x3b8   :  { %5061 = vmatpush1.bf16.msra.mxu0 %v8086_v37  ;;  %5143 = vmatpush1.bf16.msra.mxu1 %v8089_v38  ;;  %v8170_v37 = vld [vmem:[#allocation13] ss:$16 sps:$4 sm:$0xff]   ;;  %v8173_v38 = vld [vmem:[#allocation13 + $0x8] ss:$16 sps:$4 sm:$0xff]  }
 0x3b9   :  { %5062 = vmatprep.subr.bf16.mxu0 %v8094_v39  ;;  %5144 = vmatprep.subr.bf16.mxu1 %v8097_v40  ;;  %v4223_v39 = vpack.c.bf16 %v7059_v34, %v7059_v34  ;;  %v8181_v40 = vld [vmem:[#allocation13 + $0x2c] ss:$16 sps:$4 sm:$0xff]   ;;  %v8254_v34 = vld [vmem:[#allocation13 + $0x1c0] ss:$16 sps:$4 sm:$0xff]  }
 0x3bc   :  { %5063 = vmatpush1.bf16.msra.mxu0 %v8092_v41  ;;  %5145 = vmatpush1.bf16.msra.mxu1 %v8095_v42  ;;  %v8176_v41 = vld [vmem:[#allocation13 + $0x20] ss:$16 sps:$4 sm:$0xff]   ;;  %v8179_v42 = vld [vmem:[#allocation13 + $0x28] ss:$16 sps:$4 sm:$0xff]  }
 0x3bd   :  { %5064 = vmatprep.subr.bf16.mxu0 %v8100_v43  ;;  %5146 = vmatprep.subr.bf16.mxu1 %v8103_v44  ;;  %v8187_v43 = vld [vmem:[#allocation13 + $0x4c] ss:$16 sps:$4 sm:$0xff]   ;;  %v8182_v44 = vld [vmem:[#allocation13 + $0x40] ss:$16 sps:$4 sm:$0xff]  }
 0x3c0   :  { %5065 = vmatpush1.bf16.msra.mxu0 %v8098_v45  ;;  %5147 = vmatpush1.bf16.msra.mxu1 %v8101_v46  ;;  %v8185_v45 = vld [vmem:[#allocation13 + $0x48] ss:$16 sps:$4 sm:$0xff]   ;;  %v8190_v46 = vld [vmem:[#allocation13 + $0x64] ss:$16 sps:$4 sm:$0xff]  }
 0x3c1   :  { %5066 = vmatprep.subr.bf16.mxu0 %v8106_v47  ;;  %5148 = vmatprep.subr.bf16.mxu1 %v8109_v48  ;;  %v8193_v47 = vld [vmem:[#allocation13 + $0x6c] ss:$16 sps:$4 sm:$0xff]   ;;  %v8188_v48 = vld [vmem:[#allocation13 + $0x60] ss:$16 sps:$4 sm:$0xff]  }
 0x3c4   :  { %5067 = vmatpush1.bf16.msra.mxu0 %v8104_v49  ;;  %5149 = vmatpush1.bf16.msra.mxu1 %v8107_v50  ;;  %v8191_v49 = vld [vmem:[#allocation13 + $0x68] ss:$16 sps:$4 sm:$0xff]   ;;  %v8196_v50 = vld [vmem:[#allocation13 + $0x84] ss:$16 sps:$4 sm:$0xff]  }
 0x3c5   :  { %5068 = vmatprep.subr.bf16.mxu0 %v8112_v51  ;;  %5150 = vmatprep.subr.bf16.mxu1 %v8115_v52  ;;  %v8199_v51 = vld [vmem:[#allocation13 + $0x8c] ss:$16 sps:$4 sm:$0xff]   ;;  %v8194_v52 = vld [vmem:[#allocation13 + $0x80] ss:$16 sps:$4 sm:$0xff]  }
 0x3c8   :  { %5069 = vmatpush1.bf16.msra.mxu0 %v8110_v53  ;;  %5151 = vmatpush1.bf16.msra.mxu1 %v8113_v54  ;;  %v8197_v53 = vld [vmem:[#allocation13 + $0x88] ss:$16 sps:$4 sm:$0xff]   ;;  %v8202_v54 = vld [vmem:[#allocation13 + $0xa4] ss:$16 sps:$4 sm:$0xff]  }
 0x3c9   :  { %5070 = vmatprep.subr.bf16.mxu0 %v8118_v55  ;;  %5152 = vmatprep.subr.bf16.mxu1 %v8121_v56  ;;  %v8205_v55 = vld [vmem:[#allocation13 + $0xac] ss:$16 sps:$4 sm:$0xff]   ;;  %v8200_v56 = vld [vmem:[#allocation13 + $0xa0] ss:$16 sps:$4 sm:$0xff]  }
 0x3cc   :  { %5071 = vmatpush1.bf16.msra.mxu0 %v8116_v57  ;;  %5153 = vmatpush1.bf16.msra.mxu1 %v8119_v58  ;;  %v8203_v57 = vld [vmem:[#allocation13 + $0xa8] ss:$16 sps:$4 sm:$0xff]   ;;  %v8208_v58 = vld [vmem:[#allocation13 + $0xc4] ss:$16 sps:$4 sm:$0xff]  }
 0x3cd   :  { %5072 = vmatprep.subr.bf16.mxu0 %v8124_v59  ;;  %5154 = vmatprep.subr.bf16.mxu1 %v8127_v60  ;;  %v8211_v59 = vld [vmem:[#allocation13 + $0xcc] ss:$16 sps:$4 sm:$0xff]   ;;  %v8206_v60 = vld [vmem:[#allocation13 + $0xc0] ss:$16 sps:$4 sm:$0xff]  }
 0x3d0   :  { %5073 = vmatpush1.bf16.msra.mxu0 %v8122_v61  ;;  %5155 = vmatpush1.bf16.msra.mxu1 %v8125_v62  ;;  %v8209_v61 = vld [vmem:[#allocation13 + $0xc8] ss:$16 sps:$4 sm:$0xff]   ;;  %v8214_v62 = vld [vmem:[#allocation13 + $0xe4] ss:$16 sps:$4 sm:$0xff]  }
 0x3d1   :  { %5074 = vmatprep.subr.bf16.mxu0 %v8130_v63  ;;  %5156 = vmatprep.subr.bf16.mxu1 %v8133_v0  ;;  %v8217_v63 = vld [vmem:[#allocation13 + $0xec] ss:$16 sps:$4 sm:$0xff]   ;;  %v8212_v0 = vld [vmem:[#allocation13 + $0xe0] ss:$16 sps:$4 sm:$0xff]  }
 0x3d4   :  { %5075 = vmatpush1.bf16.msra.mxu0 %v8128_v1  ;;  %5157 = vmatpush1.bf16.msra.mxu1 %v8131_v2  ;;  %v8215_v1 = vld [vmem:[#allocation13 + $0xe8] ss:$16 sps:$4 sm:$0xff]   ;;  %v8220_v2 = vld [vmem:[#allocation13 + $0x104] ss:$16 sps:$4 sm:$0xff]  }
 0x3d5   :  { %5076 = vmatprep.subr.bf16.mxu0 %v8136_v3  ;;  %5158 = vmatprep.subr.bf16.mxu1 %v8139_v4  ;;  %v8223_v3 = vld [vmem:[#allocation13 + $0x10c] ss:$16 sps:$4 sm:$0xff]   ;;  %v8218_v4 = vld [vmem:[#allocation13 + $0x100] ss:$16 sps:$4 sm:$0xff]  }
 0x3d8   :  { %5077 = vmatpush1.bf16.msra.mxu0 %v8134_v5  ;;  %5159 = vmatpush1.bf16.msra.mxu1 %v8137_v6  ;;  %v8221_v5 = vld [vmem:[#allocation13 + $0x108] ss:$16 sps:$4 sm:$0xff]   ;;  %v8226_v6 = vld [vmem:[#allocation13 + $0x124] ss:$16 sps:$4 sm:$0xff]  }
 0x3d9   :  { %5078 = vmatprep.subr.bf16.mxu0 %v8142_v12  ;;  %5160 = vmatprep.subr.bf16.mxu1 %v8145_v13  ;;  %v8229_v12 = vld [vmem:[#allocation13 + $0x12c] ss:$16 sps:$4 sm:$0xff]   ;;  %v8224_v13 = vld [vmem:[#allocation13 + $0x120] ss:$16 sps:$4 sm:$0xff]  }
 0x3dc   :  { %5079 = vmatpush1.bf16.msra.mxu0 %v8140_v14  ;;  %5161 = vmatpush1.bf16.msra.mxu1 %v8143_v15  ;;  %v8227_v14 = vld [vmem:[#allocation13 + $0x128] ss:$16 sps:$4 sm:$0xff]   ;;  %v8232_v15 = vld [vmem:[#allocation13 + $0x144] ss:$16 sps:$4 sm:$0xff]  }
 0x3dd   :  { %5080 = vmatprep.subr.bf16.mxu0 %v8148_v17  ;;  %5162 = vmatprep.subr.bf16.mxu1 %v8151_v18  ;;  %v8235_v17 = vld [vmem:[#allocation13 + $0x14c] ss:$16 sps:$4 sm:$0xff]   ;;  %v8230_v18 = vld [vmem:[#allocation13 + $0x140] ss:$16 sps:$4 sm:$0xff]  }
 0x3e0   :  { %5081 = vmatpush1.bf16.msra.mxu0 %v8146_v19  ;;  %5163 = vmatpush1.bf16.msra.mxu1 %v8149_v20  ;;  %v8233_v19 = vld [vmem:[#allocation13 + $0x148] ss:$16 sps:$4 sm:$0xff]   ;;  %v8238_v20 = vld [vmem:[#allocation13 + $0x164] ss:$16 sps:$4 sm:$0xff]  }
 0x3e1   :  { %5082 = vmatprep.subr.bf16.mxu0 %v8154_v21  ;;  %5164 = vmatprep.subr.bf16.mxu1 %v8157_v22  ;;  %v8241_v21 = vld [vmem:[#allocation13 + $0x16c] ss:$16 sps:$4 sm:$0xff]   ;;  %v8236_v22 = vld [vmem:[#allocation13 + $0x160] ss:$16 sps:$4 sm:$0xff]  }
 0x3e4   :  { %5083 = vmatpush1.bf16.msra.mxu0 %v8152_v23  ;;  %5165 = vmatpush1.bf16.msra.mxu1 %v8155_v24  ;;  %v8239_v23 = vld [vmem:[#allocation13 + $0x168] ss:$16 sps:$4 sm:$0xff]   ;;  %v8244_v24 = vld [vmem:[#allocation13 + $0x184] ss:$16 sps:$4 sm:$0xff]  }
 0x3e5   :  { %5084 = vmatprep.subr.bf16.mxu0 %v8160_v26  ;;  %5166 = vmatprep.subr.bf16.mxu1 %v8163_v27  ;;  %v8247_v26 = vld [vmem:[#allocation13 + $0x18c] ss:$16 sps:$4 sm:$0xff]   ;;  %v8242_v27 = vld [vmem:[#allocation13 + $0x180] ss:$16 sps:$4 sm:$0xff]  }
 0x3e8   :  { %5085 = vmatpush1.bf16.msra.mxu0 %v8158_v28  ;;  %5167 = vmatpush1.bf16.msra.mxu1 %v8161_v29  ;;  %v8245_v28 = vld [vmem:[#allocation13 + $0x188] ss:$16 sps:$4 sm:$0xff]   ;;  %v8250_v29 = vld [vmem:[#allocation13 + $0x1a4] ss:$16 sps:$4 sm:$0xff]  }
 0x3e9   :  { %5086 = vmatprep.subr.bf16.mxu0 %v8166_v31  ;;  %5168 = vmatprep.subr.bf16.mxu1 %v8169_v32  ;;  %v8248_v31 = vld [vmem:[#allocation13 + $0x1a0] ss:$16 sps:$4 sm:$0xff]   ;;  %v8251_v32 = vld [vmem:[#allocation13 + $0x1a8] ss:$16 sps:$4 sm:$0xff]  }
 0x3ec   :  { %5087 = vmatpush1.bf16.msra.mxu0 %v8164_v33  ;;  %5169 = vmatpush1.bf16.msra.mxu1 %v8167_v7  ;;  %v8256_v33 = vld [vmem:[#allocation13 + $0x1c4] ss:$16 sps:$4 sm:$0xff]   ;;  %v8259_v7 = vld [vmem:[#allocation13 + $0x1cc] ss:$16 sps:$4 sm:$0xff]  }
 0x3ed   :  { %6007 = vmatprep.subr.bf16.mxu0 %v8172_v35  ;;  %6089 = vmatprep.subr.bf16.mxu1 %v8175_v36  ;;  %v8257_v35 = vld [vmem:[#allocation13 + $0x1c8] ss:$16 sps:$4 sm:$0xff]   ;;  %v8262_v36 = vld [vmem:[#allocation13 + $0x1e4] ss:$16 sps:$4 sm:$0xff]  }
 0x3ef   :  { %5089 = vmatmul.mubr.bf16.vlgmr.msra.gmra.mrb[4].mxu0 %v4223_v39  ;;  %5171 = vmatmul.mubr.bf16.vlgmr.msra.gmra.mrb[4].mxu1 %v4223_v39  ;;  %v8263_v39 = vld [vmem:[#allocation13 + $0x1e8] ss:$16 sps:$4 sm:$0xff]  }
 0x3f0   :  { %6008 = vmatpush1.bf16.msra.mxu0 %v8170_v37  ;;  %6090 = vmatpush1.bf16.msra.mxu1 %v8173_v38  ;;  %v8265_v37 = vld [vmem:[#allocation13 + $0x1ec] ss:$16 sps:$4 sm:$0xff]   ;;  %v8260_v38 = vld [vmem:[#allocation13 + $0x1e0] ss:$16 sps:$4 sm:$0xff]  }
 0x3f1   :  { %6009 = vmatprep.subr.bf16.mxu0 %v8178_v9  ;;  %6091 = vmatprep.subr.bf16.mxu1 %v8181_v40  ;;  %v8268_v9 = vld [vmem:[#allocation13 + $0x204] ss:$16 sps:$4 sm:$0xff]   ;;  %v8271_v40 = vld [vmem:[#allocation13 + $0x20c] ss:$16 sps:$4 sm:$0xff]  }
 0x3f4   :  { %6010 = vmatpush1.bf16.msra.mxu0 %v8176_v41  ;;  %6092 = vmatpush1.bf16.msra.mxu1 %v8179_v42  ;;  %v4353_v41 = vld [vmem:[#allocation10] sm:$0xf]  ;;  %v5183_v42 = vld [vmem:[#allocation11] sm:$0xf] }
 0x3f5   :  { %6011 = vmatprep.subr.bf16.mxu0 %v8184_v16  ;;  %6093 = vmatprep.subr.bf16.mxu1 %v8187_v43  ;;  %v4358_v16 = vrot.slane %v4353_v41, %v8802_v8  ;;  %v4366_v43 = vrot.slane %v4353_v41, %v8821_v25 }
 0x3f8   :  { %6012 = vmatpush1.bf16.msra.mxu0 %v8182_v44  ;;  %6094 = vmatpush1.bf16.msra.mxu1 %v8185_v45  ;;  %v4362_v44 = vrot.slane %v4353_v41, %v8807_v10  ;;  %v4370_v45 = vrot.slane %v4353_v41, %v8810_v11  ;;  %v8313_v41 = vld [vmem:[#allocation13 + $0x2ec] ss:$16 sps:$4 sm:$0xff]  }
 0x3f9   :  { %6013 = vmatprep.subr.bf16.mxu0 %v8190_v46  ;;  %6095 = vmatprep.subr.bf16.mxu1 %v8193_v47  ;;  %v5188_v46 = vrot.slane %v5183_v42, %v8802_v8  ;;  %v5196_v47 = vrot.slane %v5183_v42, %v8821_v25 }
 0x3fc   :  { %6014 = vmatpush1.bf16.msra.mxu0 %v8188_v48  ;;  %6096 = vmatpush1.bf16.msra.mxu1 %v8191_v49 }
 0x3fd   :  { %6015 = vmatprep.subr.bf16.mxu0 %v8196_v50  ;;  %6097 = vmatprep.subr.bf16.mxu1 %v8199_v51  ;;  %v5192_v50 = vrot.slane %v5183_v42, %v8807_v10  ;;  %v5200_v51 = vrot.slane %v5183_v42, %v8810_v11  ;;  %v8308_v42 = vld [vmem:[#allocation13 + $0x2e0] ss:$16 sps:$4 sm:$0xff]  }
 0x400   :  { %6016 = vmatpush1.bf16.msra.mxu0 %v8194_v52  ;;  %6098 = vmatpush1.bf16.msra.mxu1 %v8197_v53 }
 0x401   :  { %6017 = vmatprep.subr.bf16.mxu0 %v8202_v54  ;;  %6099 = vmatprep.subr.bf16.mxu1 %v8205_v55 }
 0x404   :  { %6018 = vmatpush1.bf16.msra.mxu0 %v8200_v56  ;;  %6100 = vmatpush1.bf16.msra.mxu1 %v8203_v57 }
 0x405   :  { %6019 = vmatprep.subr.bf16.mxu0 %v8208_v58  ;;  %6101 = vmatprep.subr.bf16.mxu1 %v8211_v59 }
 0x408   :  { %6020 = vmatpush1.bf16.msra.mxu0 %v8206_v60  ;;  %6102 = vmatpush1.bf16.msra.mxu1 %v8209_v61 }
 0x409   :  { %6021 = vmatprep.subr.bf16.mxu0 %v8214_v62  ;;  %6103 = vmatprep.subr.bf16.mxu1 %v8217_v63 }
 0x40c   :  { %6022 = vmatpush1.bf16.msra.mxu0 %v8212_v0  ;;  %6104 = vmatpush1.bf16.msra.mxu1 %v8215_v1 }
 0x40d   :  { %6023 = vmatprep.subr.bf16.mxu0 %v8220_v2  ;;  %6105 = vmatprep.subr.bf16.mxu1 %v8223_v3 }
 0x410   :  { %6024 = vmatpush1.bf16.msra.mxu0 %v8218_v4  ;;  %6106 = vmatpush1.bf16.msra.mxu1 %v8221_v5 }
 0x411   :  { %6025 = vmatprep.subr.bf16.mxu0 %v8226_v6  ;;  %6107 = vmatprep.subr.bf16.mxu1 %v8229_v12  ;;  %v8266_v6 = vld [vmem:[#allocation13 + $0x200] ss:$16 sps:$4 sm:$0xff]   ;;  %v8269_v12 = vld [vmem:[#allocation13 + $0x208] ss:$16 sps:$4 sm:$0xff]  }
 0x414   :  { %6026 = vmatpush1.bf16.msra.mxu0 %v8224_v13  ;;  %6108 = vmatpush1.bf16.msra.mxu1 %v8227_v14 }
 0x415   :  { %6027 = vmatprep.subr.bf16.mxu0 %v8232_v15  ;;  %6109 = vmatprep.subr.bf16.mxu1 %v8235_v17  ;;  %v8274_v15 = vld [vmem:[#allocation13 + $0x224] ss:$16 sps:$4 sm:$0xff]   ;;  %v8277_v17 = vld [vmem:[#allocation13 + $0x22c] ss:$16 sps:$4 sm:$0xff]  }
 0x418   :  { %6028 = vmatpush1.bf16.msra.mxu0 %v8230_v18  ;;  %6110 = vmatpush1.bf16.msra.mxu1 %v8233_v19  ;;  %v8272_v19 = vld [vmem:[#allocation13 + $0x220] ss:$16 sps:$4 sm:$0xff]  }
 0x419   :  { %6029 = vmatprep.subr.bf16.mxu0 %v8238_v20  ;;  %6111 = vmatprep.subr.bf16.mxu1 %v8241_v21  ;;  %v8275_v20 = vld [vmem:[#allocation13 + $0x228] ss:$16 sps:$4 sm:$0xff]   ;;  %v8280_v21 = vld [vmem:[#allocation13 + $0x244] ss:$16 sps:$4 sm:$0xff]  }
 0x41c   :  { %6030 = vmatpush1.bf16.msra.mxu0 %v8236_v22  ;;  %6112 = vmatpush1.bf16.msra.mxu1 %v8239_v23  ;;  %v8283_v22 = vld [vmem:[#allocation13 + $0x24c] ss:$16 sps:$4 sm:$0xff]   ;;  %v8278_v23 = vld [vmem:[#allocation13 + $0x240] ss:$16 sps:$4 sm:$0xff]  }
 0x41d   :  { %6031 = vmatprep.subr.bf16.mxu0 %v8244_v24  ;;  %6113 = vmatprep.subr.bf16.mxu1 %v8247_v26  ;;  %v8281_v24 = vld [vmem:[#allocation13 + $0x248] ss:$16 sps:$4 sm:$0xff]   ;;  %v8286_v26 = vld [vmem:[#allocation13 + $0x264] ss:$16 sps:$4 sm:$0xff]  }
 0x420   :  { %6032 = vmatpush1.bf16.msra.mxu0 %v8242_v27  ;;  %6114 = vmatpush1.bf16.msra.mxu1 %v8245_v28  ;;  %v8289_v27 = vld [vmem:[#allocation13 + $0x26c] ss:$16 sps:$4 sm:$0xff]   ;;  %v8284_v28 = vld [vmem:[#allocation13 + $0x260] ss:$16 sps:$4 sm:$0xff]  }
 0x421   :  { %6033 = vmatprep.subr.bf16.mxu0 %v8250_v29  ;;  %6115 = vmatprep.subr.bf16.mxu1 %v8253_v30  ;;  %v8287_v29 = vld [vmem:[#allocation13 + $0x268] ss:$16 sps:$4 sm:$0xff]   ;;  %v8292_v30 = vld [vmem:[#allocation13 + $0x284] ss:$16 sps:$4 sm:$0xff]  }
 0x424   :  { %6034 = vmatpush1.bf16.msra.mxu0 %v8248_v31  ;;  %6116 = vmatpush1.bf16.msra.mxu1 %v8251_v32  ;;  %v8295_v31 = vld [vmem:[#allocation13 + $0x28c] ss:$16 sps:$4 sm:$0xff]   ;;  %v8290_v32 = vld [vmem:[#allocation13 + $0x280] ss:$16 sps:$4 sm:$0xff]  }
 0x425   :  { %6035 = vmatprep.subr.bf16.mxu0 %v8256_v33  ;;  %6117 = vmatprep.subr.bf16.mxu1 %v8259_v7  ;;  %v8293_v33 = vld [vmem:[#allocation13 + $0x288] ss:$16 sps:$4 sm:$0xff]   ;;  %v8298_v7 = vld [vmem:[#allocation13 + $0x2a4] ss:$16 sps:$4 sm:$0xff]  }
 0x428   :  { %6036 = vmatpush1.bf16.msra.mxu0 %v8254_v34  ;;  %6118 = vmatpush1.bf16.msra.mxu1 %v8257_v35  ;;  %v8301_v34 = vld [vmem:[#allocation13 + $0x2ac] ss:$16 sps:$4 sm:$0xff]   ;;  %v8296_v35 = vld [vmem:[#allocation13 + $0x2a0] ss:$16 sps:$4 sm:$0xff]  }
 0x429   :  { %6037 = vmatprep.subr.bf16.mxu0 %v8262_v36  ;;  %6119 = vmatprep.subr.bf16.mxu1 %v8265_v37  ;;  %v8299_v36 = vld [vmem:[#allocation13 + $0x2a8] ss:$16 sps:$4 sm:$0xff]   ;;  %v8304_v37 = vld [vmem:[#allocation13 + $0x2c4] ss:$16 sps:$4 sm:$0xff]  }
 0x42c   :  { %6038 = vmatpush1.bf16.msra.mxu0 %v8260_v38  ;;  %6120 = vmatpush1.bf16.msra.mxu1 %v8263_v39  ;;  %v8307_v38 = vld [vmem:[#allocation13 + $0x2cc] ss:$16 sps:$4 sm:$0xff]   ;;  %v8302_v39 = vld [vmem:[#allocation13 + $0x2c0] ss:$16 sps:$4 sm:$0xff]  }
 0x42d   :  { %6048 = vmatprep.subr.bf16.mxu0 %v8268_v9  ;;  %6130 = vmatprep.subr.bf16.mxu1 %v8271_v40  ;;  %v8305_v9 = vld [vmem:[#allocation13 + $0x2c8] ss:$16 sps:$4 sm:$0xff]   ;;  %v8310_v40 = vld [vmem:[#allocation13 + $0x2e4] ss:$16 sps:$4 sm:$0xff]  }
 0x4c2   :  { %v5090_v48 = vpop.f32.mrb[4].mxu0  ;;  %v5172_v49 = vpop.f32.mrb[4].mxu1 }
 0x4c3   :  { %v7061_v52 = vadd.f32 %v5090_v48, %v4358_v16  ;;  %v7063_v53 = vadd.f32 %v5172_v49, %v4366_v43  ;;  %v5092_v54 = vpop.f32.mrb[5].mxu0  ;;  %v5174_v55 = vpop.f32.mrb[5].mxu1  ;;  %v8311_v16 = vld [vmem:[#allocation13 + $0x2e8] ss:$16 sps:$4 sm:$0xff]   ;;  %v8316_v43 = vld [vmem:[#allocation13 + $0x304] ss:$16 sps:$4 sm:$0xff]  }
 0x4c4   :  { %v7062_v56 = vadd.f32 %v5092_v54, %v4362_v44  ;;  %v7064_v57 = vadd.f32 %v5174_v55, %v4370_v45  ;;  %v5094_v58 = vpop.f32.mrb[6].mxu0  ;;  %v5176_v59 = vpop.f32.mrb[6].mxu1  ;;  %v8319_v44 = vld [vmem:[#allocation13 + $0x30c] ss:$16 sps:$4 sm:$0xff]   ;;  %v8314_v45 = vld [vmem:[#allocation13 + $0x300] ss:$16 sps:$4 sm:$0xff]  }
 0x4c5   :  { %vm5179_vm0 = vcmp.ge.f32.partialorder %v7061_v52, 0.0  ;;  %v5205_v60 = vmul.f32 %v7061_v52, %v5188_v46  ;;  %vm5181_vm1 = vcmp.ge.f32.partialorder %v7063_v53, 0.0  ;;  %v5207_v61 = vmul.f32 %v7063_v53, %v5196_v47  ;;  %v5095_v62 = vpop.f32.mrb[7].mxu0  ;;  %v5177_v63 = vpop.f32.mrb[7].mxu1  ;;  %v8317_v46 = vld [vmem:[#allocation13 + $0x308] ss:$16 sps:$4 sm:$0xff]  }
 0x4c6   :  { %vm5180_vm2 = vcmp.ge.f32.partialorder %v7062_v56, 0.0  ;;  %v5206_v0 = vmul.f32 %v7062_v56, %v5192_v50  ;;  %vm5182_vm3 = vcmp.ge.f32.partialorder %v7064_v57, 0.0  ;;  %v5208_v1 = vmul.f32 %v7064_v57, %v5200_v51  ;;  %v8322_v47 = vld [vmem:[#allocation13 + $0x324] ss:$16 sps:$4 sm:$0xff]   ;;  %v8325_v48 = vld [vmem:[#allocation13 + $0x32c] ss:$16 sps:$4 sm:$0xff]  }
 0x4c7   :  { %v5209_v2 = vsel %vm5179_vm0, %v7061_v52, %v5205_v60  ;;  %v8834_v3 = vsel %vm5181_vm1, %v7063_v53, %v5207_v61  ;;  %v8320_v49 = vld [vmem:[#allocation13 + $0x320] ss:$16 sps:$4 sm:$0xff]   ;;  %v8323_v50 = vld [vmem:[#allocation13 + $0x328] ss:$16 sps:$4 sm:$0xff]   ;;  %v8328_v51 = vld [vmem:[#allocation13 + $0x344] ss:$16 sps:$4 sm:$0xff]  }
 0x4c8   :  { %v5210_v4 = vsel %vm5180_vm2, %v7062_v56, %v5206_v0  ;;  %v5212_v13 = vsel %vm5182_vm3, %v7064_v57, %v5208_v1  ;;  %v5213_v14 = vpack.c.bf16 %v5209_v2, %v5209_v2  ;;  %v8331_v52 = vld [vmem:[#allocation13 + $0x34c] ss:$16 sps:$4 sm:$0xff]   ;;  %v8326_v53 = vld [vmem:[#allocation13 + $0x340] ss:$16 sps:$4 sm:$0xff]   ;;  %v8329_v54 = vld [vmem:[#allocation13 + $0x348] ss:$16 sps:$4 sm:$0xff]  }
 0x4c9   :  { %v5214_v5 = vpack.c.bf16 %v5210_v4, %v5210_v4  ;;  %v5216_v18 = vpack.c.bf16 %v5212_v13, %v5212_v13  ;;  %v8334_v55 = vld [vmem:[#allocation13 + $0x364] ss:$16 sps:$4 sm:$0xff]   ;;  %v8337_v56 = vld [vmem:[#allocation13 + $0x36c] ss:$16 sps:$4 sm:$0xff]   ;;  %v8332_v57 = vld [vmem:[#allocation13 + $0x360] ss:$16 sps:$4 sm:$0xff]  }
 0x4ca   :  { %v8335_v58 = vld [vmem:[#allocation13 + $0x368] ss:$16 sps:$4 sm:$0xff]   ;;  %v8340_v59 = vld [vmem:[#allocation13 + $0x384] ss:$16 sps:$4 sm:$0xff]   ;;  %v8343_v60 = vld [vmem:[#allocation13 + $0x38c] ss:$16 sps:$4 sm:$0xff]  }
 0x4cb   :  { %6039 = vmatprep.mubr.bf16.mxu0 %v5214_v5  ;;  %6121 = vmatprep.mubr.bf16.mxu1 %v5214_v5  ;;  %v8338_v61 = vld [vmem:[#allocation13 + $0x380] ss:$16 sps:$4 sm:$0xff]   ;;  %v8341_v62 = vld [vmem:[#allocation13 + $0x388] ss:$16 sps:$4 sm:$0xff]   ;;  %v8346_v63 = vld [vmem:[#allocation13 + $0x3a4] ss:$16 sps:$4 sm:$0xff]  }
 0x4cc   :  { %6040 = vmatmul.mubr.bf16.vlgmr.msra.gmra.mrb[8].mxu0 %v5213_v14  ;;  %6122 = vmatmul.mubr.bf16.vlgmr.msra.gmra.mrb[8].mxu1 %v5213_v14  ;;  %v8349_v0 = vld [vmem:[#allocation13 + $0x3ac] ss:$16 sps:$4 sm:$0xff]   ;;  %v8344_v1 = vld [vmem:[#allocation13 + $0x3a0] ss:$16 sps:$4 sm:$0xff]   ;;  %v8347_v2 = vld [vmem:[#allocation13 + $0x3a8] ss:$16 sps:$4 sm:$0xff]  }
 0x4cd   :  { %6049 = vmatpush1.bf16.msra.mxu0 %v8266_v6  ;;  %6131 = vmatpush1.bf16.msra.mxu1 %v8269_v12  ;;  %v8352_v4 = vld [vmem:[#allocation13 + $0x3c4] ss:$16 sps:$4 sm:$0xff]   ;;  %v8355_v5 = vld [vmem:[#allocation13 + $0x3cc] ss:$16 sps:$4 sm:$0xff]   ;;  %v8350_v6 = vld [vmem:[#allocation13 + $0x3c0] ss:$16 sps:$4 sm:$0xff]  }
 0x4ce   :  { %6080 = vmatprep.mubr.bf16.mxu0 %v5216_v18  ;;  %6162 = vmatprep.mubr.bf16.mxu1 %v5216_v18  ;;  %v8353_v12 = vld [vmem:[#allocation13 + $0x3c8] ss:$16 sps:$4 sm:$0xff]   ;;  %v8358_v13 = vld [vmem:[#allocation13 + $0x3e4] ss:$16 sps:$4 sm:$0xff]   ;;  %v8361_v14 = vld [vmem:[#allocation13 + $0x3ec] ss:$16 sps:$4 sm:$0xff]   ;;  %v5215_v18 = vpack.c.bf16 %v8834_v3, %v8834_v3 }
 0x4cf   :  { %6050 = vmatprep.subr.bf16.mxu0 %v8274_v15  ;;  %6132 = vmatprep.subr.bf16.mxu1 %v8277_v17  ;;  %v8356_v15 = vld [vmem:[#allocation13 + $0x3e0] ss:$16 sps:$4 sm:$0xff]   ;;  %v8359_v17 = vld [vmem:[#allocation13 + $0x3e8] ss:$16 sps:$4 sm:$0xff]  }
 0x4d1   :  { %6051 = vmatpush1.bf16.msra.mxu0 %v8272_v19  ;;  %6133 = vmatpush1.bf16.msra.mxu1 %v8275_v20  ;;  %v5345_v19 = vld [vmem:[#allocation14] sm:$0xf]  ;;  %v6175_v20 = vld [vmem:[#allocation16] sm:$0xf] }
 0x4d2   :  { %6052 = vmatprep.subr.bf16.mxu0 %v8280_v21  ;;  %6134 = vmatprep.subr.bf16.mxu1 %v8283_v22  ;;  %v5350_v21 = vrot.slane %v5345_v19, %v8802_v8  ;;  %v5358_v22 = vrot.slane %v5345_v19, %v8821_v25  ;;  %v6184_v3 = vrot.slane %v6175_v20, %v8807_v10 }
 0x4d5   :  { %6053 = vmatpush1.bf16.msra.mxu0 %v8278_v23  ;;  %6135 = vmatpush1.bf16.msra.mxu1 %v8281_v24  ;;  %v5354_v23 = vrot.slane %v5345_v19, %v8807_v10  ;;  %v5362_v24 = vrot.slane %v5345_v19, %v8810_v11 }
 0x4d6   :  { %6054 = vmatprep.subr.bf16.mxu0 %v8286_v26  ;;  %6136 = vmatprep.subr.bf16.mxu1 %v8289_v27  ;;  %v6180_v26 = vrot.slane %v6175_v20, %v8802_v8  ;;  %v6188_v27 = vrot.slane %v6175_v20, %v8821_v25 }
 0x4d9   :  { %6055 = vmatpush1.bf16.msra.mxu0 %v8284_v28  ;;  %6137 = vmatpush1.bf16.msra.mxu1 %v8287_v29  ;;  %v6205_v28 = vld [vmem:[#allocation17] sm:$0xf] }
 0x4da   :  { %6056 = vmatprep.subr.bf16.mxu0 %v8292_v30  ;;  %6138 = vmatprep.subr.bf16.mxu1 %v8295_v31  ;;  %v6192_v31 = vrot.slane %v6175_v20, %v8810_v11 }
 0x4dd   :  { %6057 = vmatpush1.bf16.msra.mxu0 %v8290_v32  ;;  %6139 = vmatpush1.bf16.msra.mxu1 %v8293_v33 }
 0x4de   :  { %6058 = vmatprep.subr.bf16.mxu0 %v8298_v7  ;;  %6140 = vmatprep.subr.bf16.mxu1 %v8301_v34 }
 0x4e1   :  { %6059 = vmatpush1.bf16.msra.mxu0 %v8296_v35  ;;  %6141 = vmatpush1.bf16.msra.mxu1 %v8299_v36 }
 0x4e2   :  { %6060 = vmatprep.subr.bf16.mxu0 %v8304_v37  ;;  %6142 = vmatprep.subr.bf16.mxu1 %v8307_v38 }
 0x4e5   :  { %6061 = vmatpush1.bf16.msra.mxu0 %v8302_v39  ;;  %6143 = vmatpush1.bf16.msra.mxu1 %v8305_v9  ;;  %v6210_v39 = vrot.slane %v6205_v28, %v8802_v8  ;;  %v6214_v9 = vrot.slane %v6205_v28, %v8807_v10  ;;  %v6222_v8 = vrot.slane %v6205_v28, %v8810_v11 }
 0x4e6   :  { %6062 = vmatprep.subr.bf16.mxu0 %v8310_v40  ;;  %6144 = vmatprep.subr.bf16.mxu1 %v8313_v41 }
 0x4e9   :  { %6063 = vmatpush1.bf16.msra.mxu0 %v8308_v42  ;;  %6145 = vmatpush1.bf16.msra.mxu1 %v8311_v16 }
 0x4ea   :  { %6064 = vmatprep.subr.bf16.mxu0 %v8316_v43  ;;  %6146 = vmatprep.subr.bf16.mxu1 %v8319_v44 }
 0x4ed   :  { %6065 = vmatpush1.bf16.msra.mxu0 %v8314_v45  ;;  %6147 = vmatpush1.bf16.msra.mxu1 %v8317_v46  ;;  %v6218_v46 = vrot.slane %v6205_v28, %v8821_v25 }
 0x4ee   :  { %6066 = vmatprep.subr.bf16.mxu0 %v8322_v47  ;;  %6148 = vmatprep.subr.bf16.mxu1 %v8325_v48 }
 0x4f1   :  { %6067 = vmatpush1.bf16.msra.mxu0 %v8320_v49  ;;  %6149 = vmatpush1.bf16.msra.mxu1 %v8323_v50 }
 0x4f2   :  { %6068 = vmatprep.subr.bf16.mxu0 %v8328_v51  ;;  %6150 = vmatprep.subr.bf16.mxu1 %v8331_v52 }
 0x4f5   :  { %6069 = vmatpush1.bf16.msra.mxu0 %v8326_v53  ;;  %6151 = vmatpush1.bf16.msra.mxu1 %v8329_v54 }
 0x4f6   :  { %6070 = vmatprep.subr.bf16.mxu0 %v8334_v55  ;;  %6152 = vmatprep.subr.bf16.mxu1 %v8337_v56  ;;  %v7056_v56 = vld [vmem:[#allocation2] ss:$0 sm:$0xff] }
 0x4f9   :  { %6071 = vmatpush1.bf16.msra.mxu0 %v8332_v57  ;;  %6153 = vmatpush1.bf16.msra.mxu1 %v8335_v58 }
 0x4fa   :  { %6072 = vmatprep.subr.bf16.mxu0 %v8340_v59  ;;  %6154 = vmatprep.subr.bf16.mxu1 %v8343_v60 }
 0x4fd   :  { %6073 = vmatpush1.bf16.msra.mxu0 %v8338_v61  ;;  %6155 = vmatpush1.bf16.msra.mxu1 %v8341_v62 }
 0x4fe   :  { %6074 = vmatprep.subr.bf16.mxu0 %v8346_v63  ;;  %6156 = vmatprep.subr.bf16.mxu1 %v8349_v0 }
 0x501   :  { %6075 = vmatpush1.bf16.msra.mxu0 %v8344_v1  ;;  %6157 = vmatpush1.bf16.msra.mxu1 %v8347_v2 }
 0x502   :  { %6076 = vmatprep.subr.bf16.mxu0 %v8352_v4  ;;  %6158 = vmatprep.subr.bf16.mxu1 %v8355_v5 }
 0x505   :  { %6077 = vmatpush1.bf16.msra.mxu0 %v8350_v6  ;;  %6159 = vmatpush1.bf16.msra.mxu1 %v8353_v12 }
 0x506   :  { %6078 = vmatprep.subr.bf16.mxu0 %v8358_v13  ;;  %6160 = vmatprep.subr.bf16.mxu1 %v8361_v14 }
 0x509   :  { %6079 = vmatpush1.bf16.msra.mxu0 %v8356_v15  ;;  %6161 = vmatpush1.bf16.msra.mxu1 %v8359_v17 }
 0x50c   :  { %6081 = vmatmul.mubr.bf16.vlgmr.msra.gmra.mrb[8].mxu0 %v5215_v18  ;;  %6163 = vmatmul.mubr.bf16.vlgmr.msra.gmra.mrb[8].mxu1 %v5215_v18 }
 0x5df   :  { %v6082_v29 = vpop.f32.mrb[8].mxu0  ;;  %v6164_v30 = vpop.f32.mrb[8].mxu1 }
 0x5e0   :  { %v7065_v32 = vadd.f32 %v6082_v29, %v5350_v21  ;;  %v7067_v33 = vadd.f32 %v6164_v30, %v5358_v22  ;;  %v6084_v7 = vpop.f32.mrb[9].mxu0  ;;  %v6166_v34 = vpop.f32.mrb[9].mxu1 }
 0x5e1   :  { %v7066_v35 = vadd.f32 %v6084_v7, %v5354_v23  ;;  %v7068_v36 = vadd.f32 %v6166_v34, %v5362_v24  ;;  %v6086_v37 = vpop.f32.mrb[10].mxu0  ;;  %v6168_v38 = vpop.f32.mrb[10].mxu1 }
 0x5e2   :  { %vm6171_vm4 = vcmp.ge.f32.partialorder %v7065_v32, 0.0  ;;  %v6197_v40 = vmul.f32 %v7065_v32, %v6180_v26  ;;  %vm6173_vm5 = vcmp.ge.f32.partialorder %v7067_v33, 0.0  ;;  %v6199_v41 = vmul.f32 %v7067_v33, %v6188_v27  ;;  %v6087_v42 = vpop.f32.mrb[11].mxu0  ;;  %v6169_v16 = vpop.f32.mrb[11].mxu1 }
 0x5e3   :  { %vm6172_vm6 = vcmp.ge.f32.partialorder %v7066_v35, 0.0  ;;  %v6198_v43 = vmul.f32 %v7066_v35, %v6184_v3  ;;  %v6200_v44 = vmul.f32 %v7068_v36, %v6192_v31  ;;  %vm6174_vm7 = vcmp.ge.f32.partialorder %v7068_v36, 0.0 }
 0x5e4   :  { %v6201_v45 = vsel %vm6171_vm4, %v7065_v32, %v6197_v40  ;;  %v6203_v48 = vsel %vm6173_vm5, %v7067_v33, %v6199_v41 }
 0x5e5   :  { %v6202_v47 = vsel %vm6172_vm6, %v7066_v35, %v6198_v43  ;;  %v6227_v49 = vmul.f32 %v6210_v39, %v6201_v45  ;;  %v6204_v10 = vsel %vm6174_vm7, %v7068_v36, %v6200_v44  ;;  %v6229_v51 = vmul.f32 %v6218_v46, %v6203_v48 }
 0x5e6   :  { %v6228_v50 = vmul.f32 %v6214_v9, %v6202_v47  ;;  %v6230_v53 = vmul.f32 %v6222_v8, %v6204_v10 }
 0x5e8   :  { %v6231_v52 = vadd.f32 %v6228_v50, %v6227_v49 }
 0x5ea   :  { %v6232_v54 = vadd.f32 %v6231_v52, %v6229_v51 }
 0x5ec   :  { %v6233_v55 = vadd.f32 %v6232_v54, %v6230_v53 }
 0x5ee   :  { %6234 = vadd.xlane.f32.xlu0 %v6233_v55 }
 0x67b   :  { %v6235_v57 = vpop.xlane.xlu0 %6234 }
 0x67c   :  { %v6243_v58 = vadd.f32 %v7056_v56, %v6235_v57 }
 0x67e   :  { %6245 = vst.msk [vmem:[%s8864_s11] sm:$0xff] %vm6244_vm8, %v6243_v58 }
 0x67f   :  { %6250 = vsyncpa [#allocation4], 1 }
 0x680   :  { %6251 = vsyncpa [#allocation6], 1 }
 0x681   :  { %6252 = vsyncpa [#allocation9], 1 }
 0x682   :  { %6253 = vsyncpa [#allocation12], 1 }
 0x683   :  { %6254 = vsyncpa [#allocation15], 1 }
 0x684   :  { %6255 = vsyncpa [#allocation18], 1 }

</bundles_post_ra>
